<compile_context>
chip_gen: v6e
topology: v6e:2x2x1
jax: 0.10.0
libtpu: 0.0.40
codegen_flags: <defaults>
</compile_context>

<pallas_src>
import functools

import jax
import jax.numpy as jnp
import numpy as np
from jax.experimental import pallas as pl
from jax.experimental.pallas import tpu as pltpu

# Cast MXU matmul operands to this dtype. float32 keeps parity with the pure-JAX
# reference at the toy config below; set to jnp.bfloat16 for scaled-up configs.
MXU_DTYPE = jnp.float32

LANE = 128                      # gate spans / class dim padded to the lane width
SUBLANE = 8                     # f32 sublane tile; batch blocks are multiples of this
MAX_BATCH_BLOCK = 256           # MXU M-rows target ceiling per grid step
VMEM_BUDGET = 48 * 1024 * 1024  # activation+weight budget used to size the batch block
VMEM_DEFAULT_LIMIT = 24 * 1024 * 1024   # raise scoped-vmem only above this estimate
HSEQ_SCRATCH_BYTES = 512 * 1024         # switch h-list -> VMEM scratch above this


def _round_up(x, m):
    return ((x + m - 1) // m) * m


def _act_row_bytes(T, E, Hp, Cp):
    # f32 bytes of per-batch-row activations resident in VMEM: double-buffered
    # input/output blocks, the hoisted xp = x @ W_ih intermediate (the big one),
    # the per-layer hidden sequence and the dense logits.
    return 4 * T * (2 * E + 4 * Hp + 2 * Hp + 3 * Cp)


def _pick_batch_block(B, T, E, Hp, Cp, weight_bytes):
    """Largest multiple-of-8 batch block that fits the VMEM budget (<=256 rows)."""
    row = _act_row_bytes(T, E, Hp, Cp)
    avail = max(VMEM_BUDGET - 2 * weight_bytes, 8 * row)
    cap = (avail // row) // SUBLANE * SUBLANE
    cap = min(MAX_BATCH_BLOCK, max(SUBLANE, cap))
    b_pad = _round_up(B, SUBLANE)
    Bb = min(b_pad, cap)
    # v7x megacore: if everything fits in one block but halving still leaves a
    # well-fed MXU (>=128 rows), split into two grid steps so both cores get work.
    if Bb == b_pad and Bb >= 128 and (Bb // 2) % SUBLANE == 0:
        Bb //= 2
    Bp = _round_up(B, Bb)
    return Bb, Bp


# ----------------------------------------------------------------------------
# Fused Pallas kernel: all LSTM layers + dense + log_softmax for one batch block.
# ----------------------------------------------------------------------------
def _make_fused_kernel(num_layers, T, Bb, Hp, C, Cp, use_hseq_scratch):
    n_in = 1 + 3 * num_layers + 2

    def kernel(*refs):
        x_ref = refs[0]                               # (T, Bb, E) time-major
        layer_refs = refs[1:1 + 3 * num_layers]       # (w_ih, w_hh, b) per layer
        dw_ref = refs[1 + 3 * num_layers]             # (Hp, Cp)
        db_ref = refs[2 + 3 * num_layers]             # (1, Cp)
        out_ref = refs[n_in]                          # (T, Bb, Cp)
        hseq_ref = refs[n_in + 1] if use_hseq_scratch else None  # (T, Bb, Hp)

        e_dim = x_ref.shape[-1]
        # Bb is a multiple of 8, so collapsing (T, Bb) -> T*Bb rows is a
        # layout-preserving, sublane-aligned reshape.
        seq = x_ref[...].reshape(T * Bb, e_dim)

        for l in range(num_layers):
            w_ih = layer_refs[3 * l][...]             # (in_dim, 4*Hp)
            w_hh = layer_refs[3 * l + 1][...]         # (Hp, 4*Hp)
            bias = layer_refs[3 * l + 2][...]         # (1, 4*Hp), f32

            # Hoisted input projection: ONE batched matmul over all timesteps keeps
            # x @ W_ih and the bias add off the serial recurrence path.
            xp = jnp.dot(seq.astype(w_ih.dtype), w_ih,
                         preferred_element_type=jnp.float32) + bias
            xp = xp.reshape(T, Bb, 4 * Hp)            # time-major: xp[t] is contiguous

            h = jnp.zeros((Bb, Hp), jnp.float32)
            c = jnp.zeros((Bb, Hp), jnp.float32)
            hs = []

            # Fully unrolled in-kernel recurrence: only h @ W_hh + gate activations
            # are on the serial path; xp[t] is a whole (Bb, 4*Hp) tile read.
            for t in range(T):
                gates = xp[t] + jnp.dot(h.astype(w_hh.dtype), w_hh,
                                        preferred_element_type=jnp.float32)
                # Gate spans are 128-lane aligned (Hp multiple of 128): whole-vreg
                # picks, no XLU lane shuffles.
                i_g = jax.nn.sigmoid(gates[:, 0 * Hp:1 * Hp])
                f_g = jax.nn.sigmoid(gates[:, 1 * Hp:2 * Hp])
                g_g = jnp.tanh(gates[:, 2 * Hp:3 * Hp])
                o_g = jax.nn.sigmoid(gates[:, 3 * Hp:4 * Hp])
                c = f_g * c + i_g * g_g
                h = o_g * jnp.tanh(c)
                if use_hseq_scratch:
                    hseq_ref[t] = h                   # contiguous (Bb, Hp) tile store
                else:
                    hs.append(h)                      # stays in vregs for small T

            if use_hseq_scratch:
                seq = hseq_ref[...].reshape(T * Bb, Hp)
            else:
                seq = jnp.concatenate(hs, axis=0)     # (T*Bb, Hp), sublane-aligned

        # Dense + log_softmax epilogue (lane-dense padded class dim, masked).
        logits = jnp.dot(seq.astype(dw_ref.dtype), dw_ref[...],
                         preferred_element_type=jnp.float32) + db_ref[...]
        lane_id = jax.lax.broadcasted_iota(jnp.int32, logits.shape, 1)
        logits = jnp.where(lane_id < C, logits, jnp.float32(-1e30))
        m = jnp.max(logits, axis=-1, keepdims=True)
        shifted = logits - m
        lse = jnp.log(jnp.sum(jnp.exp(shifted), axis=-1, keepdims=True))
        out_ref[...] = (shifted - lse).reshape(T, Bb, Cp).astype(out_ref.dtype)

    return kernel


def _fused_forward(x_tm, layers, dense_w, dense_b, H, C):
    """x_tm: (T, B, E) f32 time-major -> (T, Bp, Cp) log-probs (padding included)."""
    del H
    T, B, E = x_tm.shape
    Hp = layers[0]["w_hh"].shape[0]
    Cp = dense_w.shape[1]
    num_layers = len(layers)

    weight_bytes = 0
    for lp in layers:
        for w in (lp["w_ih"], lp["w_hh"], lp["b"]):
            weight_bytes += w.size * w.dtype.itemsize
    weight_bytes += dense_w.size * dense_w.dtype.itemsize
    weight_bytes += dense_b.size * dense_b.dtype.itemsize

    Bb, Bp = _pick_batch_block(B, T, E, Hp, Cp, weight_bytes)
    nb = Bp // Bb
    if Bp != B:
        # Zero-padded batch rows: extra throwaway work, sliced off in the wrapper.
        x_tm = jnp.pad(x_tm, ((0, 0), (0, Bp - B), (0, 0)))

    est_bytes = 2 * weight_bytes + Bb * _act_row_bytes(T, E, Hp, Cp)
    use_hseq_scratch = T * Bb * Hp * 4 > HSEQ_SCRATCH_BYTES
    vmem_limit = None
    if est_bytes > VMEM_DEFAULT_LIMIT:
        # Leave headroom under v7x's 64 MiB physical VMEM.
        vmem_limit = int(min(est_bytes * 1.25, 56 * 1024 * 1024))

    kernel = _make_fused_kernel(num_layers, T, Bb, Hp, C, Cp, use_hseq_scratch)

    in_specs = [pl.BlockSpec((T, Bb, E), lambda b: (0, b, 0))]
    args = [x_tm]
    for lp in layers:
        in_specs += [
            pl.BlockSpec(lp["w_ih"].shape, lambda b: (0, 0)),   # resident weights
            pl.BlockSpec(lp["w_hh"].shape, lambda b: (0, 0)),
            pl.BlockSpec(lp["b"].shape, lambda b: (0, 0)),
        ]
        args += [lp["w_ih"], lp["w_hh"], lp["b"]]
    in_specs += [
        pl.BlockSpec(dense_w.shape, lambda b: (0, 0)),
        pl.BlockSpec(dense_b.shape, lambda b: (0, 0)),
    ]
    args += [dense_w, dense_b]

    scratch_shapes = []
    if use_hseq_scratch:
        scratch_shapes.append(pltpu.VMEM((T, Bb, Hp), jnp.float32))

    return pl.pallas_call(
        kernel,
        out_shape=jax.ShapeDtypeStruct((T, Bp, Cp), jnp.float32),
        grid_spec=pltpu.PrefetchScalarGridSpec(
            num_scalar_prefetch=0,
            grid=(nb,),                               # independent batch blocks
            in_specs=in_specs,
            out_specs=pl.BlockSpec((T, Bb, Cp), lambda b: (0, b, 0)),
            scratch_shapes=scratch_shapes,
        ),
        compiler_params=pltpu.CompilerParams(
            # Batch axis is embarrassingly parallel -> megacore sharding on v7x.
            dimension_semantics=("parallel",),
            vmem_limit_bytes=vmem_limit,
        ),
    )(*args)


# ----------------------------------------------------------------------------
# Parameters: raw (PyTorch-equivalent, used by the reference) + padded (kernel).
# ----------------------------------------------------------------------------
def init_params(key, vocab_size, embedding_dim, hidden_dim, num_layers, num_out):
    params = {}
    k_emb, key = jax.random.split(key)
    params["embedding"] = jax.random.normal(
        k_emb, (vocab_size, embedding_dim), jnp.float32
    )
    bound = 1.0 / np.sqrt(hidden_dim)
    layers = []
    for layer in range(num_layers):
        in_dim = embedding_dim if layer == 0 else hidden_dim
        k1, k2, k3, k4, key = jax.random.split(key, 5)
        w_ih = jax.random.uniform(
            k1, (in_dim, 4 * hidden_dim), jnp.float32, -bound, bound
        )
        w_hh = jax.random.uniform(
            k2, (hidden_dim, 4 * hidden_dim), jnp.float32, -bound, bound
        )
        # PyTorch keeps b_ih and b_hh separately; their sum is what enters the gates.
        b_ih = jax.random.uniform(k3, (4 * hidden_dim,), jnp.float32, -bound, bound)
        b_hh = jax.random.uniform(k4, (4 * hidden_dim,), jnp.float32, -bound, bound)
        layers.append({"w_ih": w_ih, "w_hh": w_hh, "b": (b_ih + b_hh)[None, :]})
    params["lstm"] = layers
    k_w, k_b, key = jax.random.split(key, 3)
    d_bound = 1.0 / np.sqrt(hidden_dim)
    params["dense_w"] = jax.random.uniform(
        k_w, (hidden_dim, num_out), jnp.float32, -d_bound, d_bound
    )
    params["dense_b"] = jax.random.uniform(
        k_b, (1, num_out), jnp.float32, -d_bound, d_bound
    )
    return params


def pad_params(raw, hidden_dim, num_out, mxu_dtype=MXU_DTYPE):
    """Pad hidden dim to Hp (multiple of 128) and classes to Cp (multiple of 128).

    Padded weight/bias entries are zero, so padded hidden units stay exactly zero
    through the recurrence and contribute nothing downstream."""
    H, C = hidden_dim, num_out
    Hp = _round_up(H, LANE)
    Cp = _round_up(C, LANE)

    def pad_gate_cols(w):
        # (in_dim, 4H) -> (in_dim, 4Hp), gate k's H columns placed at [k*Hp, k*Hp+H)
        out = jnp.zeros((w.shape[0], 4 * Hp), jnp.float32)
        for k in range(4):
            out = out.at[:, k * Hp:k * Hp + H].set(w[:, k * H:(k + 1) * H])
        return out

    layers = []
    for l, lp in enumerate(raw["lstm"]):
        w_ih = pad_gate_cols(lp["w_ih"])                       # (in_dim, 4Hp)
        if l > 0:
            w_ih = jnp.pad(w_ih, ((0, Hp - H), (0, 0)))        # (Hp, 4Hp)
        w_hh = jnp.pad(pad_gate_cols(lp["w_hh"]), ((0, Hp - H), (0, 0)))
        bias = pad_gate_cols(lp["b"])                          # (1, 4Hp), stays f32
        layers.append({
            "w_ih": w_ih.astype(mxu_dtype),
            "w_hh": w_hh.astype(mxu_dtype),
            "b": bias,
        })
    dense_w = jnp.pad(raw["dense_w"], ((0, Hp - H), (0, Cp - C))).astype(mxu_dtype)
    dense_b = jnp.pad(raw["dense_b"], ((0, 0), (0, Cp - C)))
    return {
        "embedding": raw["embedding"],
        "layers": layers,
        "dense_w": dense_w,
        "dense_b": dense_b,
    }


# ----------------------------------------------------------------------------
# Forward pass (kernel) and pure-JAX reference.
# ----------------------------------------------------------------------------
@functools.partial(jax.jit, static_argnames=("hidden_dim", "num_out"))
def lstm_forward(padded_params, token_ids, *, hidden_dim, num_out):
    """token_ids: (B, T) int32 -> (B, T, num_out) log-probabilities."""
    B, T = token_ids.shape
    # Embedding lookup (glue, not the hot path) + dropout (identity in eval mode).
    emb = jnp.take(padded_params["embedding"], token_ids, axis=0)    # (B, T, E)
    # Time-major layout for the kernel: per-step xp reads / hidden writes become
    # contiguous (Bb, Hp) tiles instead of single-sublane picks / masked stores.
    x_tm = jnp.transpose(emb, (1, 0, 2))                             # (T, B, E)
    out = _fused_forward(x_tm, padded_params["layers"], padded_params["dense_w"],
                         padded_params["dense_b"], hidden_dim, num_out)
    # (T, Bp, Cp) -> (B, T, num_out): drop batch/class padding, back to batch-major.
    return jnp.transpose(out, (1, 0, 2))[:B, :, :num_out]


def lstm_forward_ref(params, token_ids):
    B, T = token_ids.shape
    emb = jnp.take(params["embedding"], token_ids, axis=0)
    x_seq = jnp.transpose(emb, (1, 0, 2))  # (T, B, E)
    for lp in params["lstm"]:
        H = lp["w_hh"].shape[0]

        def step(carry, x_t, lp=lp, H=H):
            h, c = carry
            gates = x_t @ lp["w_ih"] + h @ lp["w_hh"] + lp["b"]
            i = jax.nn.sigmoid(gates[:, 0 * H:1 * H])
            f = jax.nn.sigmoid(gates[:, 1 * H:2 * H])
            g = jnp.tanh(gates[:, 2 * H:3 * H])
            o = jax.nn.sigmoid(gates[:, 3 * H:4 * H])
            c = f * c + i * g
            h = o * jnp.tanh(c)
            return (h, c), h

        init = (jnp.zeros((B, H), jnp.float32), jnp.zeros((B, H), jnp.float32))
        _, x_seq = jax.lax.scan(step, init, x_seq)
    h2d = jnp.transpose(x_seq, (1, 0, 2)).reshape(B * T, -1)
    logits = h2d @ params["dense_w"] + params["dense_b"]
    return jax.nn.log_softmax(logits, axis=-1).reshape(B, T, -1)


if __name__ == "__main__":
    # Small config consistent with the module:
    #   embedding_dim=32, hidden_dim=32, num_layers=2, dropout (eval => identity),
    #   vocab_size=100, len(Tag_space)=5 -> output dim = 5 + 3 = 8.
    VOCAB_SIZE = 100
    EMBEDDING_DIM = 32
    HIDDEN_DIM = 32
    NUM_LAYERS = 2
    NUM_OUT = 5 + 3
    B, T = 2, 8

    key = jax.random.PRNGKey(0)
    k_params, k_ids = jax.random.split(key)
    raw_params = init_params(
        k_params, VOCAB_SIZE, EMBEDDING_DIM, HIDDEN_DIM, NUM_LAYERS, NUM_OUT
    )
    padded_params = pad_params(raw_params, HIDDEN_DIM, NUM_OUT)
    token_ids = jax.random.randint(k_ids, (B, T), 0, VOCAB_SIZE, dtype=jnp.int32)

    out = lstm_forward(padded_params, token_ids,
                       hidden_dim=HIDDEN_DIM, num_out=NUM_OUT)
    out = jax.block_until_ready(out)
    assert out.shape == (B, T, NUM_OUT), out.shape

    ref = jax.block_until_ready(lstm_forward_ref(raw_params, token_ids))
    np.testing.assert_allclose(np.asarray(out), np.asarray(ref), rtol=1e-2, atol=1e-2)

    print("KERNEL_OK")
</pallas_src>

<mosaic_0001>
module attributes {stable_mosaic.version = 11 : i64} {
  func.func @kernel(%arg0: i32, %arg1: memref<8x8x32xf32, #tpu.memory_space<vmem>>, %arg2: memref<32x512xf32, #tpu.memory_space<vmem>>, %arg3: memref<128x512xf32, #tpu.memory_space<vmem>>, %arg4: memref<1x512xf32, #tpu.memory_space<vmem>>, %arg5: memref<128x512xf32, #tpu.memory_space<vmem>>, %arg6: memref<128x512xf32, #tpu.memory_space<vmem>>, %arg7: memref<1x512xf32, #tpu.memory_space<vmem>>, %arg8: memref<128x128xf32, #tpu.memory_space<vmem>>, %arg9: memref<1x128xf32, #tpu.memory_space<vmem>>, %arg10: memref<8x8x128xf32, #tpu.memory_space<vmem>>) attributes {dimension_semantics = [#tpu.dimension_semantics<parallel>], iteration_bounds = array<i64: 1>, scalar_prefetch = 0 : i64, scratch_operands = 0 : i64, tpu.core_type = #tpu.core_type<tc>, window_params = [{transform_indices = @transform_0, window_bounds = array<i64: 8, 8, 32>}, {pipeline_mode = #tpu.pipeline_mode<synchronous>, transform_indices = @transform_1, window_bounds = array<i64: 32, 512>}, {pipeline_mode = #tpu.pipeline_mode<synchronous>, transform_indices = @transform_2, window_bounds = array<i64: 128, 512>}, {pipeline_mode = #tpu.pipeline_mode<synchronous>, transform_indices = @transform_3, window_bounds = array<i64: 1, 512>}, {pipeline_mode = #tpu.pipeline_mode<synchronous>, transform_indices = @transform_4, window_bounds = array<i64: 128, 512>}, {pipeline_mode = #tpu.pipeline_mode<synchronous>, transform_indices = @transform_5, window_bounds = array<i64: 128, 512>}, {pipeline_mode = #tpu.pipeline_mode<synchronous>, transform_indices = @transform_6, window_bounds = array<i64: 1, 512>}, {pipeline_mode = #tpu.pipeline_mode<synchronous>, transform_indices = @transform_7, window_bounds = array<i64: 128, 128>}, {pipeline_mode = #tpu.pipeline_mode<synchronous>, transform_indices = @transform_8, window_bounds = array<i64: 1, 128>}, {transform_indices = @transform_9, window_bounds = array<i64: 8, 8, 128>}]} {
    %c0 = arith.constant 0 : index
    %c0_0 = arith.constant 0 : index
    %c0_1 = arith.constant 0 : index
    %0 = vector.load %arg1[%c0, %c0_0, %c0_1] : memref<8x8x32xf32, #tpu.memory_space<vmem>>, vector<8x8x32xf32>
    %1 = vector.shape_cast %0 : vector<8x8x32xf32> to vector<64x32xf32>
    %c0_2 = arith.constant 0 : index
    %c0_3 = arith.constant 0 : index
    %2 = vector.load %arg2[%c0_2, %c0_3] : memref<32x512xf32, #tpu.memory_space<vmem>>, vector<32x512xf32>
    %c0_4 = arith.constant 0 : index
    %c0_5 = arith.constant 0 : index
    %3 = vector.load %arg3[%c0_4, %c0_5] : memref<128x512xf32, #tpu.memory_space<vmem>>, vector<128x512xf32>
    %c0_6 = arith.constant 0 : index
    %c0_7 = arith.constant 0 : index
    %4 = vector.load %arg4[%c0_6, %c0_7] : memref<1x512xf32, #tpu.memory_space<vmem>>, vector<1x512xf32>
    %cst = arith.constant dense<0.000000e+00> : vector<64x512xf32>
    %5 = tpu.matmul %1, %2, %cst {dimension_numbers = #tpu.dot_dimension_numbers<[1], [0], [0], [1], [0, 0, 1, 1], [], []>} : vector<64x32xf32>, vector<32x512xf32>, vector<64x512xf32> -> vector<64x512xf32>
    %6 = vector.broadcast %4 : vector<1x512xf32> to vector<64x512xf32>
    %7 = arith.addf %5, %6 : vector<64x512xf32>
    %8 = vector.shape_cast %7 : vector<64x512xf32> to vector<8x8x512xf32>
    %cst_8 = arith.constant 0.000000e+00 : f32
    %9 = vector.broadcast %cst_8 : f32 to vector<8x128xf32>
    %cst_9 = arith.constant 0.000000e+00 : f32
    %10 = vector.broadcast %cst_9 : f32 to vector<8x128xf32>
    %11 = vector.extract_strided_slice %8 {offsets = [0, 0, 0], sizes = [1, 8, 512], strides = [1, 1, 1]} : vector<8x8x512xf32> to vector<1x8x512xf32>
    %12 = vector.shape_cast %11 : vector<1x8x512xf32> to vector<8x512xf32>
    %cst_10 = arith.constant dense<0.000000e+00> : vector<8x512xf32>
    %13 = tpu.matmul %9, %3, %cst_10 {dimension_numbers = #tpu.dot_dimension_numbers<[1], [0], [0], [1], [0, 0, 1, 1], [], []>} : vector<8x128xf32>, vector<128x512xf32>, vector<8x512xf32> -> vector<8x512xf32>
    %14 = arith.addf %12, %13 : vector<8x512xf32>
    %15 = vector.extract_strided_slice %14 {offsets = [0, 0], sizes = [8, 128], strides = [1, 1]} : vector<8x512xf32> to vector<8x128xf32>
    %16 = arith.negf %15 : vector<8x128xf32>
    %17 = math.exp %16 : vector<8x128xf32>
    %cst_11 = arith.constant 1.000000e+00 : f32
    %18 = vector.broadcast %cst_11 : f32 to vector<8x128xf32>
    %19 = arith.addf %18, %17 : vector<8x128xf32>
    %20 = arith.divf %18, %19 : vector<8x128xf32>
    %21 = vector.extract_strided_slice %14 {offsets = [0, 128], sizes = [8, 128], strides = [1, 1]} : vector<8x512xf32> to vector<8x128xf32>
    %22 = arith.negf %21 : vector<8x128xf32>
    %23 = math.exp %22 : vector<8x128xf32>
    %cst_12 = arith.constant 1.000000e+00 : f32
    %24 = vector.broadcast %cst_12 : f32 to vector<8x128xf32>
    %25 = arith.addf %24, %23 : vector<8x128xf32>
    %26 = arith.divf %24, %25 : vector<8x128xf32>
    %27 = vector.extract_strided_slice %14 {offsets = [0, 256], sizes = [8, 128], strides = [1, 1]} : vector<8x512xf32> to vector<8x128xf32>
    %28 = math.tanh %27 : vector<8x128xf32>
    %29 = vector.extract_strided_slice %14 {offsets = [0, 384], sizes = [8, 128], strides = [1, 1]} : vector<8x512xf32> to vector<8x128xf32>
    %30 = arith.negf %29 : vector<8x128xf32>
    %31 = math.exp %30 : vector<8x128xf32>
    %cst_13 = arith.constant 1.000000e+00 : f32
    %32 = vector.broadcast %cst_13 : f32 to vector<8x128xf32>
    %33 = arith.addf %32, %31 : vector<8x128xf32>
    %34 = arith.divf %32, %33 : vector<8x128xf32>
    %35 = arith.mulf %26, %10 : vector<8x128xf32>
    %36 = arith.mulf %20, %28 : vector<8x128xf32>
    %37 = arith.addf %35, %36 : vector<8x128xf32>
    %38 = math.tanh %37 : vector<8x128xf32>
    %39 = arith.mulf %34, %38 : vector<8x128xf32>
    %40 = vector.extract_strided_slice %8 {offsets = [1, 0, 0], sizes = [1, 8, 512], strides = [1, 1, 1]} : vector<8x8x512xf32> to vector<1x8x512xf32>
    %41 = vector.shape_cast %40 : vector<1x8x512xf32> to vector<8x512xf32>
    %cst_14 = arith.constant dense<0.000000e+00> : vector<8x512xf32>
    %42 = tpu.matmul %39, %3, %cst_14 {dimension_numbers = #tpu.dot_dimension_numbers<[1], [0], [0], [1], [0, 0, 1, 1], [], []>} : vector<8x128xf32>, vector<128x512xf32>, vector<8x512xf32> -> vector<8x512xf32>
    %43 = arith.addf %41, %42 : vector<8x512xf32>
    %44 = vector.extract_strided_slice %43 {offsets = [0, 0], sizes = [8, 128], strides = [1, 1]} : vector<8x512xf32> to vector<8x128xf32>
    %45 = arith.negf %44 : vector<8x128xf32>
    %46 = math.exp %45 : vector<8x128xf32>
    %cst_15 = arith.constant 1.000000e+00 : f32
    %47 = vector.broadcast %cst_15 : f32 to vector<8x128xf32>
    %48 = arith.addf %47, %46 : vector<8x128xf32>
    %49 = arith.divf %47, %48 : vector<8x128xf32>
    %50 = vector.extract_strided_slice %43 {offsets = [0, 128], sizes = [8, 128], strides = [1, 1]} : vector<8x512xf32> to vector<8x128xf32>
    %51 = arith.negf %50 : vector<8x128xf32>
    %52 = math.exp %51 : vector<8x128xf32>
    %cst_16 = arith.constant 1.000000e+00 : f32
    %53 = vector.broadcast %cst_16 : f32 to vector<8x128xf32>
    %54 = arith.addf %53, %52 : vector<8x128xf32>
    %55 = arith.divf %53, %54 : vector<8x128xf32>
    %56 = vector.extract_strided_slice %43 {offsets = [0, 256], sizes = [8, 128], strides = [1, 1]} : vector<8x512xf32> to vector<8x128xf32>
    %57 = math.tanh %56 : vector<8x128xf32>
    %58 = vector.extract_strided_slice %43 {offsets = [0, 384], sizes = [8, 128], strides = [1, 1]} : vector<8x512xf32> to vector<8x128xf32>
    %59 = arith.negf %58 : vector<8x128xf32>
    %60 = math.exp %59 : vector<8x128xf32>
    %cst_17 = arith.constant 1.000000e+00 : f32
    %61 = vector.broadcast %cst_17 : f32 to vector<8x128xf32>
    %62 = arith.addf %61, %60 : vector<8x128xf32>
    %63 = arith.divf %61, %62 : vector<8x128xf32>
    %64 = arith.mulf %55, %37 : vector<8x128xf32>
    %65 = arith.mulf %49, %57 : vector<8x128xf32>
    %66 = arith.addf %64, %65 : vector<8x128xf32>
    %67 = math.tanh %66 : vector<8x128xf32>
    %68 = arith.mulf %63, %67 : vector<8x128xf32>
    %69 = vector.extract_strided_slice %8 {offsets = [2, 0, 0], sizes = [1, 8, 512], strides = [1, 1, 1]} : vector<8x8x512xf32> to vector<1x8x512xf32>
    %70 = vector.shape_cast %69 : vector<1x8x512xf32> to vector<8x512xf32>
    %cst_18 = arith.constant dense<0.000000e+00> : vector<8x512xf32>
    %71 = tpu.matmul %68, %3, %cst_18 {dimension_numbers = #tpu.dot_dimension_numbers<[1], [0], [0], [1], [0, 0, 1, 1], [], []>} : vector<8x128xf32>, vector<128x512xf32>, vector<8x512xf32> -> vector<8x512xf32>
    %72 = arith.addf %70, %71 : vector<8x512xf32>
    %73 = vector.extract_strided_slice %72 {offsets = [0, 0], sizes = [8, 128], strides = [1, 1]} : vector<8x512xf32> to vector<8x128xf32>
    %74 = arith.negf %73 : vector<8x128xf32>
    %75 = math.exp %74 : vector<8x128xf32>
    %cst_19 = arith.constant 1.000000e+00 : f32
    %76 = vector.broadcast %cst_19 : f32 to vector<8x128xf32>
    %77 = arith.addf %76, %75 : vector<8x128xf32>
    %78 = arith.divf %76, %77 : vector<8x128xf32>
    %79 = vector.extract_strided_slice %72 {offsets = [0, 128], sizes = [8, 128], strides = [1, 1]} : vector<8x512xf32> to vector<8x128xf32>
    %80 = arith.negf %79 : vector<8x128xf32>
    %81 = math.exp %80 : vector<8x128xf32>
    %cst_20 = arith.constant 1.000000e+00 : f32
    %82 = vector.broadcast %cst_20 : f32 to vector<8x128xf32>
    %83 = arith.addf %82, %81 : vector<8x128xf32>
    %84 = arith.divf %82, %83 : vector<8x128xf32>
    %85 = vector.extract_strided_slice %72 {offsets = [0, 256], sizes = [8, 128], strides = [1, 1]} : vector<8x512xf32> to vector<8x128xf32>
    %86 = math.tanh %85 : vector<8x128xf32>
    %87 = vector.extract_strided_slice %72 {offsets = [0, 384], sizes = [8, 128], strides = [1, 1]} : vector<8x512xf32> to vector<8x128xf32>
    %88 = arith.negf %87 : vector<8x128xf32>
    %89 = math.exp %88 : vector<8x128xf32>
    %cst_21 = arith.constant 1.000000e+00 : f32
    %90 = vector.broadcast %cst_21 : f32 to vector<8x128xf32>
    %91 = arith.addf %90, %89 : vector<8x128xf32>
    %92 = arith.divf %90, %91 : vector<8x128xf32>
    %93 = arith.mulf %84, %66 : vector<8x128xf32>
    %94 = arith.mulf %78, %86 : vector<8x128xf32>
    %95 = arith.addf %93, %94 : vector<8x128xf32>
    %96 = math.tanh %95 : vector<8x128xf32>
    %97 = arith.mulf %92, %96 : vector<8x128xf32>
    %98 = vector.extract_strided_slice %8 {offsets = [3, 0, 0], sizes = [1, 8, 512], strides = [1, 1, 1]} : vector<8x8x512xf32> to vector<1x8x512xf32>
    %99 = vector.shape_cast %98 : vector<1x8x512xf32> to vector<8x512xf32>
    %cst_22 = arith.constant dense<0.000000e+00> : vector<8x512xf32>
    %100 = tpu.matmul %97, %3, %cst_22 {dimension_numbers = #tpu.dot_dimension_numbers<[1], [0], [0], [1], [0, 0, 1, 1], [], []>} : vector<8x128xf32>, vector<128x512xf32>, vector<8x512xf32> -> vector<8x512xf32>
    %101 = arith.addf %99, %100 : vector<8x512xf32>
    %102 = vector.extract_strided_slice %101 {offsets = [0, 0], sizes = [8, 128], strides = [1, 1]} : vector<8x512xf32> to vector<8x128xf32>
    %103 = arith.negf %102 : vector<8x128xf32>
    %104 = math.exp %103 : vector<8x128xf32>
    %cst_23 = arith.constant 1.000000e+00 : f32
    %105 = vector.broadcast %cst_23 : f32 to vector<8x128xf32>
    %106 = arith.addf %105, %104 : vector<8x128xf32>
    %107 = arith.divf %105, %106 : vector<8x128xf32>
    %108 = vector.extract_strided_slice %101 {offsets = [0, 128], sizes = [8, 128], strides = [1, 1]} : vector<8x512xf32> to vector<8x128xf32>
    %109 = arith.negf %108 : vector<8x128xf32>
    %110 = math.exp %109 : vector<8x128xf32>
    %cst_24 = arith.constant 1.000000e+00 : f32
    %111 = vector.broadcast %cst_24 : f32 to vector<8x128xf32>
    %112 = arith.addf %111, %110 : vector<8x128xf32>
    %113 = arith.divf %111, %112 : vector<8x128xf32>
    %114 = vector.extract_strided_slice %101 {offsets = [0, 256], sizes = [8, 128], strides = [1, 1]} : vector<8x512xf32> to vector<8x128xf32>
    %115 = math.tanh %114 : vector<8x128xf32>
    %116 = vector.extract_strided_slice %101 {offsets = [0, 384], sizes = [8, 128], strides = [1, 1]} : vector<8x512xf32> to vector<8x128xf32>
    %117 = arith.negf %116 : vector<8x128xf32>
    %118 = math.exp %117 : vector<8x128xf32>
    %cst_25 = arith.constant 1.000000e+00 : f32
    %119 = vector.broadcast %cst_25 : f32 to vector<8x128xf32>
    %120 = arith.addf %119, %118 : vector<8x128xf32>
    %121 = arith.divf %119, %120 : vector<8x128xf32>
    %122 = arith.mulf %113, %95 : vector<8x128xf32>
    %123 = arith.mulf %107, %115 : vector<8x128xf32>
    %124 = arith.addf %122, %123 : vector<8x128xf32>
    %125 = math.tanh %124 : vector<8x128xf32>
    %126 = arith.mulf %121, %125 : vector<8x128xf32>
    %127 = vector.extract_strided_slice %8 {offsets = [4, 0, 0], sizes = [1, 8, 512], strides = [1, 1, 1]} : vector<8x8x512xf32> to vector<1x8x512xf32>
    %128 = vector.shape_cast %127 : vector<1x8x512xf32> to vector<8x512xf32>
    %cst_26 = arith.constant dense<0.000000e+00> : vector<8x512xf32>
    %129 = tpu.matmul %126, %3, %cst_26 {dimension_numbers = #tpu.dot_dimension_numbers<[1], [0], [0], [1], [0, 0, 1, 1], [], []>} : vector<8x128xf32>, vector<128x512xf32>, vector<8x512xf32> -> vector<8x512xf32>
    %130 = arith.addf %128, %129 : vector<8x512xf32>
    %131 = vector.extract_strided_slice %130 {offsets = [0, 0], sizes = [8, 128], strides = [1, 1]} : vector<8x512xf32> to vector<8x128xf32>
    %132 = arith.negf %131 : vector<8x128xf32>
    %133 = math.exp %132 : vector<8x128xf32>
    %cst_27 = arith.constant 1.000000e+00 : f32
    %134 = vector.broadcast %cst_27 : f32 to vector<8x128xf32>
    %135 = arith.addf %134, %133 : vector<8x128xf32>
    %136 = arith.divf %134, %135 : vector<8x128xf32>
    %137 = vector.extract_strided_slice %130 {offsets = [0, 128], sizes = [8, 128], strides = [1, 1]} : vector<8x512xf32> to vector<8x128xf32>
    %138 = arith.negf %137 : vector<8x128xf32>
    %139 = math.exp %138 : vector<8x128xf32>
    %cst_28 = arith.constant 1.000000e+00 : f32
    %140 = vector.broadcast %cst_28 : f32 to vector<8x128xf32>
    %141 = arith.addf %140, %139 : vector<8x128xf32>
    %142 = arith.divf %140, %141 : vector<8x128xf32>
    %143 = vector.extract_strided_slice %130 {offsets = [0, 256], sizes = [8, 128], strides = [1, 1]} : vector<8x512xf32> to vector<8x128xf32>
    %144 = math.tanh %143 : vector<8x128xf32>
    %145 = vector.extract_strided_slice %130 {offsets = [0, 384], sizes = [8, 128], strides = [1, 1]} : vector<8x512xf32> to vector<8x128xf32>
    %146 = arith.negf %145 : vector<8x128xf32>
    %147 = math.exp %146 : vector<8x128xf32>
    %cst_29 = arith.constant 1.000000e+00 : f32
    %148 = vector.broadcast %cst_29 : f32 to vector<8x128xf32>
    %149 = arith.addf %148, %147 : vector<8x128xf32>
    %150 = arith.divf %148, %149 : vector<8x128xf32>
    %151 = arith.mulf %142, %124 : vector<8x128xf32>
    %152 = arith.mulf %136, %144 : vector<8x128xf32>
    %153 = arith.addf %151, %152 : vector<8x128xf32>
    %154 = math.tanh %153 : vector<8x128xf32>
    %155 = arith.mulf %150, %154 : vector<8x128xf32>
    %156 = vector.extract_strided_slice %8 {offsets = [5, 0, 0], sizes = [1, 8, 512], strides = [1, 1, 1]} : vector<8x8x512xf32> to vector<1x8x512xf32>
    %157 = vector.shape_cast %156 : vector<1x8x512xf32> to vector<8x512xf32>
    %cst_30 = arith.constant dense<0.000000e+00> : vector<8x512xf32>
    %158 = tpu.matmul %155, %3, %cst_30 {dimension_numbers = #tpu.dot_dimension_numbers<[1], [0], [0], [1], [0, 0, 1, 1], [], []>} : vector<8x128xf32>, vector<128x512xf32>, vector<8x512xf32> -> vector<8x512xf32>
    %159 = arith.addf %157, %158 : vector<8x512xf32>
    %160 = vector.extract_strided_slice %159 {offsets = [0, 0], sizes = [8, 128], strides = [1, 1]} : vector<8x512xf32> to vector<8x128xf32>
    %161 = arith.negf %160 : vector<8x128xf32>
    %162 = math.exp %161 : vector<8x128xf32>
    %cst_31 = arith.constant 1.000000e+00 : f32
    %163 = vector.broadcast %cst_31 : f32 to vector<8x128xf32>
    %164 = arith.addf %163, %162 : vector<8x128xf32>
    %165 = arith.divf %163, %164 : vector<8x128xf32>
    %166 = vector.extract_strided_slice %159 {offsets = [0, 128], sizes = [8, 128], strides = [1, 1]} : vector<8x512xf32> to vector<8x128xf32>
    %167 = arith.negf %166 : vector<8x128xf32>
    %168 = math.exp %167 : vector<8x128xf32>
    %cst_32 = arith.constant 1.000000e+00 : f32
    %169 = vector.broadcast %cst_32 : f32 to vector<8x128xf32>
    %170 = arith.addf %169, %168 : vector<8x128xf32>
    %171 = arith.divf %169, %170 : vector<8x128xf32>
    %172 = vector.extract_strided_slice %159 {offsets = [0, 256], sizes = [8, 128], strides = [1, 1]} : vector<8x512xf32> to vector<8x128xf32>
    %173 = math.tanh %172 : vector<8x128xf32>
    %174 = vector.extract_strided_slice %159 {offsets = [0, 384], sizes = [8, 128], strides = [1, 1]} : vector<8x512xf32> to vector<8x128xf32>
    %175 = arith.negf %174 : vector<8x128xf32>
    %176 = math.exp %175 : vector<8x128xf32>
    %cst_33 = arith.constant 1.000000e+00 : f32
    %177 = vector.broadcast %cst_33 : f32 to vector<8x128xf32>
    %178 = arith.addf %177, %176 : vector<8x128xf32>
    %179 = arith.divf %177, %178 : vector<8x128xf32>
    %180 = arith.mulf %171, %153 : vector<8x128xf32>
    %181 = arith.mulf %165, %173 : vector<8x128xf32>
    %182 = arith.addf %180, %181 : vector<8x128xf32>
    %183 = math.tanh %182 : vector<8x128xf32>
    %184 = arith.mulf %179, %183 : vector<8x128xf32>
    %185 = vector.extract_strided_slice %8 {offsets = [6, 0, 0], sizes = [1, 8, 512], strides = [1, 1, 1]} : vector<8x8x512xf32> to vector<1x8x512xf32>
    %186 = vector.shape_cast %185 : vector<1x8x512xf32> to vector<8x512xf32>
    %cst_34 = arith.constant dense<0.000000e+00> : vector<8x512xf32>
    %187 = tpu.matmul %184, %3, %cst_34 {dimension_numbers = #tpu.dot_dimension_numbers<[1], [0], [0], [1], [0, 0, 1, 1], [], []>} : vector<8x128xf32>, vector<128x512xf32>, vector<8x512xf32> -> vector<8x512xf32>
    %188 = arith.addf %186, %187 : vector<8x512xf32>
    %189 = vector.extract_strided_slice %188 {offsets = [0, 0], sizes = [8, 128], strides = [1, 1]} : vector<8x512xf32> to vector<8x128xf32>
    %190 = arith.negf %189 : vector<8x128xf32>
    %191 = math.exp %190 : vector<8x128xf32>
    %cst_35 = arith.constant 1.000000e+00 : f32
    %192 = vector.broadcast %cst_35 : f32 to vector<8x128xf32>
    %193 = arith.addf %192, %191 : vector<8x128xf32>
    %194 = arith.divf %192, %193 : vector<8x128xf32>
    %195 = vector.extract_strided_slice %188 {offsets = [0, 128], sizes = [8, 128], strides = [1, 1]} : vector<8x512xf32> to vector<8x128xf32>
    %196 = arith.negf %195 : vector<8x128xf32>
    %197 = math.exp %196 : vector<8x128xf32>
    %cst_36 = arith.constant 1.000000e+00 : f32
    %198 = vector.broadcast %cst_36 : f32 to vector<8x128xf32>
    %199 = arith.addf %198, %197 : vector<8x128xf32>
    %200 = arith.divf %198, %199 : vector<8x128xf32>
    %201 = vector.extract_strided_slice %188 {offsets = [0, 256], sizes = [8, 128], strides = [1, 1]} : vector<8x512xf32> to vector<8x128xf32>
    %202 = math.tanh %201 : vector<8x128xf32>
    %203 = vector.extract_strided_slice %188 {offsets = [0, 384], sizes = [8, 128], strides = [1, 1]} : vector<8x512xf32> to vector<8x128xf32>
    %204 = arith.negf %203 : vector<8x128xf32>
    %205 = math.exp %204 : vector<8x128xf32>
    %cst_37 = arith.constant 1.000000e+00 : f32
    %206 = vector.broadcast %cst_37 : f32 to vector<8x128xf32>
    %207 = arith.addf %206, %205 : vector<8x128xf32>
    %208 = arith.divf %206, %207 : vector<8x128xf32>
    %209 = arith.mulf %200, %182 : vector<8x128xf32>
    %210 = arith.mulf %194, %202 : vector<8x128xf32>
    %211 = arith.addf %209, %210 : vector<8x128xf32>
    %212 = math.tanh %211 : vector<8x128xf32>
    %213 = arith.mulf %208, %212 : vector<8x128xf32>
    %214 = vector.extract_strided_slice %8 {offsets = [7, 0, 0], sizes = [1, 8, 512], strides = [1, 1, 1]} : vector<8x8x512xf32> to vector<1x8x512xf32>
    %215 = vector.shape_cast %214 : vector<1x8x512xf32> to vector<8x512xf32>
    %cst_38 = arith.constant dense<0.000000e+00> : vector<8x512xf32>
    %216 = tpu.matmul %213, %3, %cst_38 {dimension_numbers = #tpu.dot_dimension_numbers<[1], [0], [0], [1], [0, 0, 1, 1], [], []>} : vector<8x128xf32>, vector<128x512xf32>, vector<8x512xf32> -> vector<8x512xf32>
    %217 = arith.addf %215, %216 : vector<8x512xf32>
    %218 = vector.extract_strided_slice %217 {offsets = [0, 0], sizes = [8, 128], strides = [1, 1]} : vector<8x512xf32> to vector<8x128xf32>
    %219 = arith.negf %218 : vector<8x128xf32>
    %220 = math.exp %219 : vector<8x128xf32>
    %cst_39 = arith.constant 1.000000e+00 : f32
    %221 = vector.broadcast %cst_39 : f32 to vector<8x128xf32>
    %222 = arith.addf %221, %220 : vector<8x128xf32>
    %223 = arith.divf %221, %222 : vector<8x128xf32>
    %224 = vector.extract_strided_slice %217 {offsets = [0, 128], sizes = [8, 128], strides = [1, 1]} : vector<8x512xf32> to vector<8x128xf32>
    %225 = arith.negf %224 : vector<8x128xf32>
    %226 = math.exp %225 : vector<8x128xf32>
    %cst_40 = arith.constant 1.000000e+00 : f32
    %227 = vector.broadcast %cst_40 : f32 to vector<8x128xf32>
    %228 = arith.addf %227, %226 : vector<8x128xf32>
    %229 = arith.divf %227, %228 : vector<8x128xf32>
    %230 = vector.extract_strided_slice %217 {offsets = [0, 256], sizes = [8, 128], strides = [1, 1]} : vector<8x512xf32> to vector<8x128xf32>
    %231 = math.tanh %230 : vector<8x128xf32>
    %232 = vector.extract_strided_slice %217 {offsets = [0, 384], sizes = [8, 128], strides = [1, 1]} : vector<8x512xf32> to vector<8x128xf32>
    %233 = arith.negf %232 : vector<8x128xf32>
    %234 = math.exp %233 : vector<8x128xf32>
    %cst_41 = arith.constant 1.000000e+00 : f32
    %235 = vector.broadcast %cst_41 : f32 to vector<8x128xf32>
    %236 = arith.addf %235, %234 : vector<8x128xf32>
    %237 = arith.divf %235, %236 : vector<8x128xf32>
    %238 = arith.mulf %229, %211 : vector<8x128xf32>
    %239 = arith.mulf %223, %231 : vector<8x128xf32>
    %240 = arith.addf %238, %239 : vector<8x128xf32>
    %241 = math.tanh %240 : vector<8x128xf32>
    %242 = arith.mulf %237, %241 : vector<8x128xf32>
    %243 = tpu.concatenate %39, %68, %97, %126, %155, %184, %213, %242 in 0 : vector<8x128xf32>, vector<8x128xf32>, vector<8x128xf32>, vector<8x128xf32>, vector<8x128xf32>, vector<8x128xf32>, vector<8x128xf32>, vector<8x128xf32> -> vector<64x128xf32>
    %c0_42 = arith.constant 0 : index
    %c0_43 = arith.constant 0 : index
    %244 = vector.load %arg5[%c0_42, %c0_43] : memref<128x512xf32, #tpu.memory_space<vmem>>, vector<128x512xf32>
    %c0_44 = arith.constant 0 : index
    %c0_45 = arith.constant 0 : index
    %245 = vector.load %arg6[%c0_44, %c0_45] : memref<128x512xf32, #tpu.memory_space<vmem>>, vector<128x512xf32>
    %c0_46 = arith.constant 0 : index
    %c0_47 = arith.constant 0 : index
    %246 = vector.load %arg7[%c0_46, %c0_47] : memref<1x512xf32, #tpu.memory_space<vmem>>, vector<1x512xf32>
    %cst_48 = arith.constant dense<0.000000e+00> : vector<64x512xf32>
    %247 = tpu.matmul %243, %244, %cst_48 {dimension_numbers = #tpu.dot_dimension_numbers<[1], [0], [0], [1], [0, 0, 1, 1], [], []>} : vector<64x128xf32>, vector<128x512xf32>, vector<64x512xf32> -> vector<64x512xf32>
    %248 = vector.broadcast %246 : vector<1x512xf32> to vector<64x512xf32>
    %249 = arith.addf %247, %248 : vector<64x512xf32>
    %250 = vector.shape_cast %249 : vector<64x512xf32> to vector<8x8x512xf32>
    %cst_49 = arith.constant 0.000000e+00 : f32
    %251 = vector.broadcast %cst_49 : f32 to vector<8x128xf32>
    %cst_50 = arith.constant 0.000000e+00 : f32
    %252 = vector.broadcast %cst_50 : f32 to vector<8x128xf32>
    %253 = vector.extract_strided_slice %250 {offsets = [0, 0, 0], sizes = [1, 8, 512], strides = [1, 1, 1]} : vector<8x8x512xf32> to vector<1x8x512xf32>
    %254 = vector.shape_cast %253 : vector<1x8x512xf32> to vector<8x512xf32>
    %cst_51 = arith.constant dense<0.000000e+00> : vector<8x512xf32>
    %255 = tpu.matmul %251, %245, %cst_51 {dimension_numbers = #tpu.dot_dimension_numbers<[1], [0], [0], [1], [0, 0, 1, 1], [], []>} : vector<8x128xf32>, vector<128x512xf32>, vector<8x512xf32> -> vector<8x512xf32>
    %256 = arith.addf %254, %255 : vector<8x512xf32>
    %257 = vector.extract_strided_slice %256 {offsets = [0, 0], sizes = [8, 128], strides = [1, 1]} : vector<8x512xf32> to vector<8x128xf32>
    %258 = arith.negf %257 : vector<8x128xf32>
    %259 = math.exp %258 : vector<8x128xf32>
    %cst_52 = arith.constant 1.000000e+00 : f32
    %260 = vector.broadcast %cst_52 : f32 to vector<8x128xf32>
    %261 = arith.addf %260, %259 : vector<8x128xf32>
    %262 = arith.divf %260, %261 : vector<8x128xf32>
    %263 = vector.extract_strided_slice %256 {offsets = [0, 128], sizes = [8, 128], strides = [1, 1]} : vector<8x512xf32> to vector<8x128xf32>
    %264 = arith.negf %263 : vector<8x128xf32>
    %265 = math.exp %264 : vector<8x128xf32>
    %cst_53 = arith.constant 1.000000e+00 : f32
    %266 = vector.broadcast %cst_53 : f32 to vector<8x128xf32>
    %267 = arith.addf %266, %265 : vector<8x128xf32>
    %268 = arith.divf %266, %267 : vector<8x128xf32>
    %269 = vector.extract_strided_slice %256 {offsets = [0, 256], sizes = [8, 128], strides = [1, 1]} : vector<8x512xf32> to vector<8x128xf32>
    %270 = math.tanh %269 : vector<8x128xf32>
    %271 = vector.extract_strided_slice %256 {offsets = [0, 384], sizes = [8, 128], strides = [1, 1]} : vector<8x512xf32> to vector<8x128xf32>
    %272 = arith.negf %271 : vector<8x128xf32>
    %273 = math.exp %272 : vector<8x128xf32>
    %cst_54 = arith.constant 1.000000e+00 : f32
    %274 = vector.broadcast %cst_54 : f32 to vector<8x128xf32>
    %275 = arith.addf %274, %273 : vector<8x128xf32>
    %276 = arith.divf %274, %275 : vector<8x128xf32>
    %277 = arith.mulf %268, %252 : vector<8x128xf32>
    %278 = arith.mulf %262, %270 : vector<8x128xf32>
    %279 = arith.addf %277, %278 : vector<8x128xf32>
    %280 = math.tanh %279 : vector<8x128xf32>
    %281 = arith.mulf %276, %280 : vector<8x128xf32>
    %282 = vector.extract_strided_slice %250 {offsets = [1, 0, 0], sizes = [1, 8, 512], strides = [1, 1, 1]} : vector<8x8x512xf32> to vector<1x8x512xf32>
    %283 = vector.shape_cast %282 : vector<1x8x512xf32> to vector<8x512xf32>
    %cst_55 = arith.constant dense<0.000000e+00> : vector<8x512xf32>
    %284 = tpu.matmul %281, %245, %cst_55 {dimension_numbers = #tpu.dot_dimension_numbers<[1], [0], [0], [1], [0, 0, 1, 1], [], []>} : vector<8x128xf32>, vector<128x512xf32>, vector<8x512xf32> -> vector<8x512xf32>
    %285 = arith.addf %283, %284 : vector<8x512xf32>
    %286 = vector.extract_strided_slice %285 {offsets = [0, 0], sizes = [8, 128], strides = [1, 1]} : vector<8x512xf32> to vector<8x128xf32>
    %287 = arith.negf %286 : vector<8x128xf32>
    %288 = math.exp %287 : vector<8x128xf32>
    %cst_56 = arith.constant 1.000000e+00 : f32
    %289 = vector.broadcast %cst_56 : f32 to vector<8x128xf32>
    %290 = arith.addf %289, %288 : vector<8x128xf32>
    %291 = arith.divf %289, %290 : vector<8x128xf32>
    %292 = vector.extract_strided_slice %285 {offsets = [0, 128], sizes = [8, 128], strides = [1, 1]} : vector<8x512xf32> to vector<8x128xf32>
    %293 = arith.negf %292 : vector<8x128xf32>
    %294 = math.exp %293 : vector<8x128xf32>
    %cst_57 = arith.constant 1.000000e+00 : f32
    %295 = vector.broadcast %cst_57 : f32 to vector<8x128xf32>
    %296 = arith.addf %295, %294 : vector<8x128xf32>
    %297 = arith.divf %295, %296 : vector<8x128xf32>
    %298 = vector.extract_strided_slice %285 {offsets = [0, 256], sizes = [8, 128], strides = [1, 1]} : vector<8x512xf32> to vector<8x128xf32>
    %299 = math.tanh %298 : vector<8x128xf32>
    %300 = vector.extract_strided_slice %285 {offsets = [0, 384], sizes = [8, 128], strides = [1, 1]} : vector<8x512xf32> to vector<8x128xf32>
    %301 = arith.negf %300 : vector<8x128xf32>
    %302 = math.exp %301 : vector<8x128xf32>
    %cst_58 = arith.constant 1.000000e+00 : f32
    %303 = vector.broadcast %cst_58 : f32 to vector<8x128xf32>
    %304 = arith.addf %303, %302 : vector<8x128xf32>
    %305 = arith.divf %303, %304 : vector<8x128xf32>
    %306 = arith.mulf %297, %279 : vector<8x128xf32>
    %307 = arith.mulf %291, %299 : vector<8x128xf32>
    %308 = arith.addf %306, %307 : vector<8x128xf32>
    %309 = math.tanh %308 : vector<8x128xf32>
    %310 = arith.mulf %305, %309 : vector<8x128xf32>
    %311 = vector.extract_strided_slice %250 {offsets = [2, 0, 0], sizes = [1, 8, 512], strides = [1, 1, 1]} : vector<8x8x512xf32> to vector<1x8x512xf32>
    %312 = vector.shape_cast %311 : vector<1x8x512xf32> to vector<8x512xf32>
    %cst_59 = arith.constant dense<0.000000e+00> : vector<8x512xf32>
    %313 = tpu.matmul %310, %245, %cst_59 {dimension_numbers = #tpu.dot_dimension_numbers<[1], [0], [0], [1], [0, 0, 1, 1], [], []>} : vector<8x128xf32>, vector<128x512xf32>, vector<8x512xf32> -> vector<8x512xf32>
    %314 = arith.addf %312, %313 : vector<8x512xf32>
    %315 = vector.extract_strided_slice %314 {offsets = [0, 0], sizes = [8, 128], strides = [1, 1]} : vector<8x512xf32> to vector<8x128xf32>
    %316 = arith.negf %315 : vector<8x128xf32>
    %317 = math.exp %316 : vector<8x128xf32>
    %cst_60 = arith.constant 1.000000e+00 : f32
    %318 = vector.broadcast %cst_60 : f32 to vector<8x128xf32>
    %319 = arith.addf %318, %317 : vector<8x128xf32>
    %320 = arith.divf %318, %319 : vector<8x128xf32>
    %321 = vector.extract_strided_slice %314 {offsets = [0, 128], sizes = [8, 128], strides = [1, 1]} : vector<8x512xf32> to vector<8x128xf32>
    %322 = arith.negf %321 : vector<8x128xf32>
    %323 = math.exp %322 : vector<8x128xf32>
    %cst_61 = arith.constant 1.000000e+00 : f32
    %324 = vector.broadcast %cst_61 : f32 to vector<8x128xf32>
    %325 = arith.addf %324, %323 : vector<8x128xf32>
    %326 = arith.divf %324, %325 : vector<8x128xf32>
    %327 = vector.extract_strided_slice %314 {offsets = [0, 256], sizes = [8, 128], strides = [1, 1]} : vector<8x512xf32> to vector<8x128xf32>
    %328 = math.tanh %327 : vector<8x128xf32>
    %329 = vector.extract_strided_slice %314 {offsets = [0, 384], sizes = [8, 128], strides = [1, 1]} : vector<8x512xf32> to vector<8x128xf32>
    %330 = arith.negf %329 : vector<8x128xf32>
    %331 = math.exp %330 : vector<8x128xf32>
    %cst_62 = arith.constant 1.000000e+00 : f32
    %332 = vector.broadcast %cst_62 : f32 to vector<8x128xf32>
    %333 = arith.addf %332, %331 : vector<8x128xf32>
    %334 = arith.divf %332, %333 : vector<8x128xf32>
    %335 = arith.mulf %326, %308 : vector<8x128xf32>
    %336 = arith.mulf %320, %328 : vector<8x128xf32>
    %337 = arith.addf %335, %336 : vector<8x128xf32>
    %338 = math.tanh %337 : vector<8x128xf32>
    %339 = arith.mulf %334, %338 : vector<8x128xf32>
    %340 = vector.extract_strided_slice %250 {offsets = [3, 0, 0], sizes = [1, 8, 512], strides = [1, 1, 1]} : vector<8x8x512xf32> to vector<1x8x512xf32>
    %341 = vector.shape_cast %340 : vector<1x8x512xf32> to vector<8x512xf32>
    %cst_63 = arith.constant dense<0.000000e+00> : vector<8x512xf32>
    %342 = tpu.matmul %339, %245, %cst_63 {dimension_numbers = #tpu.dot_dimension_numbers<[1], [0], [0], [1], [0, 0, 1, 1], [], []>} : vector<8x128xf32>, vector<128x512xf32>, vector<8x512xf32> -> vector<8x512xf32>
    %343 = arith.addf %341, %342 : vector<8x512xf32>
    %344 = vector.extract_strided_slice %343 {offsets = [0, 0], sizes = [8, 128], strides = [1, 1]} : vector<8x512xf32> to vector<8x128xf32>
    %345 = arith.negf %344 : vector<8x128xf32>
    %346 = math.exp %345 : vector<8x128xf32>
    %cst_64 = arith.constant 1.000000e+00 : f32
    %347 = vector.broadcast %cst_64 : f32 to vector<8x128xf32>
    %348 = arith.addf %347, %346 : vector<8x128xf32>
    %349 = arith.divf %347, %348 : vector<8x128xf32>
    %350 = vector.extract_strided_slice %343 {offsets = [0, 128], sizes = [8, 128], strides = [1, 1]} : vector<8x512xf32> to vector<8x128xf32>
    %351 = arith.negf %350 : vector<8x128xf32>
    %352 = math.exp %351 : vector<8x128xf32>
    %cst_65 = arith.constant 1.000000e+00 : f32
    %353 = vector.broadcast %cst_65 : f32 to vector<8x128xf32>
    %354 = arith.addf %353, %352 : vector<8x128xf32>
    %355 = arith.divf %353, %354 : vector<8x128xf32>
    %356 = vector.extract_strided_slice %343 {offsets = [0, 256], sizes = [8, 128], strides = [1, 1]} : vector<8x512xf32> to vector<8x128xf32>
    %357 = math.tanh %356 : vector<8x128xf32>
    %358 = vector.extract_strided_slice %343 {offsets = [0, 384], sizes = [8, 128], strides = [1, 1]} : vector<8x512xf32> to vector<8x128xf32>
    %359 = arith.negf %358 : vector<8x128xf32>
    %360 = math.exp %359 : vector<8x128xf32>
    %cst_66 = arith.constant 1.000000e+00 : f32
    %361 = vector.broadcast %cst_66 : f32 to vector<8x128xf32>
    %362 = arith.addf %361, %360 : vector<8x128xf32>
    %363 = arith.divf %361, %362 : vector<8x128xf32>
    %364 = arith.mulf %355, %337 : vector<8x128xf32>
    %365 = arith.mulf %349, %357 : vector<8x128xf32>
    %366 = arith.addf %364, %365 : vector<8x128xf32>
    %367 = math.tanh %366 : vector<8x128xf32>
    %368 = arith.mulf %363, %367 : vector<8x128xf32>
    %369 = vector.extract_strided_slice %250 {offsets = [4, 0, 0], sizes = [1, 8, 512], strides = [1, 1, 1]} : vector<8x8x512xf32> to vector<1x8x512xf32>
    %370 = vector.shape_cast %369 : vector<1x8x512xf32> to vector<8x512xf32>
    %cst_67 = arith.constant dense<0.000000e+00> : vector<8x512xf32>
    %371 = tpu.matmul %368, %245, %cst_67 {dimension_numbers = #tpu.dot_dimension_numbers<[1], [0], [0], [1], [0, 0, 1, 1], [], []>} : vector<8x128xf32>, vector<128x512xf32>, vector<8x512xf32> -> vector<8x512xf32>
    %372 = arith.addf %370, %371 : vector<8x512xf32>
    %373 = vector.extract_strided_slice %372 {offsets = [0, 0], sizes = [8, 128], strides = [1, 1]} : vector<8x512xf32> to vector<8x128xf32>
    %374 = arith.negf %373 : vector<8x128xf32>
    %375 = math.exp %374 : vector<8x128xf32>
    %cst_68 = arith.constant 1.000000e+00 : f32
    %376 = vector.broadcast %cst_68 : f32 to vector<8x128xf32>
    %377 = arith.addf %376, %375 : vector<8x128xf32>
    %378 = arith.divf %376, %377 : vector<8x128xf32>
    %379 = vector.extract_strided_slice %372 {offsets = [0, 128], sizes = [8, 128], strides = [1, 1]} : vector<8x512xf32> to vector<8x128xf32>
    %380 = arith.negf %379 : vector<8x128xf32>
    %381 = math.exp %380 : vector<8x128xf32>
    %cst_69 = arith.constant 1.000000e+00 : f32
    %382 = vector.broadcast %cst_69 : f32 to vector<8x128xf32>
    %383 = arith.addf %382, %381 : vector<8x128xf32>
    %384 = arith.divf %382, %383 : vector<8x128xf32>
    %385 = vector.extract_strided_slice %372 {offsets = [0, 256], sizes = [8, 128], strides = [1, 1]} : vector<8x512xf32> to vector<8x128xf32>
    %386 = math.tanh %385 : vector<8x128xf32>
    %387 = vector.extract_strided_slice %372 {offsets = [0, 384], sizes = [8, 128], strides = [1, 1]} : vector<8x512xf32> to vector<8x128xf32>
    %388 = arith.negf %387 : vector<8x128xf32>
    %389 = math.exp %388 : vector<8x128xf32>
    %cst_70 = arith.constant 1.000000e+00 : f32
    %390 = vector.broadcast %cst_70 : f32 to vector<8x128xf32>
    %391 = arith.addf %390, %389 : vector<8x128xf32>
    %392 = arith.divf %390, %391 : vector<8x128xf32>
    %393 = arith.mulf %384, %366 : vector<8x128xf32>
    %394 = arith.mulf %378, %386 : vector<8x128xf32>
    %395 = arith.addf %393, %394 : vector<8x128xf32>
    %396 = math.tanh %395 : vector<8x128xf32>
    %397 = arith.mulf %392, %396 : vector<8x128xf32>
    %398 = vector.extract_strided_slice %250 {offsets = [5, 0, 0], sizes = [1, 8, 512], strides = [1, 1, 1]} : vector<8x8x512xf32> to vector<1x8x512xf32>
    %399 = vector.shape_cast %398 : vector<1x8x512xf32> to vector<8x512xf32>
    %cst_71 = arith.constant dense<0.000000e+00> : vector<8x512xf32>
    %400 = tpu.matmul %397, %245, %cst_71 {dimension_numbers = #tpu.dot_dimension_numbers<[1], [0], [0], [1], [0, 0, 1, 1], [], []>} : vector<8x128xf32>, vector<128x512xf32>, vector<8x512xf32> -> vector<8x512xf32>
    %401 = arith.addf %399, %400 : vector<8x512xf32>
    %402 = vector.extract_strided_slice %401 {offsets = [0, 0], sizes = [8, 128], strides = [1, 1]} : vector<8x512xf32> to vector<8x128xf32>
    %403 = arith.negf %402 : vector<8x128xf32>
    %404 = math.exp %403 : vector<8x128xf32>
    %cst_72 = arith.constant 1.000000e+00 : f32
    %405 = vector.broadcast %cst_72 : f32 to vector<8x128xf32>
    %406 = arith.addf %405, %404 : vector<8x128xf32>
    %407 = arith.divf %405, %406 : vector<8x128xf32>
    %408 = vector.extract_strided_slice %401 {offsets = [0, 128], sizes = [8, 128], strides = [1, 1]} : vector<8x512xf32> to vector<8x128xf32>
    %409 = arith.negf %408 : vector<8x128xf32>
    %410 = math.exp %409 : vector<8x128xf32>
    %cst_73 = arith.constant 1.000000e+00 : f32
    %411 = vector.broadcast %cst_73 : f32 to vector<8x128xf32>
    %412 = arith.addf %411, %410 : vector<8x128xf32>
    %413 = arith.divf %411, %412 : vector<8x128xf32>
    %414 = vector.extract_strided_slice %401 {offsets = [0, 256], sizes = [8, 128], strides = [1, 1]} : vector<8x512xf32> to vector<8x128xf32>
    %415 = math.tanh %414 : vector<8x128xf32>
    %416 = vector.extract_strided_slice %401 {offsets = [0, 384], sizes = [8, 128], strides = [1, 1]} : vector<8x512xf32> to vector<8x128xf32>
    %417 = arith.negf %416 : vector<8x128xf32>
    %418 = math.exp %417 : vector<8x128xf32>
    %cst_74 = arith.constant 1.000000e+00 : f32
    %419 = vector.broadcast %cst_74 : f32 to vector<8x128xf32>
    %420 = arith.addf %419, %418 : vector<8x128xf32>
    %421 = arith.divf %419, %420 : vector<8x128xf32>
    %422 = arith.mulf %413, %395 : vector<8x128xf32>
    %423 = arith.mulf %407, %415 : vector<8x128xf32>
    %424 = arith.addf %422, %423 : vector<8x128xf32>
    %425 = math.tanh %424 : vector<8x128xf32>
    %426 = arith.mulf %421, %425 : vector<8x128xf32>
    %427 = vector.extract_strided_slice %250 {offsets = [6, 0, 0], sizes = [1, 8, 512], strides = [1, 1, 1]} : vector<8x8x512xf32> to vector<1x8x512xf32>
    %428 = vector.shape_cast %427 : vector<1x8x512xf32> to vector<8x512xf32>
    %cst_75 = arith.constant dense<0.000000e+00> : vector<8x512xf32>
    %429 = tpu.matmul %426, %245, %cst_75 {dimension_numbers = #tpu.dot_dimension_numbers<[1], [0], [0], [1], [0, 0, 1, 1], [], []>} : vector<8x128xf32>, vector<128x512xf32>, vector<8x512xf32> -> vector<8x512xf32>
    %430 = arith.addf %428, %429 : vector<8x512xf32>
    %431 = vector.extract_strided_slice %430 {offsets = [0, 0], sizes = [8, 128], strides = [1, 1]} : vector<8x512xf32> to vector<8x128xf32>
    %432 = arith.negf %431 : vector<8x128xf32>
    %433 = math.exp %432 : vector<8x128xf32>
    %cst_76 = arith.constant 1.000000e+00 : f32
    %434 = vector.broadcast %cst_76 : f32 to vector<8x128xf32>
    %435 = arith.addf %434, %433 : vector<8x128xf32>
    %436 = arith.divf %434, %435 : vector<8x128xf32>
    %437 = vector.extract_strided_slice %430 {offsets = [0, 128], sizes = [8, 128], strides = [1, 1]} : vector<8x512xf32> to vector<8x128xf32>
    %438 = arith.negf %437 : vector<8x128xf32>
    %439 = math.exp %438 : vector<8x128xf32>
    %cst_77 = arith.constant 1.000000e+00 : f32
    %440 = vector.broadcast %cst_77 : f32 to vector<8x128xf32>
    %441 = arith.addf %440, %439 : vector<8x128xf32>
    %442 = arith.divf %440, %441 : vector<8x128xf32>
    %443 = vector.extract_strided_slice %430 {offsets = [0, 256], sizes = [8, 128], strides = [1, 1]} : vector<8x512xf32> to vector<8x128xf32>
    %444 = math.tanh %443 : vector<8x128xf32>
    %445 = vector.extract_strided_slice %430 {offsets = [0, 384], sizes = [8, 128], strides = [1, 1]} : vector<8x512xf32> to vector<8x128xf32>
    %446 = arith.negf %445 : vector<8x128xf32>
    %447 = math.exp %446 : vector<8x128xf32>
    %cst_78 = arith.constant 1.000000e+00 : f32
    %448 = vector.broadcast %cst_78 : f32 to vector<8x128xf32>
    %449 = arith.addf %448, %447 : vector<8x128xf32>
    %450 = arith.divf %448, %449 : vector<8x128xf32>
    %451 = arith.mulf %442, %424 : vector<8x128xf32>
    %452 = arith.mulf %436, %444 : vector<8x128xf32>
    %453 = arith.addf %451, %452 : vector<8x128xf32>
    %454 = math.tanh %453 : vector<8x128xf32>
    %455 = arith.mulf %450, %454 : vector<8x128xf32>
    %456 = vector.extract_strided_slice %250 {offsets = [7, 0, 0], sizes = [1, 8, 512], strides = [1, 1, 1]} : vector<8x8x512xf32> to vector<1x8x512xf32>
    %457 = vector.shape_cast %456 : vector<1x8x512xf32> to vector<8x512xf32>
    %cst_79 = arith.constant dense<0.000000e+00> : vector<8x512xf32>
    %458 = tpu.matmul %455, %245, %cst_79 {dimension_numbers = #tpu.dot_dimension_numbers<[1], [0], [0], [1], [0, 0, 1, 1], [], []>} : vector<8x128xf32>, vector<128x512xf32>, vector<8x512xf32> -> vector<8x512xf32>
    %459 = arith.addf %457, %458 : vector<8x512xf32>
    %460 = vector.extract_strided_slice %459 {offsets = [0, 0], sizes = [8, 128], strides = [1, 1]} : vector<8x512xf32> to vector<8x128xf32>
    %461 = arith.negf %460 : vector<8x128xf32>
    %462 = math.exp %461 : vector<8x128xf32>
    %cst_80 = arith.constant 1.000000e+00 : f32
    %463 = vector.broadcast %cst_80 : f32 to vector<8x128xf32>
    %464 = arith.addf %463, %462 : vector<8x128xf32>
    %465 = arith.divf %463, %464 : vector<8x128xf32>
    %466 = vector.extract_strided_slice %459 {offsets = [0, 128], sizes = [8, 128], strides = [1, 1]} : vector<8x512xf32> to vector<8x128xf32>
    %467 = arith.negf %466 : vector<8x128xf32>
    %468 = math.exp %467 : vector<8x128xf32>
    %cst_81 = arith.constant 1.000000e+00 : f32
    %469 = vector.broadcast %cst_81 : f32 to vector<8x128xf32>
    %470 = arith.addf %469, %468 : vector<8x128xf32>
    %471 = arith.divf %469, %470 : vector<8x128xf32>
    %472 = vector.extract_strided_slice %459 {offsets = [0, 256], sizes = [8, 128], strides = [1, 1]} : vector<8x512xf32> to vector<8x128xf32>
    %473 = math.tanh %472 : vector<8x128xf32>
    %474 = vector.extract_strided_slice %459 {offsets = [0, 384], sizes = [8, 128], strides = [1, 1]} : vector<8x512xf32> to vector<8x128xf32>
    %475 = arith.negf %474 : vector<8x128xf32>
    %476 = math.exp %475 : vector<8x128xf32>
    %cst_82 = arith.constant 1.000000e+00 : f32
    %477 = vector.broadcast %cst_82 : f32 to vector<8x128xf32>
    %478 = arith.addf %477, %476 : vector<8x128xf32>
    %479 = arith.divf %477, %478 : vector<8x128xf32>
    %480 = arith.mulf %471, %453 : vector<8x128xf32>
    %481 = arith.mulf %465, %473 : vector<8x128xf32>
    %482 = arith.addf %480, %481 : vector<8x128xf32>
    %483 = math.tanh %482 : vector<8x128xf32>
    %484 = arith.mulf %479, %483 : vector<8x128xf32>
    %485 = tpu.concatenate %281, %310, %339, %368, %397, %426, %455, %484 in 0 : vector<8x128xf32>, vector<8x128xf32>, vector<8x128xf32>, vector<8x128xf32>, vector<8x128xf32>, vector<8x128xf32>, vector<8x128xf32>, vector<8x128xf32> -> vector<64x128xf32>
    %c0_83 = arith.constant 0 : index
    %c0_84 = arith.constant 0 : index
    %486 = vector.load %arg8[%c0_83, %c0_84] : memref<128x128xf32, #tpu.memory_space<vmem>>, vector<128x128xf32>
    %cst_85 = arith.constant dense<0.000000e+00> : vector<64x128xf32>
    %487 = tpu.matmul %485, %486, %cst_85 {dimension_numbers = #tpu.dot_dimension_numbers<[1], [0], [0], [1], [0, 0, 1, 1], [], []>} : vector<64x128xf32>, vector<128x128xf32>, vector<64x128xf32> -> vector<64x128xf32>
    %c0_86 = arith.constant 0 : index
    %c0_87 = arith.constant 0 : index
    %488 = vector.load %arg9[%c0_86, %c0_87] : memref<1x128xf32, #tpu.memory_space<vmem>>, vector<1x128xf32>
    %489 = vector.broadcast %488 : vector<1x128xf32> to vector<64x128xf32>
    %490 = arith.addf %487, %489 : vector<64x128xf32>
    %491 = tpu.iota {dimensions = array<i32: 1>} : vector<64x128xi32>
    %c8_i32 = arith.constant 8 : i32
    %492 = vector.broadcast %c8_i32 : i32 to vector<64x128xi32>
    %493 = arith.cmpi slt, %491, %492 : vector<64x128xi32>
    %cst_88 = arith.constant -1.000000e+30 : f32
    %494 = vector.broadcast %cst_88 : f32 to vector<64x128xf32>
    %495 = arith.select %493, %490, %494 : vector<64x128xi1>, vector<64x128xf32>
    %cst_89 = arith.constant dense<0xFF800000> : vector<64xf32>
    %496 = vector.multi_reduction <maximumf>, %495, %cst_89 [1] : vector<64x128xf32> to vector<64xf32>
    %497 = vector.shape_cast %496 : vector<64xf32> to vector<64x1xf32>
    %498 = vector.broadcast %497 : vector<64x1xf32> to vector<64x128xf32>
    %499 = arith.subf %495, %498 : vector<64x128xf32>
    %500 = math.exp %499 : vector<64x128xf32>
    %cst_90 = arith.constant dense<0.000000e+00> : vector<64xf32>
    %501 = vector.multi_reduction <add>, %500, %cst_90 [1] : vector<64x128xf32> to vector<64xf32>
    %502 = vector.shape_cast %501 : vector<64xf32> to vector<64x1xf32>
    %503 = math.log %502 : vector<64x1xf32>
    %504 = vector.broadcast %503 : vector<64x1xf32> to vector<64x128xf32>
    %505 = arith.subf %499, %504 : vector<64x128xf32>
    %506 = vector.shape_cast %505 : vector<64x128xf32> to vector<8x8x128xf32>
    %c0_91 = arith.constant 0 : index
    %c0_92 = arith.constant 0 : index
    %c0_93 = arith.constant 0 : index
    %507 = vector.load %arg10[%c0_91, %c0_92, %c0_93] : memref<8x8x128xf32, #tpu.memory_space<vmem>>, vector<8x8x128xf32>
    tpu.vector_store %arg10[%c0_91, %c0_92, %c0_93], %506 {strides = array<i32>} : memref<8x8x128xf32, #tpu.memory_space<vmem>>, vector<8x8x128xf32>,
    return
  }
  func.func @transform_0(%arg0: i32) -> (i32, i32, i32) {
    %c0_i32 = arith.constant 0 : i32
    %c0_i32_0 = arith.constant 0 : i32
    %c0_i32_1 = arith.constant 0 : i32
    return %c0_i32, %arg0, %c0_i32_0 : i32, i32, i32
  }
  func.func @transform_1(%arg0: i32) -> (i32, i32) {
    %c0_i32 = arith.constant 0 : i32
    %c0_i32_0 = arith.constant 0 : i32
    %c0_i32_1 = arith.constant 0 : i32
    return %c0_i32, %c0_i32_0 : i32, i32
  }
  func.func @transform_2(%arg0: i32) -> (i32, i32) {
    %c0_i32 = arith.constant 0 : i32
    %c0_i32_0 = arith.constant 0 : i32
    %c0_i32_1 = arith.constant 0 : i32
    return %c0_i32, %c0_i32_0 : i32, i32
  }
  func.func @transform_3(%arg0: i32) -> (i32, i32) {
    %c0_i32 = arith.constant 0 : i32
    %c0_i32_0 = arith.constant 0 : i32
    %c0_i32_1 = arith.constant 0 : i32
    return %c0_i32, %c0_i32_0 : i32, i32
  }
  func.func @transform_4(%arg0: i32) -> (i32, i32) {
    %c0_i32 = arith.constant 0 : i32
    %c0_i32_0 = arith.constant 0 : i32
    %c0_i32_1 = arith.constant 0 : i32
    return %c0_i32, %c0_i32_0 : i32, i32
  }
  func.func @transform_5(%arg0: i32) -> (i32, i32) {
    %c0_i32 = arith.constant 0 : i32
    %c0_i32_0 = arith.constant 0 : i32
    %c0_i32_1 = arith.constant 0 : i32
    return %c0_i32, %c0_i32_0 : i32, i32
  }
  func.func @transform_6(%arg0: i32) -> (i32, i32) {
    %c0_i32 = arith.constant 0 : i32
    %c0_i32_0 = arith.constant 0 : i32
    %c0_i32_1 = arith.constant 0 : i32
    return %c0_i32, %c0_i32_0 : i32, i32
  }
  func.func @transform_7(%arg0: i32) -> (i32, i32) {
    %c0_i32 = arith.constant 0 : i32
    %c0_i32_0 = arith.constant 0 : i32
    %c0_i32_1 = arith.constant 0 : i32
    return %c0_i32, %c0_i32_0 : i32, i32
  }
  func.func @transform_8(%arg0: i32) -> (i32, i32) {
    %c0_i32 = arith.constant 0 : i32
    %c0_i32_0 = arith.constant 0 : i32
    %c0_i32_1 = arith.constant 0 : i32
    return %c0_i32, %c0_i32_0 : i32, i32
  }
  func.func @transform_9(%arg0: i32) -> (i32, i32, i32) {
    %c0_i32 = arith.constant 0 : i32
    %c0_i32_0 = arith.constant 0 : i32
    %c0_i32_1 = arith.constant 0 : i32
    return %c0_i32, %arg0, %c0_i32_0 : i32, i32, i32
  }
}

</mosaic_0001>

<bundles_post_ra>
// kernel: lstm_forward.1
= control target key start
LH: loop header
LB: loop body
LE: loop exit
PB: predicated region body
PF: predicated region fallthrough
CT: control target
= control target key end

     0   :  { %14 = vsyncpa [#allocation3], 0  ;;  %s6711_s0 = inlined_call_operand.vmem [shape: f32[8,8,32], index: 0, kind: input, shape index: {}]   ;;  %s6712_s1 = inlined_call_operand.vmem [shape: f32[32,512], index: 1, kind: input, shape index: {}]   ;;  %s6713_s2 = inlined_call_operand.hbm [shape: f32[128,512], index: 2, kind: input, shape index: {}]   ;;  %s6714_s3 = inlined_call_operand.vmem [shape: f32[1,512], index: 3, kind: input, shape index: {}]   ;;  %s6715_s4 = inlined_call_operand.hbm [shape: f32[128,512], index: 4, kind: input, shape index: {}]   ;;  %s6716_s5 = inlined_call_operand.hbm [shape: f32[128,512], index: 5, kind: input, shape index: {}]   ;;  %s6717_s6 = inlined_call_operand.vmem [shape: f32[1,512], index: 6, kind: input, shape index: {}]   ;;  %s6718_s7 = inlined_call_operand.vmem [shape: f32[128,128], index: 7, kind: input, shape index: {}]   ;;  %s6719_s8 = inlined_call_operand.vmem [shape: f32[1,128], index: 8, kind: input, shape index: {}]   ;;  %s6720_s9 = inlined_call_operand.vmem [shape: f32[8,8,128], index: 9, kind: output, shape index: {}]  }
   0x1   :  { %15 = vsyncpa [#allocation5], 0  ;;  %s4382_s30 = smov [#allocation4]   ;;  %s4383_s11 = smov [#allocation2]  }
   0x2   :  { %s39_s10 = sshll.u32 %s4382_s30, 4  ;;  %s25_s12 = sshll.u32 %s4383_s11, 4  ;;  %s40_s10 = int_to_ptr.vmem [resolvable:$true] %s39_s10  ;;  %s26_s12 = int_to_ptr.vmem [resolvable:$true] %s25_s12 }
   0x3   :  { %s4326_s13 = scalar_lea.vmem %s40_s10, 8192  ;;  %p4331_p1 = scmp.lt.s32.totalorder %s40_s10, %s40_s10 }
   0x4   :  { %p4327_p0 = scmp.ne.s32.totalorder %s40_s10, %s4326_s13  ;;  %p4332_p2 = scmp.lt.s32.totalorder %s4326_s13, %s4326_s13 }
   0x6   :  { %p4333_p3 = por %p4332_p2, %p4331_p1 }
   0x8   :  { %p4334_p4 = pnand %p4333_p3, %p4327_p0 }
   0xa   :  { %4337 = shalt.err (!%p4334_p4)
}
   0xb   :  { %s4384_s14 = smov 512   ;;  %s4385_s15 = smov 32  }
   0xc   :  { %45 = dma.hbm_to_vmem [thread:$0]  %s6715_s4, 8192, %s40_s10, [#allocation5], %s4384_s14, %s4384_s14, %s4385_s15  }
   0xd   :  { %s4346_s18 = scalar_lea.vmem %s26_s12, 8192  ;;  %p4351_p6 = scmp.lt.s32.totalorder %s26_s12, %s26_s12 }
   0xe   :  { %p4347_p5 = scmp.ne.s32.totalorder %s26_s12, %s4346_s18  ;;  %p4352_p7 = scmp.lt.s32.totalorder %s4346_s18, %s4346_s18 }
  0x10   :  { %p4353_p8 = por %p4352_p7, %p4351_p6 }
  0x12   :  { %p4354_p9 = pnand %p4353_p8, %p4347_p5 }
  0x14   :  { %4357 = shalt.err (!%p4354_p9)
}
  0x15   :  { %31 = dma.hbm_to_vmem [thread:$0]  %s6713_s2, 8192, %s26_s12, [#allocation3], %s4384_s14, %s4384_s14, %s4385_s15  }
  0x16   :  { %s4386_s21 = smov [#allocation6]  }
  0x17   :  { %s51_s22 = sshll.u32 %s4386_s21, 4  ;;  %s52_s22 = int_to_ptr.vmem [resolvable:$true] %s51_s22 }
  0x18   :  { %s4366_s23 = scalar_lea.vmem %s52_s22, 8192  ;;  %p4371_p11 = scmp.lt.s32.totalorder %s52_s22, %s52_s22 }
  0x19   :  { %p4367_p10 = scmp.ne.s32.totalorder %s52_s22, %s4366_s23  ;;  %p4372_p12 = scmp.lt.s32.totalorder %s4366_s23, %s4366_s23 }
  0x1b   :  { %p4373_p13 = por %p4372_p12, %p4371_p11 }
  0x1d   :  { %p4374_p0 = pnand %p4373_p13, %p4367_p10 }
  0x1f   :  { %4377 = shalt.err (!%p4374_p0)
}
  0x20   :  { %57 = dma.hbm_to_vmem [thread:$0]  %s6716_s5, 8192, %s52_s22, [#allocation5], %s4384_s14, %s4384_s14, %s4385_s15  }
  0x21   :  { %4378 = dma.done.wait [#allocation3], 8192  }
  0x22   :  { %4379 = vsyncadd [#allocation3], 4294959104 }
  0x23   :  { %4380 = dma.done.wait [#allocation5], 16384  }
  0x24   :  { %4381 = vsyncadd [#allocation5], 4294950912  ;;  %v6725_v0 = vmov 0.0   ;;  %v96_v1 = vld [vmem:[%s6712_s1 + $0x78] sm:$0xff]  ;;  %v95_v2 = vld [vmem:[%s6712_s1 + $0x70] sm:$0xff]  ;;  %vm183_vm0 = vcmask 261120  }
  0x25   :  { %385 = vmatprep.mubr.f32.mxu1 %v6725_v0  ;;  %272 = vmatprep.mubr.f32.mxu0 %v6725_v0  ;;  %v92_v3 = vld [vmem:[%s6712_s1 + $0x58] sm:$0xff]  ;;  %v91_v4 = vld [vmem:[%s6712_s1 + $0x50] sm:$0xff]  ;;  %v4476_v9 = vld [vmem:[%s6711_s0] sm:$0xff] }
  0x26   :  { %345 = vmatprep.subr.mxu1 %v96_v1  ;;  %v88_v5 = vld [vmem:[%s6712_s1 + $0x38] sm:$0xff]  ;;  %v87_v6 = vld [vmem:[%s6712_s1 + $0x30] sm:$0xff]  ;;  %v4478_v10 = vld [vmem:[#allocation2 + $0x1e8] sm:$0xff] }
  0x27   :  { %346 = vmatpush1.msra.mxu1 %v95_v2  ;;  %v84_v7 = vld [vmem:[%s6712_s1 + $0x18] sm:$0xff]  ;;  %v83_v8 = vld [vmem:[%s6712_s1 + $0x10] sm:$0xff]  ;;  %6932 = vst [vmem:[#allocation9_spill] sm:$0xff] %v4478_v10  ;;  %v4480_v11 = vld [vmem:[#allocation2 + $0x1e0] sm:$0xff] }
  0x28   :  { %347 = vmatprep.subr.mxu1 %v92_v3  ;;  %v4482_v12 = vld [vmem:[#allocation2 + $0x1c8] sm:$0xff]  ;;  %v4487_v13 = vld [vmem:[#allocation2 + $0x1c0] sm:$0xff]  ;;  %v4520_v21 = vld [vmem:[%s6711_s0 + $0x10] sm:$0xff] }
  0x29   :  { %348 = vmatpush1.msra.mxu1 %v91_v4  ;;  %v4494_v14 = vld [vmem:[%s6711_s0 + $0x8] sm:$0xff]  ;;  %v4499_v16 = vld [vmem:[#allocation2 + $0x1a0] sm:$0xff]  ;;  %v4546_v28 = vld [vmem:[%s6711_s0 + $0x18] sm:$0xff] }
  0x2a   :  { %349 = vmatprep.subr.mxu1 %v88_v5  ;;  %v4496_v15 = vld [vmem:[#allocation2 + $0x1a8] sm:$0xff]  ;;  %v4510_v19 = vld [vmem:[#allocation2 + $0x180] sm:$0xff]  ;;  %v4618_v47 = vld [vmem:[%s6711_s0 + $0x30] sm:$0xff] }
  0x2b   :  { %350 = vmatpush1.msra.mxu1 %v87_v6  ;;  %v4502_v17 = vld [vmem:[#allocation2 + $0x188] sm:$0xff]  ;;  %v93_v20 = vld [vmem:[%s6712_s1 + $0x60] sm:$0xff]  ;;  %v4641_v52 = vld [vmem:[%s6711_s0 + $0x38] sm:$0xff] }
  0x2c   :  { %351 = vmatprep.subr.mxu1 %v84_v7  ;;  %v94_v18 = vld [vmem:[%s6712_s1 + $0x68] sm:$0xff]  ;;  %v4525_v23 = vld [vmem:[#allocation2 + $0x160] sm:$0xff]  ;;  %v4660_v57 = vld [vmem:[#allocation2 + $0x1f8] sm:$0xff] }
  0x2d   :  { %352 = vmatpush1.msra.mxu1 %v83_v8  ;;  %v4522_v22 = vld [vmem:[#allocation2 + $0x168] sm:$0xff]  ;;  %232 = vmatprep.subr.mxu0 %v94_v18  ;;  %v4536_v26 = vld [vmem:[#allocation2 + $0x140] sm:$0xff]  ;;  %6945 = vst [vmem:[#allocation22_spill] sm:$0xff] %v4660_v57  ;;  %v4663_v58 = vld [vmem:[#allocation2 + $0x1f0] sm:$0xff] }
  0x2e   :  { %3771 = vmatmul.mubr.msk.f32.vlgmr.msra.gmra.mxu1 %vm183_vm0, %v4476_v9  ;;  %434 = vmatprep.subr.mxu1 %v4478_v10  ;;  %v4528_v24 = vld [vmem:[#allocation2 + $0x148] sm:$0xff]  ;;  %v89_v27 = vld [vmem:[%s6712_s1 + $0x40] sm:$0xff]  ;;  %v4667_v59 = vld [vmem:[#allocation2 + $0x1d8] sm:$0xff] }
  0x2f   :  { %435 = vmatpush1.msra.mxu1 %v4480_v11  ;;  %391 = vmatprep.mubr.f32.mxu1 %v6725_v0  ;;  %v90_v25 = vld [vmem:[%s6712_s1 + $0x48] sm:$0xff]  ;;  %v4551_v30 = vld [vmem:[#allocation2 + $0x120] sm:$0xff]  ;;  %v4673_v60 = vld [vmem:[#allocation2 + $0x1d0] sm:$0xff] }
  0x30   :  { %436 = vmatprep.subr.mxu1 %v4482_v12  ;;  %233 = vmatpush1.msra.mxu0 %v93_v20  ;;  %v4548_v29 = vld [vmem:[#allocation2 + $0x128] sm:$0xff]  ;;  %v4562_v33 = vld [vmem:[#allocation2 + $0x100] sm:$0xff]  ;;  %v4676_v61 = vld [vmem:[#allocation2 + $0x1b8] sm:$0xff] }
  0x31   :  { %437 = vmatpush1.msra.mxu1 %v4487_v13  ;;  %234 = vmatprep.subr.mxu0 %v90_v25  ;;  %v4554_v31 = vld [vmem:[#allocation2 + $0x108] sm:$0xff]  ;;  %v85_v34 = vld [vmem:[%s6712_s1 + $0x20] sm:$0xff]  ;;  %v4680_v62 = vld [vmem:[#allocation2 + $0x1b0] sm:$0xff] }
  0x32   :  { %3772 = vmatmul.mubr.msk.f32.gmra.mxu1 %vm183_vm0, %v4494_v14  ;;  %438 = vmatprep.subr.mxu1 %v4496_v15  ;;  %v86_v32 = vld [vmem:[%s6712_s1 + $0x28] sm:$0xff]  ;;  %v4572_v35 = vld [vmem:[%s6711_s0 + $0x20] sm:$0xff]  ;;  %v4684_v63 = vld [vmem:[#allocation2 + $0x198] sm:$0xff] }
  0x33   :  { %439 = vmatpush1.msra.mxu1 %v4499_v16  ;;  %397 = vmatprep.mubr.f32.mxu1 %v6725_v0  ;;  %v4574_v36 = vld [vmem:[#allocation2 + $0xe8] sm:$0xff]  ;;  %v4577_v37 = vld [vmem:[#allocation2 + $0xe0] sm:$0xff]  ;;  %v4688_v1 = vld [vmem:[#allocation2 + $0x190] sm:$0xff] }
  0x34   :  { %440 = vmatprep.subr.mxu1 %v4502_v17  ;;  %235 = vmatpush1.msra.mxu0 %v89_v27  ;;  %6933 = vst [vmem:[#allocation10_spill] sm:$0xff] %v4574_v36  ;;  %6934 = vst [vmem:[#allocation11_spill] sm:$0xff] %v4577_v37  ;;  %v4580_v38 = vld [vmem:[#allocation2 + $0xc8] sm:$0xff]  ;;  %v4588_v40 = vld [vmem:[#allocation2 + $0xc0] sm:$0xff] }
  0x35   :  { %441 = vmatpush1.msra.mxu1 %v4510_v19  ;;  %236 = vmatprep.subr.mxu0 %v86_v32  ;;  %6935 = vst [vmem:[#allocation12_spill] sm:$0xff] %v4580_v38  ;;  %v82_v39 = vld [vmem:[%s6712_s1 + $0x8] sm:$0xff]  ;;  %v81_v41 = vld [vmem:[%s6712_s1] sm:$0xff]  ;;  %v4692_v2 = vld [vmem:[#allocation2 + $0x178] sm:$0xff] }
  0x36   :  { %3773 = vmatmul.mubr.msk.f32.gmra.mxu1 %vm183_vm0, %v4520_v21  ;;  %442 = vmatprep.subr.mxu1 %v4522_v22  ;;  %v4598_v42 = vld [vmem:[%s6711_s0 + $0x28] sm:$0xff]  ;;  %v4603_v44 = vld [vmem:[#allocation2 + $0xa0] sm:$0xff]  ;;  %v4696_v3 = vld [vmem:[#allocation2 + $0x170] sm:$0xff] }
  0x37   :  { %443 = vmatpush1.msra.mxu1 %v4525_v23  ;;  %403 = vmatprep.mubr.f32.mxu1 %v6725_v0  ;;  %v4600_v43 = vld [vmem:[#allocation2 + $0xa8] sm:$0xff]  ;;  %v4611_v46 = vld [vmem:[#allocation2 + $0x80] sm:$0xff]  ;;  %v4700_v4 = vld [vmem:[#allocation2 + $0x158] sm:$0xff] }
  0x38   :  { %444 = vmatprep.subr.mxu1 %v4528_v24  ;;  %237 = vmatpush1.msra.mxu0 %v85_v34  ;;  %v4606_v45 = vld [vmem:[#allocation2 + $0x88] sm:$0xff]  ;;  %6936 = vst [vmem:[#allocation13_spill] sm:$0xff] %v4611_v46  ;;  %v4623_v49 = vld [vmem:[#allocation2 + $0x60] sm:$0xff]  ;;  %v4705_v5 = vld [vmem:[#allocation2 + $0x150] sm:$0xff] }
  0x39   :  { %445 = vmatpush1.msra.mxu1 %v4536_v26  ;;  %238 = vmatprep.subr.mxu0 %v82_v39  ;;  %v4620_v48 = vld [vmem:[#allocation2 + $0x68] sm:$0xff]  ;;  %6938 = vst [vmem:[#allocation15_spill] sm:$0xff] %v4623_v49  ;;  %v4634_v51 = vld [vmem:[#allocation2 + $0x40] sm:$0xff]  ;;  %v4709_v6 = vld [vmem:[#allocation2 + $0x138] sm:$0xff] }
  0x3a   :  { %3774 = vmatmul.mubr.msk.f32.gmra.mxu1 %vm183_vm0, %v4546_v28  ;;  %446 = vmatprep.subr.mxu1 %v4548_v29  ;;  %6937 = vst [vmem:[#allocation14_spill] sm:$0xff] %v4620_v48  ;;  %v4628_v50 = vld [vmem:[#allocation2 + $0x48] sm:$0xff]  ;;  %6940 = vst [vmem:[#allocation17_spill] sm:$0xff] %v4634_v51  ;;  %v4646_v54 = vld [vmem:[#allocation2 + $0x20] sm:$0xff] }
  0x3b   :  { %447 = vmatpush1.msra.mxu1 %v4551_v30  ;;  %409 = vmatprep.mubr.f32.mxu1 %v6725_v0  ;;  %6939 = vst [vmem:[#allocation16_spill] sm:$0xff] %v4628_v50  ;;  %v4643_v53 = vld [vmem:[#allocation2 + $0x28] sm:$0xff]  ;;  %6942 = vst [vmem:[#allocation19_spill] sm:$0xff] %v4646_v54  ;;  %v4656_v56 = vld [vmem:[#allocation2] sm:$0xff] }
  0x3c   :  { %448 = vmatprep.subr.mxu1 %v4554_v31  ;;  %239 = vmatpush1.msra.mxu0 %v81_v41  ;;  %6941 = vst [vmem:[#allocation18_spill] sm:$0xff] %v4643_v53  ;;  %v4650_v55 = vld [vmem:[#allocation2 + $0x8] sm:$0xff]  ;;  %6944 = vst [vmem:[#allocation21_spill] sm:$0xff] %v4656_v56  ;;  %v4713_v7 = vld [vmem:[#allocation2 + $0x130] sm:$0xff] }
  0x3d   :  { %449 = vmatpush1.msra.mxu1 %v4562_v33  ;;  %3763 = vmatmul.mubr.msk.f32.vlgmr.msra.gmra.mxu0 %vm183_vm0, %v4476_v9  ;;  %6943 = vst [vmem:[#allocation20_spill] sm:$0xff] %v4650_v55  ;;  %v4717_v8 = vld [vmem:[#allocation2 + $0x118] sm:$0xff]  ;;  %v4721_v9 = vld [vmem:[#allocation2 + $0x110] sm:$0xff] }
  0x3e   :  { %3775 = vmatmul.mubr.msk.f32.gmra.mxu1 %vm183_vm0, %v4572_v35  ;;  %450 = vmatprep.subr.mxu1 %v4574_v36  ;;  %v4730_v18 = vld [vmem:[#allocation2 + $0xf0] sm:$0xff]  ;;  %v4734_v20 = vld [vmem:[#allocation2 + $0xd8] sm:$0xff] }
  0x3f   :  { %451 = vmatpush1.msra.mxu1 %v4577_v37  ;;  %415 = vmatprep.mubr.f32.mxu1 %v6725_v0  ;;  %v4742_v25 = vld [vmem:[#allocation2 + $0xb8] sm:$0xff]  ;;  %v4746_v27 = vld [vmem:[#allocation2 + $0xb0] sm:$0xff] }
  0x40   :  { %452 = vmatprep.subr.mxu1 %v4580_v38  ;;  %604 = vmatprep.subr.mxu0 %v4478_v10  ;;  %v4755_v32 = vld [vmem:[#allocation2 + $0x90] sm:$0xff]  ;;  %v4759_v34 = vld [vmem:[#allocation2 + $0x78] sm:$0xff] }
  0x41   :  { %453 = vmatpush1.msra.mxu1 %v4588_v40  ;;  %605 = vmatpush1.msra.mxu0 %v4480_v11  ;;  %6947 = vst [vmem:[#allocation24_spill] sm:$0xff] %v4755_v32  ;;  %6948 = vst [vmem:[#allocation25_spill] sm:$0xff] %v4759_v34  ;;  %v4763_v39 = vld [vmem:[#allocation2 + $0x70] sm:$0xff] }
  0x42   :  { %3776 = vmatmul.mubr.msk.f32.gmra.mxu1 %vm183_vm0, %v4598_v42  ;;  %454 = vmatprep.subr.mxu1 %v4600_v43  ;;  %6949 = vst [vmem:[#allocation26_spill] sm:$0xff] %v4763_v39  ;;  %v4771_v41 = vld [vmem:[#allocation2 + $0x50] sm:$0xff] }
  0x43   :  { %455 = vmatpush1.msra.mxu1 %v4603_v44  ;;  %421 = vmatprep.mubr.f32.mxu1 %v6725_v0  ;;  %6951 = vst [vmem:[#allocation28_spill] sm:$0xff] %v4771_v41 }
  0x44   :  { %456 = vmatprep.subr.mxu1 %v4606_v45  ;;  %278 = vmatprep.mubr.f32.mxu0 %v6725_v0 }
  0x45   :  { %457 = vmatpush1.msra.mxu1 %v4611_v46  ;;  %606 = vmatprep.subr.mxu0 %v4482_v12 }
  0x46   :  { %3777 = vmatmul.mubr.msk.f32.gmra.mxu1 %vm183_vm0, %v4618_v47  ;;  %458 = vmatprep.subr.mxu1 %v4620_v48 }
  0x47   :  { %459 = vmatpush1.msra.mxu1 %v4623_v49  ;;  %427 = vmatprep.mubr.f32.mxu1 %v6725_v0 }
  0x48   :  { %460 = vmatprep.subr.mxu1 %v4628_v50  ;;  %3764 = vmatmul.mubr.msk.f32.gmra.mxu0 %vm183_vm0, %v4494_v14  ;;  %v4725_v14 = vld [vmem:[#allocation2 + $0xf8] sm:$0xff] }
  0x49   :  { %461 = vmatpush1.msra.mxu1 %v4634_v51  ;;  %607 = vmatpush1.msra.mxu0 %v4487_v13 }
  0x4a   :  { %3778 = vmatmul.mubr.msk.f32.gmra.mxu1 %vm183_vm0, %v4641_v52  ;;  %462 = vmatprep.subr.mxu1 %v4643_v53 }
  0x4b   :  { %463 = vmatpush1.msra.mxu1 %v4646_v54  ;;  %498 = vmatprep.mubr.f32.mxu1 %v6725_v0 }
  0x4c   :  { %464 = vmatprep.subr.mxu1 %v4650_v55  ;;  %608 = vmatprep.subr.mxu0 %v4496_v15 }
  0x4d   :  { %465 = vmatpush1.msra.mxu1 %v4656_v56  ;;  %609 = vmatpush1.msra.mxu0 %v4499_v16 }
  0x4e   :  { %499 = vmatmul.mubr.f32.vlgmr.msra.gmra.mxu1 %v6725_v0  ;;  %505 = vmatprep.subr.mxu1 %v4660_v57 }
  0x4f   :  { %506 = vmatpush1.msra.mxu1 %v4663_v58  ;;  %569 = vmatprep.mubr.f32.mxu1 %v6725_v0 }
  0x50   :  { %507 = vmatprep.subr.mxu1 %v4667_v59  ;;  %284 = vmatprep.mubr.f32.mxu0 %v6725_v0 }
  0x51   :  { %508 = vmatpush1.msra.mxu1 %v4673_v60  ;;  %610 = vmatprep.subr.mxu0 %v4502_v17 }
  0x52   :  { %509 = vmatprep.subr.mxu1 %v4676_v61  ;;  %3765 = vmatmul.mubr.msk.f32.gmra.mxu0 %vm183_vm0, %v4520_v21  ;;  %v4738_v21 = vld [vmem:[#allocation2 + $0xd0] sm:$0xff] }
  0x53   :  { %510 = vmatpush1.msra.mxu1 %v4680_v62  ;;  %611 = vmatpush1.msra.mxu0 %v4510_v19 }
  0x54   :  { %511 = vmatprep.subr.mxu1 %v4684_v63  ;;  %612 = vmatprep.subr.mxu0 %v4522_v22 }
  0x55   :  { %512 = vmatpush1.msra.mxu1 %v4688_v1  ;;  %613 = vmatpush1.msra.mxu0 %v4525_v23 }
  0x56   :  { %513 = vmatprep.subr.mxu1 %v4692_v2  ;;  %290 = vmatprep.mubr.f32.mxu0 %v6725_v0 }
  0x57   :  { %514 = vmatpush1.msra.mxu1 %v4696_v3  ;;  %614 = vmatprep.subr.mxu0 %v4528_v24 }
  0x58   :  { %515 = vmatprep.subr.mxu1 %v4700_v4  ;;  %3766 = vmatmul.mubr.msk.f32.gmra.mxu0 %vm183_vm0, %v4546_v28  ;;  %v4750_v28 = vld [vmem:[#allocation2 + $0x98] sm:$0xff] }
  0x59   :  { %516 = vmatpush1.msra.mxu1 %v4705_v5  ;;  %615 = vmatpush1.msra.mxu0 %v4536_v26  ;;  %6946 = vst [vmem:[#allocation23_spill] sm:$0xff] %v4750_v28 }
  0x5a   :  { %517 = vmatprep.subr.mxu1 %v4709_v6  ;;  %616 = vmatprep.subr.mxu0 %v4548_v29 }
  0x5b   :  { %518 = vmatpush1.msra.mxu1 %v4713_v7  ;;  %617 = vmatpush1.msra.mxu0 %v4551_v30 }
  0x5c   :  { %519 = vmatprep.subr.mxu1 %v4717_v8  ;;  %296 = vmatprep.mubr.f32.mxu0 %v6725_v0 }
  0x5d   :  { %520 = vmatpush1.msra.mxu1 %v4721_v9  ;;  %618 = vmatprep.subr.mxu0 %v4554_v31 }
  0x5e   :  { %521 = vmatprep.subr.mxu1 %v4725_v14  ;;  %3767 = vmatmul.mubr.msk.f32.gmra.mxu0 %vm183_vm0, %v4572_v35  ;;  %v4767_v35 = vld [vmem:[#allocation2 + $0x58] sm:$0xff] }
  0x5f   :  { %522 = vmatpush1.msra.mxu1 %v4730_v18  ;;  %619 = vmatpush1.msra.mxu0 %v4562_v33  ;;  %6950 = vst [vmem:[#allocation27_spill] sm:$0xff] %v4767_v35 }
  0x60   :  { %523 = vmatprep.subr.mxu1 %v4734_v20  ;;  %620 = vmatprep.subr.mxu0 %v4574_v36  ;;  %v4775_v36 = vld [vmem:[#allocation2 + $0x38] sm:$0xff] }
  0x61   :  { %524 = vmatpush1.msra.mxu1 %v4738_v21  ;;  %621 = vmatpush1.msra.mxu0 %v4577_v37  ;;  %6952 = vst [vmem:[#allocation29_spill] sm:$0xff] %v4775_v36  ;;  %v4780_v37 = vld [vmem:[#allocation2 + $0x30] sm:$0xff] }
  0x62   :  { %525 = vmatprep.subr.mxu1 %v4742_v25  ;;  %302 = vmatprep.mubr.f32.mxu0 %v6725_v0  ;;  %6953 = vst [vmem:[#allocation30_spill] sm:$0xff] %v4780_v37  ;;  %v4784_v0 = vld [vmem:[#allocation2 + $0x18] sm:$0xff] }
  0x63   :  { %526 = vmatpush1.msra.mxu1 %v4746_v27  ;;  %622 = vmatprep.subr.mxu0 %v4580_v38  ;;  %6954 = vst [vmem:[#allocation31_spill] sm:$0xff] %v4784_v0  ;;  %v4788_v38 = vld [vmem:[#allocation2 + $0x10] sm:$0xff] }
  0x64   :  { %527 = vmatprep.subr.mxu1 %v4750_v28  ;;  %3768 = vmatmul.mubr.msk.f32.gmra.mxu0 %vm183_vm0, %v4598_v42  ;;  %6955 = vst [vmem:[#allocation32_spill] sm:$0xff] %v4788_v38  ;;  %v6956_v42 = vmov 0.0  }
  0x65   :  { %528 = vmatpush1.msra.mxu1 %v4755_v32  ;;  %623 = vmatpush1.msra.mxu0 %v4588_v40 }
  0x66   :  { %529 = vmatprep.subr.mxu1 %v4759_v34  ;;  %624 = vmatprep.subr.mxu0 %v4600_v43 }
  0x67   :  { %530 = vmatpush1.msra.mxu1 %v4763_v39  ;;  %625 = vmatpush1.msra.mxu0 %v4603_v44 }
  0x68   :  { %531 = vmatprep.subr.mxu1 %v4767_v35  ;;  %308 = vmatprep.mubr.f32.mxu0 %v6956_v42 }
  0x69   :  { %532 = vmatpush1.msra.mxu1 %v4771_v41  ;;  %626 = vmatprep.subr.mxu0 %v4606_v45 }
  0x6a   :  { %533 = vmatprep.subr.mxu1 %v4775_v36  ;;  %3769 = vmatmul.mubr.msk.f32.gmra.mxu0 %vm183_vm0, %v4618_v47  ;;  %v6741_v47 = vlaneseq }
  0x6b   :  { %534 = vmatpush1.msra.mxu1 %v4780_v37  ;;  %627 = vmatpush1.msra.mxu0 %v4611_v46 }
  0x6c   :  { %535 = vmatprep.subr.mxu1 %v4784_v0  ;;  %628 = vmatprep.subr.mxu0 %v4620_v48 }
  0x6d   :  { %536 = vmatpush1.msra.mxu1 %v4788_v38  ;;  %629 = vmatpush1.msra.mxu0 %v4623_v49 }
  0x6e   :  { %570 = vmatmul.mubr.f32.vlgmr.msra.gmra.mxu1 %v6956_v42  ;;  %675 = vmatprep.subr.mxu1 %v4660_v57 }
  0x6f   :  { %676 = vmatpush1.msra.mxu1 %v4663_v58  ;;  %314 = vmatprep.mubr.f32.mxu0 %v6956_v42 }
  0x70   :  { %677 = vmatprep.subr.mxu1 %v4667_v59  ;;  %630 = vmatprep.subr.mxu0 %v4628_v50 }
  0x71   :  { %678 = vmatpush1.msra.mxu1 %v4673_v60  ;;  %3770 = vmatmul.mubr.msk.f32.gmra.mxu0 %vm183_vm0, %v4641_v52  ;;  %v4848_v52 = vshrl.u32 %v6741_v47, 7 }
  0x72   :  { %679 = vmatprep.subr.mxu1 %v4676_v61  ;;  %631 = vmatpush1.msra.mxu0 %v4634_v51 }
  0x73   :  { %680 = vmatpush1.msra.mxu1 %v4680_v62  ;;  %632 = vmatprep.subr.mxu0 %v4643_v53  ;;  %6957 = vst [vmem:[#allocation33_spill] sm:$0xff] %v4848_v52 }
  0x74   :  { %681 = vmatprep.subr.mxu1 %v4684_v63  ;;  %633 = vmatpush1.msra.mxu0 %v4646_v54 }
  0x75   :  { %682 = vmatpush1.msra.mxu1 %v4688_v1  ;;  %634 = vmatprep.subr.mxu0 %v4650_v55  ;;  %v6759_v55 = vsub.s32 3, %v4848_v52 }
  0x76   :  { %683 = vmatprep.subr.mxu1 %v4692_v2  ;;  %635 = vmatpush1.msra.mxu0 %v4656_v56 }
  0x77   :  { %684 = vmatpush1.msra.mxu1 %v4696_v3  ;;  %668 = vmatprep.mubr.f32.mxu0 %v6956_v42 }
  0x78   :  { %685 = vmatprep.subr.mxu1 %v4700_v4  ;;  %739 = vmatprep.mubr.f32.mxu1 %v6956_v42  ;;  %v161_v42 = vld [vmem:[%s6714_s3] sm:$0xf] }
  0x79   :  { %686 = vmatpush1.msra.mxu1 %v4705_v5  ;;  %774 = vmatprep.subr.mxu0 %v4478_v10  ;;  %v6754_v10 = vsub.s32 2, %v4848_v52  ;;  %v4865_v47 = vrot.slane %v161_v42, %v6759_v55 }
  0x7a   :  { %687 = vmatprep.subr.mxu1 %v4709_v6 }
  0x7b   :  { %688 = vmatpush1.msra.mxu1 %v4713_v7 }
  0x7c   :  { %689 = vmatprep.subr.mxu1 %v4717_v8 }
  0x7d   :  { %690 = vmatpush1.msra.mxu1 %v4721_v9 }
  0x7e   :  { %691 = vmatprep.subr.mxu1 %v4725_v14 }
  0x7f   :  { %692 = vmatpush1.msra.mxu1 %v4730_v18 }
  0x80   :  { %693 = vmatprep.subr.mxu1 %v4734_v20 }
  0x81   :  { %694 = vmatpush1.msra.mxu1 %v4738_v21 }
  0x82   :  { %695 = vmatprep.subr.mxu1 %v4742_v25 }
  0x83   :  { %696 = vmatpush1.msra.mxu1 %v4746_v27 }
  0x84   :  { %697 = vmatprep.subr.mxu1 %v4750_v28 }
  0x85   :  { %698 = vmatpush1.msra.mxu1 %v4755_v32 }
  0x86   :  { %699 = vmatprep.subr.mxu1 %v4759_v34 }
  0x87   :  { %700 = vmatpush1.msra.mxu1 %v4763_v39  ;;  %v6771_v39 = vsub.s32 0, %v4848_v52 }
  0x88   :  { %701 = vmatprep.subr.mxu1 %v4767_v35 }
  0x89   :  { %702 = vmatpush1.msra.mxu1 %v4771_v41 }
  0x8a   :  { %703 = vmatprep.subr.mxu1 %v4775_v36 }
  0x8b   :  { %704 = vmatpush1.msra.mxu1 %v4780_v37 }
  0x8c   :  { %705 = vmatprep.subr.mxu1 %v4784_v0 }
  0x8d   :  { %706 = vmatpush1.msra.mxu1 %v4788_v38  ;;  %v4861_v38 = vrot.slane %v161_v42, %v6754_v10 }
  0x8e   :  { %845 = vmatprep.subr.mxu1 %v4660_v57 }
  0xee   :  { %v4854_v56 = vpop.f32.mrf.mxu1 }
  0xf0   :  { %v4857_v37 = vpop.f32.mrf.mxu1 }
  0xf2   :  { %v393_v57 = vpop.f32.mrf.mxu1 }
  0xf3   :  { %v4868_v0 = vadd.f32 %v393_v57, %v4861_v38 }
  0xf4   :  { %v395_v54 = vpop.f32.mrf.mxu1 }
  0xf5   :  { %6958 = vst [vmem:[#allocation34_spill] sm:$0xff] %v4868_v0  ;;  %v4871_v36 = vadd.f32 %v395_v54, %v4865_v47 }
  0xf6   :  { %v399_v53 = vpop.f32.mrf.mxu1 }
  0xf7   :  { %6959 = vst [vmem:[#allocation35_spill] sm:$0xff] %v4871_v36  ;;  %v4874_v41 = vadd.f32 %v399_v53, %v4861_v38 }
  0xf8   :  { %v401_v51 = vpop.f32.mrf.mxu1 }
  0xf9   :  { %6960 = vst [vmem:[#allocation36_spill] sm:$0xff] %v4874_v41  ;;  %v4877_v10 = vadd.f32 %v401_v51, %v4865_v47 }
  0xfa   :  { %v405_v35 = vpop.f32.mrf.mxu1 }
  0xfb   :  { %6961 = vst [vmem:[#allocation37_spill] sm:$0xff] %v4877_v10  ;;  %v4880_v50 = vadd.f32 %v405_v35, %v4861_v38 }
  0xfc   :  { %v407_v55 = vpop.f32.mrf.mxu1 }
  0xfd   :  { %6962 = vst [vmem:[#allocation38_spill] sm:$0xff] %v4880_v50  ;;  %v4883_v57 = vadd.f32 %v407_v55, %v4865_v47 }
  0xfe   :  { %v411_v0 = vpop.f32.mrf.mxu1 }
  0xff   :  { %6963 = vst [vmem:[#allocation39_spill] sm:$0xff] %v4883_v57  ;;  %v4886_v54 = vadd.f32 %v411_v0, %v4861_v38  ;;  %v274_v57 = vpop.f32.mrf.mxu0  ;;  %v6766_v0 = vsub.s32 1, %v4848_v52 }
 0x100   :  { %v413_v36 = vpop.f32.mrf.mxu1 }
 0x101   :  { %6964 = vst [vmem:[#allocation40_spill] sm:$0xff] %v4886_v54  ;;  %v4889_v53 = vadd.f32 %v413_v36, %v4865_v47 }
 0x102   :  { %v417_v41 = vpop.f32.mrf.mxu1 }
 0x103   :  { %6965 = vst [vmem:[#allocation41_spill] sm:$0xff] %v4889_v53  ;;  %v4892_v51 = vadd.f32 %v417_v41, %v4861_v38 }
 0x104   :  { %v419_v10 = vpop.f32.mrf.mxu1 }
 0x105   :  { %6966 = vst [vmem:[#allocation42_spill] sm:$0xff] %v4892_v51  ;;  %v4895_v35 = vadd.f32 %v419_v10, %v4865_v47  ;;  %v4910_v10 = vrot.slane %v161_v42, %v6766_v0  ;;  %v276_v51 = vpop.f32.mrf.mxu0 }
 0x106   :  { %v423_v50 = vpop.f32.mrf.mxu1 }
 0x107   :  { %6967 = vst [vmem:[#allocation43_spill] sm:$0xff] %v4895_v35  ;;  %v4898_v55 = vadd.f32 %v423_v50, %v4861_v38  ;;  %6971 = vst [vmem:[#allocation47_spill] sm:$0xff] %v4910_v10  ;;  %v4914_v50 = vrot.slane %v161_v42, %v6771_v39 }
 0x108   :  { %v425_v54 = vpop.f32.mrf.mxu1  ;;  %v4919_v49 = vpop.f32.mrf.mxu0 }
 0x109   :  { %6968 = vst [vmem:[#allocation44_spill] sm:$0xff] %v4898_v55  ;;  %v4903_v36 = vadd.f32 %v425_v54, %v4865_v47  ;;  %6973 = vst [vmem:[#allocation49_spill] sm:$0xff] %v4919_v49 }
 0x10a   :  { %v429_v53 = vpop.f32.mrf.mxu1  ;;  %v4923_v34 = vpop.f32.mrf.mxu0 }
 0x10b   :  { %6969 = vst [vmem:[#allocation45_spill] sm:$0xff] %v4903_v36  ;;  %v4906_v41 = vadd.f32 %v429_v53, %v4861_v38  ;;  %v277_v36 = vadd.f32 %v276_v51, %v4910_v10  ;;  %v275_v53 = vadd.f32 %v274_v57, %v4914_v50 }
 0x10c   :  { %v431_v55 = vpop.f32.mrf.mxu1 }
 0x10d   :  { %6970 = vst [vmem:[#allocation46_spill] sm:$0xff] %v4906_v41  ;;  %v4917_v35 = vadd.f32 %v431_v55, %v4865_v47 }
 0x10e   :  { %v500_v54 = vpop.f32.mrf.mxu1 }
 0x10f   :  { %6972 = vst [vmem:[#allocation48_spill] sm:$0xff] %v4917_v35  ;;  %v576_v48 = vadd.f32 %v500_v54, %v275_v53 }
 0x110   :  { %v502_v41 = vpop.f32.mrf.mxu1 }
 0x111   :  { %v577_v0 = vadd.f32 %v502_v41, %v277_v36  ;;  %v3779_v55 = vmul.f32 -1.442695, %v576_v48 }
 0x112   :  { %v286_v32 = vpop.f32.mrf.mxu0 }
 0x113   :  { %v4926_v42 = vadd.f32 %v286_v32, %v4914_v50  ;;  %v3780_v39 = vmul.f32 -1.442695, %v577_v0 }
 0x114   :  { %v288_v52 = vpop.f32.mrf.mxu0 }
 0x115   :  { %6974 = vst [vmem:[#allocation50_spill] sm:$0xff] %v4926_v42  ;;  %v4929_v35 = vadd.f32 %v288_v52, %v4910_v10  ;;  %3902 = vpow2.f32 %v3780_v39  ;;  %v7003_v42 = vld [vmem:[#allocation31_spill] sm:$0xff] }
 0x116   :  { %3904 = vpow2.f32 %v3779_v55 }
 0x117   :  { %6975 = vst [vmem:[#allocation51_spill] sm:$0xff] %v4929_v35 }
 0x118   :  { %v292_v49 = vpop.f32.mrf.mxu0 }
 0x119   :  { %v4932_v57 = vadd.f32 %v292_v49, %v4914_v50 }
 0x11a   :  { %v294_v51 = vpop.f32.mrf.mxu0 }
 0x11b   :  { %6976 = vst [vmem:[#allocation52_spill] sm:$0xff] %v4932_v57  ;;  %v4935_v36 = vadd.f32 %v294_v51, %v4910_v10 }
 0x11d   :  { %6977 = vst [vmem:[#allocation53_spill] sm:$0xff] %v4935_v36 }
 0x11e   :  { %v298_v41 = vpop.f32.mrf.mxu0 }
 0x11f   :  { %v4938_v32 = vadd.f32 %v298_v41, %v4914_v50  ;;  %v388_v41 = vadd.f32 %v4854_v56, %v4861_v38 }
 0x120   :  { %v300_v0 = vpop.f32.mrf.mxu0 }
 0x121   :  { %6978 = vst [vmem:[#allocation54_spill] sm:$0xff] %v4938_v32  ;;  %v4941_v48 = vadd.f32 %v300_v0, %v4910_v10 }
 0x122   :  { %v3903_v54 = vpop.eup %3902 }
 0x123   :  { %6979 = vst [vmem:[#allocation55_spill] sm:$0xff] %v4941_v48  ;;  %v3905_v53 = vpop.eup %3904  ;;  %v589_v51 = vadd.f32 1.0, %v3903_v54  ;;  %v390_v48 = vadd.f32 %v4857_v37, %v4865_v47 }
 0x124   :  { %v304_v52 = vpop.f32.mrf.mxu0  ;;  %v583_v36 = vadd.f32 1.0, %v3905_v53 }
 0x125   :  { %v4944_v39 = vadd.f32 %v304_v52, %v4914_v50  ;;  %3906 = vrcp.f32 %v589_v51 }
 0x126   :  { %v306_v49 = vpop.f32.mrf.mxu0  ;;  %3908 = vrcp.f32 %v583_v36 }
 0x127   :  { %6980 = vst [vmem:[#allocation56_spill] sm:$0xff] %v4944_v39  ;;  %v4947_v55 = vadd.f32 %v306_v49, %v4910_v10 }
 0x129   :  { %6981 = vst [vmem:[#allocation57_spill] sm:$0xff] %v4947_v55 }
 0x12a   :  { %v310_v32 = vpop.f32.mrf.mxu0 }
 0x12b   :  { %v4952_v0 = vadd.f32 %v310_v32, %v4914_v50 }
 0x12c   :  { %v312_v39 = vpop.f32.mrf.mxu0 }
 0x12d   :  { %6982 = vst [vmem:[#allocation58_spill] sm:$0xff] %v4952_v0  ;;  %v4957_v49 = vadd.f32 %v312_v39, %v4910_v10 }
 0x12e   :  { %v571_v57 = vpop.f32.mrf.mxu1 }
 0x12f   :  { %v578_v52 = vadd.f32 %v571_v57, %v388_v41  ;;  %6983 = vst [vmem:[#allocation59_spill] sm:$0xff] %v4957_v49  ;;  %v6987_v41 = vld [vmem:[#allocation11_spill] sm:$0xff]  ;;  %v7002_v49 = vld [vmem:[#allocation20_spill] sm:$0xff] }
 0x130   :  { %v573_v35 = vpop.f32.mrf.mxu1 }
 0x131   :  { %3910 = vtanh.f32 %v578_v52  ;;  %v579_v54 = vadd.f32 %v573_v35, %v390_v48  ;;  %v316_v38 = vpop.f32.mrf.mxu0  ;;  %v6989_v52 = vld [vmem:[#allocation24_spill] sm:$0xff] }
 0x132   :  { %v4960_v56 = vadd.f32 %v316_v38, %v4914_v50  ;;  %v3907_v32 = vpop.eup %3906  ;;  %v6992_v38 = vld [vmem:[#allocation15_spill] sm:$0xff] }
 0x133   :  { %v3781_v53 = vmul.f32 -1.442695, %v579_v54  ;;  %v3909_v0 = vpop.eup %3908  ;;  %v599_v37 = vmul.f32 0.0, %v3907_v32  ;;  %v6990_v54 = vld [vmem:[#allocation14_spill] sm:$0xff] }
 0x134   :  { %6984 = vst [vmem:[#allocation60_spill] sm:$0xff] %v4960_v56  ;;  %v6993_v32 = vld [vmem:[#allocation26_spill] sm:$0xff]  ;;  %v7000_v56 = vld [vmem:[#allocation19_spill] sm:$0xff] }
 0x135   :  { %3912 = vpow2.f32 %v3781_v53  ;;  %v6991_v53 = vld [vmem:[#allocation25_spill] sm:$0xff] }
 0x13e   :  { %v3911_v55 = vpop.eup %3910 }
 0x13f   :  { %v600_v47 = vmul.f32 %v3911_v55, %v3909_v0  ;;  %v6986_v55 = vld [vmem:[#allocation10_spill] sm:$0xff]  ;;  %v6988_v0 = vld [vmem:[#allocation12_spill] sm:$0xff] }
 0x141   :  { %v4962_v57 = vadd.f32 %v600_v47, %v599_v37  ;;  %v6994_v37 = vld [vmem:[#allocation16_spill] sm:$0xff]  ;;  %v6995_v47 = vld [vmem:[#allocation27_spill] sm:$0xff] }
 0x142   :  { %v3913_v36 = vpop.eup %3912 }
 0x143   :  { %v596_v51 = vadd.f32 1.0, %v3913_v36  ;;  %3914 = vtanh.f32 %v4962_v57  ;;  %v6996_v36 = vld [vmem:[#allocation17_spill] sm:$0xff] }
 0x145   :  { %3916 = vrcp.f32 %v596_v51  ;;  %v6997_v51 = vld [vmem:[#allocation28_spill] sm:$0xff] }
 0x150   :  { %v3915_v39 = vpop.eup %3914 }
 0x152   :  { %v3917_v35 = vpop.eup %3916 }
 0x153   :  { %v4965_v48 = vmul.f32 %v3917_v35, %v3915_v39  ;;  %v6998_v39 = vld [vmem:[#allocation18_spill] sm:$0xff]  ;;  %v6999_v35 = vld [vmem:[#allocation29_spill] sm:$0xff] }
 0x155   :  { %6985 = vst [vmem:[#allocation61_spill] sm:$0xff] %v4965_v48  ;;  %669 = vmatmul.mubr.f32.vlgmr.msra.gmra.mxu0 %v4965_v48  ;;  %740 = vmatmul.mubr.f32.vlgmr.msra.gmra.mxu1 %v4965_v48  ;;  %v7001_v48 = vld [vmem:[#allocation30_spill] sm:$0xff] }
 0x156   :  { %775 = vmatpush1.msra.mxu0 %v4480_v11  ;;  %846 = vmatpush1.msra.mxu1 %v4663_v58 }
 0x157   :  { %776 = vmatprep.subr.mxu0 %v4482_v12  ;;  %847 = vmatprep.subr.mxu1 %v4667_v59 }
 0x158   :  { %777 = vmatpush1.msra.mxu0 %v4487_v13  ;;  %848 = vmatpush1.msra.mxu1 %v4673_v60 }
 0x159   :  { %778 = vmatprep.subr.mxu0 %v4496_v15  ;;  %849 = vmatprep.subr.mxu1 %v4676_v61 }
 0x15a   :  { %779 = vmatpush1.msra.mxu0 %v4499_v16  ;;  %850 = vmatpush1.msra.mxu1 %v4680_v62 }
 0x15b   :  { %780 = vmatprep.subr.mxu0 %v4502_v17  ;;  %851 = vmatprep.subr.mxu1 %v4684_v63 }
 0x15c   :  { %781 = vmatpush1.msra.mxu0 %v4510_v19  ;;  %852 = vmatpush1.msra.mxu1 %v4688_v1 }
 0x15d   :  { %782 = vmatprep.subr.mxu0 %v4522_v22  ;;  %853 = vmatprep.subr.mxu1 %v4692_v2 }
 0x15e   :  { %783 = vmatpush1.msra.mxu0 %v4525_v23  ;;  %854 = vmatpush1.msra.mxu1 %v4696_v3 }
 0x15f   :  { %784 = vmatprep.subr.mxu0 %v4528_v24  ;;  %855 = vmatprep.subr.mxu1 %v4700_v4 }
 0x160   :  { %785 = vmatpush1.msra.mxu0 %v4536_v26  ;;  %856 = vmatpush1.msra.mxu1 %v4705_v5 }
 0x161   :  { %786 = vmatprep.subr.mxu0 %v4548_v29  ;;  %857 = vmatprep.subr.mxu1 %v4709_v6 }
 0x162   :  { %787 = vmatpush1.msra.mxu0 %v4551_v30  ;;  %858 = vmatpush1.msra.mxu1 %v4713_v7 }
 0x163   :  { %788 = vmatprep.subr.mxu0 %v4554_v31  ;;  %859 = vmatprep.subr.mxu1 %v4717_v8 }
 0x164   :  { %789 = vmatpush1.msra.mxu0 %v4562_v33  ;;  %860 = vmatpush1.msra.mxu1 %v4721_v9 }
 0x165   :  { %790 = vmatprep.subr.mxu0 %v6986_v55  ;;  %861 = vmatprep.subr.mxu1 %v4725_v14 }
 0x166   :  { %791 = vmatpush1.msra.mxu0 %v6987_v41  ;;  %862 = vmatpush1.msra.mxu1 %v4730_v18 }
 0x167   :  { %792 = vmatprep.subr.mxu0 %v6988_v0  ;;  %863 = vmatprep.subr.mxu1 %v4734_v20 }
 0x168   :  { %793 = vmatpush1.msra.mxu0 %v4588_v40  ;;  %864 = vmatpush1.msra.mxu1 %v4738_v21 }
 0x169   :  { %794 = vmatprep.subr.mxu0 %v4600_v43  ;;  %865 = vmatprep.subr.mxu1 %v4742_v25 }
 0x16a   :  { %795 = vmatpush1.msra.mxu0 %v4603_v44  ;;  %866 = vmatpush1.msra.mxu1 %v4746_v27 }
 0x16b   :  { %796 = vmatprep.subr.mxu0 %v4606_v45  ;;  %867 = vmatprep.subr.mxu1 %v4750_v28 }
 0x16c   :  { %797 = vmatpush1.msra.mxu0 %v4611_v46  ;;  %868 = vmatpush1.msra.mxu1 %v6989_v52  ;;  %v7012_v52 = vld [vmem:[#allocation34_spill] sm:$0xff] }
 0x16d   :  { %798 = vmatprep.subr.mxu0 %v6990_v54  ;;  %869 = vmatprep.subr.mxu1 %v6991_v53  ;;  %v7011_v54 = vld [vmem:[#allocation35_spill] sm:$0xff] }
 0x16e   :  { %799 = vmatpush1.msra.mxu0 %v6992_v38  ;;  %870 = vmatpush1.msra.mxu1 %v6993_v32  ;;  %v7004_v32 = vld [vmem:[#allocation21_spill] sm:$0xff] }
 0x16f   :  { %800 = vmatprep.subr.mxu0 %v6994_v37  ;;  %871 = vmatprep.subr.mxu1 %v6995_v47  ;;  %v7005_v37 = vmov 0.0   ;;  %v7006_v47 = vld [vmem:[#allocation32_spill] sm:$0xff] }
 0x170   :  { %801 = vmatpush1.msra.mxu0 %v6996_v36  ;;  %872 = vmatpush1.msra.mxu1 %v6997_v51  ;;  %v7007_v51 = vld [vmem:[#allocation9_spill] sm:$0xff] }
 0x171   :  { %802 = vmatprep.subr.mxu0 %v6998_v39  ;;  %873 = vmatprep.subr.mxu1 %v6999_v35  ;;  %v7008_v39 = vld [vmem:[#allocation22_spill] sm:$0xff]  ;;  %v5035_v35 = vpop.f32.mrf.mxu0 }
 0x172   :  { %803 = vmatpush1.msra.mxu0 %v7000_v56  ;;  %874 = vmatpush1.msra.mxu1 %v7001_v48  ;;  %7009 = vst [vmem:[#allocation10_spill] sm:$0xff] %v5035_v35  ;;  %v7010_v48 = vld [vmem:[#allocation49_spill] sm:$0xff] }
 0x173   :  { %804 = vmatprep.subr.mxu0 %v7002_v49  ;;  %875 = vmatprep.subr.mxu1 %v7003_v42  ;;  %v281_v56 = vadd.f32 %v7010_v48, %v4914_v50  ;;  %v283_v42 = vadd.f32 %v4923_v34, %v4910_v10  ;;  %v5374_v10 = vld [vmem:[#allocation2 + $0x58] sm:$0xff] }
 0x174   :  { %805 = vmatpush1.msra.mxu0 %v7004_v32  ;;  %838 = vmatprep.mubr.f32.mxu0 %v7005_v37 }
 0x175   :  { %876 = vmatpush1.msra.mxu1 %v7006_v47  ;;  %909 = vmatprep.mubr.f32.mxu1 %v7005_v37 }
 0x176   :  { %944 = vmatprep.subr.mxu0 %v7007_v51  ;;  %1015 = vmatprep.subr.mxu1 %v7008_v39 }
 0x215   :  { %v670_v49 = vpop.f32.mrf.mxu0  ;;  %v741_v47 = vpop.f32.mrf.mxu1 }
 0x216   :  { %v746_v32 = vadd.f32 %v670_v49, %v281_v56  ;;  %v748_v35 = vadd.f32 %v741_v47, %v7012_v52 }
 0x217   :  { %v672_v36 = vpop.f32.mrf.mxu0  ;;  %v743_v51 = vpop.f32.mrf.mxu1 }
 0x218   :  { %v3782_v38 = vmul.f32 -1.442695, %v746_v32  ;;  %v747_v53 = vadd.f32 %v672_v36, %v283_v42  ;;  %v749_v39 = vadd.f32 %v743_v51, %v7011_v54  ;;  %v7037_v51 = vld [vmem:[#allocation51_spill] sm:$0xff] }
 0x21a   :  { %3918 = vpow2.f32 %v3782_v38  ;;  %v3783_v37 = vmul.f32 -1.442695, %v747_v53  ;;  %v3784_v46 = vmul.f32 -1.442695, %v749_v39 }
 0x21c   :  { %3920 = vpow2.f32 %v3783_v37 }
 0x21d   :  { %3922 = vtanh.f32 %v748_v35 }
 0x21e   :  { %3924 = vpow2.f32 %v3784_v46  ;;  %v7033_v46 = vld [vmem:[#allocation32_spill] sm:$0xff] }
 0x227   :  { %v3919_v28 = vpop.eup %3918 }
 0x228   :  { %v753_v50 = vadd.f32 1.0, %v3919_v28 }
 0x229   :  { %v3921_v48 = vpop.eup %3920 }
 0x22a   :  { %3926 = vrcp.f32 %v753_v50  ;;  %v759_v34 = vadd.f32 1.0, %v3921_v48  ;;  %v3923_v49 = vpop.eup %3922 }
 0x22b   :  { %v3925_v42 = vpop.eup %3924 }
 0x22c   :  { %3928 = vrcp.f32 %v759_v34  ;;  %v766_v32 = vadd.f32 1.0, %v3925_v42  ;;  %v7038_v42 = vld [vmem:[#allocation37_spill] sm:$0xff] }
 0x22e   :  { %3930 = vrcp.f32 %v766_v32 }
 0x237   :  { %v3927_v56 = vpop.eup %3926 }
 0x238   :  { %v770_v38 = vmul.f32 %v3927_v56, %v3923_v49 }
 0x239   :  { %v3929_v53 = vpop.eup %3928 }
 0x23a   :  { %v769_v37 = vmul.f32 %v3929_v53, %v4962_v57  ;;  %v5115_v57 = vld [vmem:[#allocation2 + $0x1e8] sm:$0xff] }
 0x23b   :  { %v3931_v28 = vpop.eup %3930  ;;  %7034 = vst [vmem:[#allocation12_spill] sm:$0xff] %v5115_v57 }
 0x23c   :  { %v5044_v54 = vadd.f32 %v770_v38, %v769_v37  ;;  %v7039_v38 = vld [vmem:[#allocation36_spill] sm:$0xff] }
 0x23e   :  { %3932 = vtanh.f32 %v5044_v54 }
 0x24b   :  { %v3933_v52 = vpop.eup %3932 }
 0x24c   :  { %v5047_v47 = vmul.f32 %v3933_v52, %v3931_v28 }
 0x24e   :  { %7013 = vst [vmem:[#allocation11_spill] sm:$0xff] %v5047_v47  ;;  %839 = vmatmul.mubr.f32.vlgmr.msra.gmra.mxu0 %v5047_v47  ;;  %910 = vmatmul.mubr.f32.vlgmr.msra.gmra.mxu1 %v5047_v47  ;;  %v5386_v47 = vld [vmem:[#allocation2 + $0x30] sm:$0xff] }
 0x24f   :  { %945 = vmatpush1.msra.mxu0 %v4480_v11  ;;  %1016 = vmatpush1.msra.mxu1 %v4663_v58  ;;  %v7014_v11 = vld [vmem:[#allocation23_spill] sm:$0xff] }
 0x250   :  { %946 = vmatprep.subr.mxu0 %v4482_v12  ;;  %1017 = vmatprep.subr.mxu1 %v4667_v59  ;;  %v7015_v12 = vld [vmem:[#allocation13_spill] sm:$0xff] }
 0x251   :  { %947 = vmatpush1.msra.mxu0 %v4487_v13  ;;  %1018 = vmatpush1.msra.mxu1 %v4673_v60  ;;  %v7016_v13 = vld [vmem:[#allocation24_spill] sm:$0xff] }
 0x252   :  { %948 = vmatprep.subr.mxu0 %v4496_v15  ;;  %1019 = vmatprep.subr.mxu1 %v4676_v61  ;;  %v7017_v15 = vld [vmem:[#allocation14_spill] sm:$0xff] }
 0x253   :  { %949 = vmatpush1.msra.mxu0 %v4499_v16  ;;  %1020 = vmatpush1.msra.mxu1 %v4680_v62  ;;  %v7018_v16 = vld [vmem:[#allocation25_spill] sm:$0xff] }
 0x254   :  { %950 = vmatprep.subr.mxu0 %v4502_v17  ;;  %1021 = vmatprep.subr.mxu1 %v4684_v63  ;;  %v7019_v17 = vld [vmem:[#allocation15_spill] sm:$0xff] }
 0x255   :  { %951 = vmatpush1.msra.mxu0 %v4510_v19  ;;  %1022 = vmatpush1.msra.mxu1 %v4688_v1  ;;  %v7020_v19 = vld [vmem:[#allocation26_spill] sm:$0xff] }
 0x256   :  { %952 = vmatprep.subr.mxu0 %v4522_v22  ;;  %1023 = vmatprep.subr.mxu1 %v4692_v2  ;;  %v7021_v22 = vld [vmem:[#allocation16_spill] sm:$0xff] }
 0x257   :  { %953 = vmatpush1.msra.mxu0 %v4525_v23  ;;  %1024 = vmatpush1.msra.mxu1 %v4696_v3  ;;  %v7022_v23 = vld [vmem:[#allocation27_spill] sm:$0xff] }
 0x258   :  { %954 = vmatprep.subr.mxu0 %v4528_v24  ;;  %1025 = vmatprep.subr.mxu1 %v4700_v4  ;;  %v7023_v24 = vld [vmem:[#allocation17_spill] sm:$0xff] }
 0x259   :  { %955 = vmatpush1.msra.mxu0 %v4536_v26  ;;  %1026 = vmatpush1.msra.mxu1 %v4705_v5  ;;  %v7024_v26 = vld [vmem:[#allocation28_spill] sm:$0xff] }
 0x25a   :  { %956 = vmatprep.subr.mxu0 %v4548_v29  ;;  %1027 = vmatprep.subr.mxu1 %v4709_v6  ;;  %v7025_v29 = vld [vmem:[#allocation18_spill] sm:$0xff]  ;;  %7058 = vst [vmem:[#allocation28_spill] sm:$0xff] %v5374_v10 }
 0x25b   :  { %957 = vmatpush1.msra.mxu0 %v4551_v30  ;;  %1028 = vmatpush1.msra.mxu1 %v4713_v7  ;;  %v7026_v30 = vld [vmem:[#allocation29_spill] sm:$0xff] }
 0x25c   :  { %958 = vmatprep.subr.mxu0 %v4554_v31  ;;  %1029 = vmatprep.subr.mxu1 %v4717_v8  ;;  %v7027_v31 = vld [vmem:[#allocation19_spill] sm:$0xff] }
 0x25d   :  { %959 = vmatpush1.msra.mxu0 %v4562_v33  ;;  %1030 = vmatpush1.msra.mxu1 %v4721_v9  ;;  %v7028_v33 = vld [vmem:[#allocation30_spill] sm:$0xff]  ;;  %7061 = vst [vmem:[#allocation19_spill] sm:$0xff] %v5386_v47 }
 0x25e   :  { %960 = vmatprep.subr.mxu0 %v6986_v55  ;;  %1031 = vmatprep.subr.mxu1 %v4725_v14  ;;  %v7035_v55 = vld [vmem:[#allocation22_spill] sm:$0xff] }
 0x25f   :  { %961 = vmatpush1.msra.mxu0 %v6987_v41  ;;  %1032 = vmatpush1.msra.mxu1 %v4730_v18 }
 0x260   :  { %962 = vmatprep.subr.mxu0 %v6988_v0  ;;  %1033 = vmatprep.subr.mxu1 %v4734_v20  ;;  %v7036_v0 = vld [vmem:[#allocation50_spill] sm:$0xff] }
 0x261   :  { %963 = vmatpush1.msra.mxu0 %v4588_v40  ;;  %1034 = vmatpush1.msra.mxu1 %v4738_v21  ;;  %v7029_v40 = vld [vmem:[#allocation20_spill] sm:$0xff] }
 0x262   :  { %964 = vmatprep.subr.mxu0 %v4600_v43  ;;  %1035 = vmatprep.subr.mxu1 %v4742_v25  ;;  %v7030_v43 = vld [vmem:[#allocation31_spill] sm:$0xff] }
 0x263   :  { %965 = vmatpush1.msra.mxu0 %v4603_v44  ;;  %1036 = vmatpush1.msra.mxu1 %v4746_v27  ;;  %v7031_v44 = vld [vmem:[#allocation21_spill] sm:$0xff] }
 0x264   :  { %966 = vmatprep.subr.mxu0 %v4606_v45  ;;  %1037 = vmatprep.subr.mxu1 %v7014_v11  ;;  %v7032_v45 = vmov 0.0  }
 0x265   :  { %967 = vmatpush1.msra.mxu0 %v7015_v12  ;;  %1038 = vmatpush1.msra.mxu1 %v7016_v13 }
 0x266   :  { %968 = vmatprep.subr.mxu0 %v7017_v15  ;;  %1039 = vmatprep.subr.mxu1 %v7018_v16 }
 0x267   :  { %969 = vmatpush1.msra.mxu0 %v7019_v17  ;;  %1040 = vmatpush1.msra.mxu1 %v7020_v19 }
 0x268   :  { %970 = vmatprep.subr.mxu0 %v7021_v22  ;;  %1041 = vmatprep.subr.mxu1 %v7022_v23 }
 0x269   :  { %971 = vmatpush1.msra.mxu0 %v7023_v24  ;;  %1042 = vmatpush1.msra.mxu1 %v7024_v26 }
 0x26a   :  { %972 = vmatprep.subr.mxu0 %v7025_v29  ;;  %1043 = vmatprep.subr.mxu1 %v7026_v30 }
 0x26b   :  { %973 = vmatpush1.msra.mxu0 %v7027_v31  ;;  %1044 = vmatpush1.msra.mxu1 %v7028_v33 }
 0x26c   :  { %974 = vmatprep.subr.mxu0 %v7029_v40  ;;  %1045 = vmatprep.subr.mxu1 %v7030_v43 }
 0x26d   :  { %975 = vmatpush1.msra.mxu0 %v7031_v44  ;;  %1008 = vmatprep.mubr.f32.mxu0 %v7032_v45 }
 0x26e   :  { %1046 = vmatpush1.msra.mxu1 %v7033_v46  ;;  %1079 = vmatprep.mubr.f32.mxu1 %v7032_v45 }
 0x26f   :  { %1114 = vmatprep.subr.mxu0 %v5115_v57  ;;  %1185 = vmatprep.subr.mxu1 %v7035_v55 }
 0x30e   :  { %v840_v41 = vpop.f32.mrf.mxu0  ;;  %v911_v48 = vpop.f32.mrf.mxu1 }
 0x30f   :  { %v916_v36 = vadd.f32 %v840_v41, %v7036_v0  ;;  %v918_v53 = vadd.f32 %v911_v48, %v7039_v38  ;;  %v7052_v38 = vld [vmem:[#allocation39_spill] sm:$0xff] }
 0x310   :  { %v842_v39 = vpop.f32.mrf.mxu0  ;;  %v913_v49 = vpop.f32.mrf.mxu1 }
 0x311   :  { %v3785_v35 = vmul.f32 -1.442695, %v916_v36  ;;  %v917_v50 = vadd.f32 %v842_v39, %v7037_v51  ;;  %v919_v56 = vadd.f32 %v913_v49, %v7038_v42  ;;  %v5131_v36 = vld [vmem:[#allocation2 + $0x1e0] sm:$0xff] }
 0x312   :  { %v5139_v39 = vld [vmem:[#allocation2 + $0x1c0] sm:$0xff] }
 0x313   :  { %3934 = vpow2.f32 %v3785_v35  ;;  %v3786_v34 = vmul.f32 -1.442695, %v917_v50  ;;  %v3787_v32 = vmul.f32 -1.442695, %v919_v56  ;;  %v5143_v35 = vld [vmem:[#allocation2 + $0x1a8] sm:$0xff]  ;;  %v5147_v51 = vld [vmem:[#allocation2 + $0x1a0] sm:$0xff] }
 0x315   :  { %3936 = vpow2.f32 %v3786_v34  ;;  %v7051_v34 = vld [vmem:[#allocation53_spill] sm:$0xff] }
 0x316   :  { %3938 = vtanh.f32 %v918_v53 }
 0x317   :  { %3940 = vpow2.f32 %v3787_v32  ;;  %v7053_v32 = vld [vmem:[#allocation38_spill] sm:$0xff] }
 0x320   :  { %v3935_v37 = vpop.eup %3934 }
 0x321   :  { %v923_v28 = vadd.f32 1.0, %v3935_v37 }
 0x322   :  { %v3937_v52 = vpop.eup %3936 }
 0x323   :  { %3942 = vrcp.f32 %v923_v28  ;;  %v929_v12 = vadd.f32 1.0, %v3937_v52  ;;  %v3939_v15 = vpop.eup %3938 }
 0x324   :  { %v3941_v17 = vpop.eup %3940 }
 0x325   :  { %3944 = vrcp.f32 %v929_v12  ;;  %v936_v31 = vadd.f32 1.0, %v3941_v17 }
 0x327   :  { %3946 = vrcp.f32 %v936_v31 }
 0x330   :  { %v3943_v22 = vpop.eup %3942 }
 0x331   :  { %v940_v24 = vmul.f32 %v3943_v22, %v3939_v15 }
 0x332   :  { %v3945_v29 = vpop.eup %3944 }
 0x333   :  { %v939_v40 = vmul.f32 %v3945_v29, %v5044_v54  ;;  %v5135_v54 = vld [vmem:[#allocation2 + $0x1c8] sm:$0xff] }
 0x334   :  { %v3947_v55 = vpop.eup %3946 }
 0x335   :  { %v5124_v44 = vadd.f32 %v940_v24, %v939_v40 }
 0x337   :  { %3948 = vtanh.f32 %v5124_v44 }
 0x344   :  { %v3949_v41 = vpop.eup %3948 }
 0x345   :  { %v5127_v0 = vmul.f32 %v3949_v41, %v3947_v55 }
 0x347   :  { %7040 = vst [vmem:[#allocation9_spill] sm:$0xff] %v5127_v0  ;;  %1009 = vmatmul.mubr.f32.vlgmr.msra.gmra.mxu0 %v5127_v0  ;;  %1080 = vmatmul.mubr.f32.vlgmr.msra.gmra.mxu1 %v5127_v0  ;;  %v5382_v0 = vld [vmem:[#allocation2 + $0x38] sm:$0xff] }
 0x348   :  { %1115 = vmatpush1.msra.mxu0 %v5131_v36  ;;  %1186 = vmatpush1.msra.mxu1 %v4663_v58  ;;  %v5151_v58 = vld [vmem:[#allocation2 + $0x188] sm:$0xff]  ;;  %7060 = vst [vmem:[#allocation29_spill] sm:$0xff] %v5382_v0 }
 0x349   :  { %1116 = vmatprep.subr.mxu0 %v5135_v54  ;;  %1187 = vmatprep.subr.mxu1 %v4667_v59  ;;  %v5155_v59 = vld [vmem:[#allocation2 + $0x180] sm:$0xff] }
 0x34a   :  { %1117 = vmatpush1.msra.mxu0 %v5139_v39  ;;  %1188 = vmatpush1.msra.mxu1 %v4673_v60  ;;  %v5159_v60 = vld [vmem:[#allocation2 + $0x168] sm:$0xff] }
 0x34b   :  { %1118 = vmatprep.subr.mxu0 %v5143_v35  ;;  %1189 = vmatprep.subr.mxu1 %v4676_v61  ;;  %v5163_v61 = vld [vmem:[#allocation2 + $0x160] sm:$0xff] }
 0x34c   :  { %1119 = vmatpush1.msra.mxu0 %v5147_v51  ;;  %1190 = vmatpush1.msra.mxu1 %v4680_v62  ;;  %v5167_v62 = vld [vmem:[#allocation2 + $0x148] sm:$0xff] }
 0x34d   :  { %1120 = vmatprep.subr.mxu0 %v5151_v58  ;;  %1191 = vmatprep.subr.mxu1 %v4684_v63  ;;  %v5171_v63 = vld [vmem:[#allocation2 + $0x140] sm:$0xff] }
 0x34e   :  { %1121 = vmatpush1.msra.mxu0 %v5155_v59  ;;  %1192 = vmatpush1.msra.mxu1 %v4688_v1  ;;  %v5175_v1 = vld [vmem:[#allocation2 + $0x128] sm:$0xff] }
 0x34f   :  { %1122 = vmatprep.subr.mxu0 %v5159_v60  ;;  %1193 = vmatprep.subr.mxu1 %v4692_v2  ;;  %v5179_v2 = vld [vmem:[#allocation2 + $0x120] sm:$0xff] }
 0x350   :  { %1123 = vmatpush1.msra.mxu0 %v5163_v61  ;;  %1194 = vmatpush1.msra.mxu1 %v4696_v3  ;;  %v5183_v3 = vld [vmem:[#allocation2 + $0x108] sm:$0xff] }
 0x351   :  { %1124 = vmatprep.subr.mxu0 %v5167_v62  ;;  %1195 = vmatprep.subr.mxu1 %v4700_v4  ;;  %v5187_v4 = vld [vmem:[#allocation2 + $0x100] sm:$0xff] }
 0x352   :  { %1125 = vmatpush1.msra.mxu0 %v5171_v63  ;;  %1196 = vmatpush1.msra.mxu1 %v4705_v5  ;;  %v5191_v5 = vld [vmem:[#allocation2 + $0xe8] sm:$0xff] }
 0x353   :  { %1126 = vmatprep.subr.mxu0 %v5175_v1  ;;  %1197 = vmatprep.subr.mxu1 %v4709_v6  ;;  %v5195_v6 = vld [vmem:[#allocation2 + $0xe0] sm:$0xff] }
 0x354   :  { %1127 = vmatpush1.msra.mxu0 %v5179_v2  ;;  %1198 = vmatpush1.msra.mxu1 %v4713_v7  ;;  %v5199_v7 = vld [vmem:[#allocation2 + $0xc8] sm:$0xff] }
 0x355   :  { %1128 = vmatprep.subr.mxu0 %v5183_v3  ;;  %1199 = vmatprep.subr.mxu1 %v4717_v8  ;;  %v5203_v8 = vld [vmem:[#allocation2 + $0xc0] sm:$0xff] }
 0x356   :  { %1129 = vmatpush1.msra.mxu0 %v5187_v4  ;;  %1200 = vmatpush1.msra.mxu1 %v4721_v9  ;;  %v5207_v9 = vld [vmem:[#allocation2 + $0xa8] sm:$0xff] }
 0x357   :  { %1130 = vmatprep.subr.mxu0 %v5191_v5  ;;  %1201 = vmatprep.subr.mxu1 %v4725_v14  ;;  %v5211_v14 = vld [vmem:[#allocation2 + $0xa0] sm:$0xff] }
 0x358   :  { %1131 = vmatpush1.msra.mxu0 %v5195_v6  ;;  %1202 = vmatpush1.msra.mxu1 %v4730_v18  ;;  %v5215_v18 = vld [vmem:[#allocation2 + $0x88] sm:$0xff] }
 0x359   :  { %1132 = vmatprep.subr.mxu0 %v5199_v7  ;;  %1203 = vmatprep.subr.mxu1 %v4734_v20  ;;  %v5219_v20 = vld [vmem:[#allocation2 + $0x80] sm:$0xff] }
 0x35a   :  { %1133 = vmatpush1.msra.mxu0 %v5203_v8  ;;  %1204 = vmatpush1.msra.mxu1 %v4738_v21  ;;  %v5223_v21 = vld [vmem:[#allocation2 + $0x68] sm:$0xff] }
 0x35b   :  { %1134 = vmatprep.subr.mxu0 %v5207_v9  ;;  %1205 = vmatprep.subr.mxu1 %v4742_v25  ;;  %7041 = vst [vmem:[#allocation49_spill] sm:$0xff] %v5223_v21  ;;  %v5227_v25 = vld [vmem:[#allocation2 + $0x60] sm:$0xff] }
 0x35c   :  { %1135 = vmatpush1.msra.mxu0 %v5211_v14  ;;  %1206 = vmatpush1.msra.mxu1 %v4746_v27  ;;  %7042 = vst [vmem:[#allocation35_spill] sm:$0xff] %v5227_v25  ;;  %v5231_v27 = vld [vmem:[#allocation2 + $0x48] sm:$0xff] }
 0x35d   :  { %1136 = vmatprep.subr.mxu0 %v5215_v18  ;;  %1207 = vmatprep.subr.mxu1 %v7014_v11  ;;  %7043 = vst [vmem:[#allocation34_spill] sm:$0xff] %v5231_v27  ;;  %v5235_v11 = vld [vmem:[#allocation2 + $0x40] sm:$0xff] }
 0x35e   :  { %1137 = vmatpush1.msra.mxu0 %v5219_v20  ;;  %1208 = vmatpush1.msra.mxu1 %v7016_v13  ;;  %7044 = vst [vmem:[#allocation23_spill] sm:$0xff] %v5235_v11  ;;  %v5239_v13 = vld [vmem:[#allocation2 + $0x28] sm:$0xff] }
 0x35f   :  { %1138 = vmatprep.subr.mxu0 %v5223_v21  ;;  %1209 = vmatprep.subr.mxu1 %v7018_v16  ;;  %7045 = vst [vmem:[#allocation13_spill] sm:$0xff] %v5239_v13  ;;  %v5243_v16 = vld [vmem:[#allocation2 + $0x20] sm:$0xff] }
 0x360   :  { %1139 = vmatpush1.msra.mxu0 %v5227_v25  ;;  %1210 = vmatpush1.msra.mxu1 %v7020_v19  ;;  %7046 = vst [vmem:[#allocation24_spill] sm:$0xff] %v5243_v16  ;;  %v5247_v19 = vld [vmem:[#allocation2 + $0x8] sm:$0xff] }
 0x361   :  { %1140 = vmatprep.subr.mxu0 %v5231_v27  ;;  %1211 = vmatprep.subr.mxu1 %v7022_v23  ;;  %7047 = vst [vmem:[#allocation14_spill] sm:$0xff] %v5247_v19  ;;  %v5251_v23 = vld [vmem:[#allocation2] sm:$0xff] }
 0x362   :  { %1141 = vmatpush1.msra.mxu0 %v5235_v11  ;;  %1212 = vmatpush1.msra.mxu1 %v7024_v26  ;;  %7048 = vst [vmem:[#allocation25_spill] sm:$0xff] %v5251_v23  ;;  %v5258_v26 = vld [vmem:[#allocation2 + $0x1f8] sm:$0xff] }
 0x363   :  { %1142 = vmatprep.subr.mxu0 %v5239_v13  ;;  %1213 = vmatprep.subr.mxu1 %v7026_v30  ;;  %7049 = vst [vmem:[#allocation15_spill] sm:$0xff] %v5258_v26 }
 0x364   :  { %1143 = vmatpush1.msra.mxu0 %v5243_v16  ;;  %1214 = vmatpush1.msra.mxu1 %v7028_v33  ;;  %v7050_v33 = vld [vmem:[#allocation52_spill] sm:$0xff] }
 0x365   :  { %1144 = vmatprep.subr.mxu0 %v5247_v19  ;;  %1215 = vmatprep.subr.mxu1 %v7030_v43 }
 0x366   :  { %1145 = vmatpush1.msra.mxu0 %v5251_v23  ;;  %1178 = vmatprep.mubr.f32.mxu0 %v7032_v45 }
 0x367   :  { %1216 = vmatpush1.msra.mxu1 %v7033_v46  ;;  %1249 = vmatprep.mubr.f32.mxu1 %v7032_v45 }
 0x368   :  { %1284 = vmatprep.subr.mxu0 %v5115_v57  ;;  %1355 = vmatprep.subr.mxu1 %v5258_v26 }
 0x407   :  { %v1010_v30 = vpop.f32.mrf.mxu0  ;;  %v1081_v42 = vpop.f32.mrf.mxu1 }
 0x408   :  { %v1086_v50 = vadd.f32 %v1010_v30, %v7050_v33  ;;  %v1088_v37 = vadd.f32 %v1081_v42, %v7053_v32  ;;  %v5290_v42 = vld [vmem:[#allocation2 + $0x1b0] sm:$0xff]  ;;  %v5310_v32 = vld [vmem:[#allocation2 + $0x158] sm:$0xff] }
 0x409   :  { %v1012_v43 = vpop.f32.mrf.mxu0  ;;  %v1083_v46 = vpop.f32.mrf.mxu1 }
 0x40a   :  { %v3788_v48 = vmul.f32 -1.442695, %v1086_v50  ;;  %v1087_v49 = vadd.f32 %v1012_v43, %v7051_v34  ;;  %v1089_v53 = vadd.f32 %v1083_v46, %v7052_v38  ;;  %v5282_v34 = vld [vmem:[#allocation2 + $0x1d0] sm:$0xff]  ;;  %v5302_v38 = vld [vmem:[#allocation2 + $0x178] sm:$0xff] }
 0x40b   :  { %v5298_v46 = vld [vmem:[#allocation2 + $0x190] sm:$0xff] }
 0x40c   :  { %3950 = vpow2.f32 %v3788_v48  ;;  %v3789_v56 = vmul.f32 -1.442695, %v1087_v49  ;;  %v3790_v28 = vmul.f32 -1.442695, %v1089_v53  ;;  %v5274_v48 = vld [vmem:[#allocation2 + $0x1f0] sm:$0xff]  ;;  %v5286_v49 = vld [vmem:[#allocation2 + $0x1b8] sm:$0xff] }
 0x40d   :  { %v5306_v53 = vld [vmem:[#allocation2 + $0x170] sm:$0xff] }
 0x40e   :  { %3952 = vpow2.f32 %v3789_v56  ;;  %v5294_v56 = vld [vmem:[#allocation2 + $0x198] sm:$0xff] }
 0x40f   :  { %3954 = vtanh.f32 %v1088_v37  ;;  %v5314_v37 = vld [vmem:[#allocation2 + $0x150] sm:$0xff] }
 0x410   :  { %3956 = vpow2.f32 %v3790_v28  ;;  %v5318_v28 = vld [vmem:[#allocation2 + $0x138] sm:$0xff] }
 0x419   :  { %v3951_v52 = vpop.eup %3950 }
 0x41a   :  { %v1093_v12 = vadd.f32 1.0, %v3951_v52  ;;  %v5322_v52 = vld [vmem:[#allocation2 + $0x130] sm:$0xff] }
 0x41b   :  { %v3953_v15 = vpop.eup %3952 }
 0x41c   :  { %3958 = vrcp.f32 %v1093_v12  ;;  %v1099_v17 = vadd.f32 1.0, %v3953_v15  ;;  %v3955_v22 = vpop.eup %3954  ;;  %v5326_v12 = vld [vmem:[#allocation2 + $0x118] sm:$0xff]  ;;  %v5330_v15 = vld [vmem:[#allocation2 + $0x110] sm:$0xff] }
 0x41d   :  { %v3957_v24 = vpop.eup %3956 }
 0x41e   :  { %3960 = vrcp.f32 %v1099_v17  ;;  %v1106_v55 = vadd.f32 1.0, %v3957_v24  ;;  %v5334_v17 = vld [vmem:[#allocation2 + $0xf8] sm:$0xff] }
 0x41f   :  { %v5342_v24 = vld [vmem:[#allocation2 + $0xd8] sm:$0xff] }
 0x420   :  { %3962 = vrcp.f32 %v1106_v55  ;;  %v5358_v55 = vld [vmem:[#allocation2 + $0x98] sm:$0xff] }
 0x429   :  { %v3959_v29 = vpop.eup %3958 }
 0x42a   :  { %v1110_v31 = vmul.f32 %v3959_v29, %v3955_v22  ;;  %v5338_v22 = vld [vmem:[#allocation2 + $0xf0] sm:$0xff] }
 0x42b   :  { %v3961_v40 = vpop.eup %3960  ;;  %v5346_v29 = vld [vmem:[#allocation2 + $0xd0] sm:$0xff] }
 0x42c   :  { %v1109_v41 = vmul.f32 %v3961_v40, %v5124_v44  ;;  %v5278_v44 = vld [vmem:[#allocation2 + $0x1d8] sm:$0xff]  ;;  %v5354_v40 = vld [vmem:[#allocation2 + $0xb0] sm:$0xff] }
 0x42d   :  { %v3963_v33 = vpop.eup %3962 }
 0x42e   :  { %v5266_v30 = vadd.f32 %v1110_v31, %v1109_v41  ;;  %v5350_v31 = vld [vmem:[#allocation2 + $0xb8] sm:$0xff]  ;;  %v5362_v41 = vld [vmem:[#allocation2 + $0x90] sm:$0xff] }
 0x42f   :  { %7055 = vst [vmem:[#allocation16_spill] sm:$0xff] %v5362_v41 }
 0x430   :  { %3964 = vtanh.f32 %v5266_v30 }
 0x43d   :  { %v3965_v50 = vpop.eup %3964 }
 0x43e   :  { %v5269_v43 = vmul.f32 %v3965_v50, %v3963_v33  ;;  %v5366_v33 = vld [vmem:[#allocation2 + $0x78] sm:$0xff]  ;;  %v5370_v50 = vld [vmem:[#allocation2 + $0x70] sm:$0xff] }
 0x43f   :  { %7056 = vst [vmem:[#allocation27_spill] sm:$0xff] %v5366_v33  ;;  %7057 = vst [vmem:[#allocation17_spill] sm:$0xff] %v5370_v50 }
 0x440   :  { %7054 = vst [vmem:[#allocation26_spill] sm:$0xff] %v5269_v43  ;;  %1179 = vmatmul.mubr.f32.vlgmr.msra.gmra.mxu0 %v5269_v43  ;;  %1250 = vmatmul.mubr.f32.vlgmr.msra.gmra.mxu1 %v5269_v43  ;;  %v5378_v43 = vld [vmem:[#allocation2 + $0x50] sm:$0xff] }
 0x441   :  { %1285 = vmatpush1.msra.mxu0 %v5131_v36  ;;  %1356 = vmatpush1.msra.mxu1 %v5274_v48  ;;  %7059 = vst [vmem:[#allocation18_spill] sm:$0xff] %v5378_v43 }
 0x442   :  { %1286 = vmatprep.subr.mxu0 %v5135_v54  ;;  %1357 = vmatprep.subr.mxu1 %v5278_v44 }
 0x443   :  { %1287 = vmatpush1.msra.mxu0 %v5139_v39  ;;  %1358 = vmatpush1.msra.mxu1 %v5282_v34 }
 0x444   :  { %1288 = vmatprep.subr.mxu0 %v5143_v35  ;;  %1359 = vmatprep.subr.mxu1 %v5286_v49 }
 0x445   :  { %1289 = vmatpush1.msra.mxu0 %v5147_v51  ;;  %1360 = vmatpush1.msra.mxu1 %v5290_v42 }
 0x446   :  { %1290 = vmatprep.subr.mxu0 %v5151_v58  ;;  %1361 = vmatprep.subr.mxu1 %v5294_v56 }
 0x447   :  { %1291 = vmatpush1.msra.mxu0 %v5155_v59  ;;  %1362 = vmatpush1.msra.mxu1 %v5298_v46 }
 0x448   :  { %1292 = vmatprep.subr.mxu0 %v5159_v60  ;;  %1363 = vmatprep.subr.mxu1 %v5302_v38 }
 0x449   :  { %1293 = vmatpush1.msra.mxu0 %v5163_v61  ;;  %1364 = vmatpush1.msra.mxu1 %v5306_v53 }
 0x44a   :  { %1294 = vmatprep.subr.mxu0 %v5167_v62  ;;  %1365 = vmatprep.subr.mxu1 %v5310_v32 }
 0x44b   :  { %1295 = vmatpush1.msra.mxu0 %v5171_v63  ;;  %1366 = vmatpush1.msra.mxu1 %v5314_v37 }
 0x44c   :  { %1296 = vmatprep.subr.mxu0 %v5175_v1  ;;  %1367 = vmatprep.subr.mxu1 %v5318_v28 }
 0x44d   :  { %1297 = vmatpush1.msra.mxu0 %v5179_v2  ;;  %1368 = vmatpush1.msra.mxu1 %v5322_v52 }
 0x44e   :  { %1298 = vmatprep.subr.mxu0 %v5183_v3  ;;  %1369 = vmatprep.subr.mxu1 %v5326_v12 }
 0x44f   :  { %1299 = vmatpush1.msra.mxu0 %v5187_v4  ;;  %1370 = vmatpush1.msra.mxu1 %v5330_v15 }
 0x450   :  { %1300 = vmatprep.subr.mxu0 %v5191_v5  ;;  %1371 = vmatprep.subr.mxu1 %v5334_v17 }
 0x451   :  { %1301 = vmatpush1.msra.mxu0 %v5195_v6  ;;  %1372 = vmatpush1.msra.mxu1 %v5338_v22 }
 0x452   :  { %1302 = vmatprep.subr.mxu0 %v5199_v7  ;;  %1373 = vmatprep.subr.mxu1 %v5342_v24 }
 0x453   :  { %1303 = vmatpush1.msra.mxu0 %v5203_v8  ;;  %1374 = vmatpush1.msra.mxu1 %v5346_v29 }
 0x454   :  { %1304 = vmatprep.subr.mxu0 %v5207_v9  ;;  %1375 = vmatprep.subr.mxu1 %v5350_v31 }
 0x455   :  { %1305 = vmatpush1.msra.mxu0 %v5211_v14  ;;  %1376 = vmatpush1.msra.mxu1 %v5354_v40 }
 0x456   :  { %1306 = vmatprep.subr.mxu0 %v5215_v18  ;;  %1377 = vmatprep.subr.mxu1 %v5358_v55 }
 0x457   :  { %1307 = vmatpush1.msra.mxu0 %v5219_v20  ;;  %1378 = vmatpush1.msra.mxu1 %v5362_v41 }
 0x458   :  { %1308 = vmatprep.subr.mxu0 %v5223_v21  ;;  %1379 = vmatprep.subr.mxu1 %v5366_v33  ;;  %v7067_v33 = vld [vmem:[#allocation40_spill] sm:$0xff] }
 0x459   :  { %1309 = vmatpush1.msra.mxu0 %v5227_v25  ;;  %1380 = vmatpush1.msra.mxu1 %v5370_v50  ;;  %v7066_v25 = vld [vmem:[#allocation41_spill] sm:$0xff] }
 0x45a   :  { %1310 = vmatprep.subr.mxu0 %v5231_v27  ;;  %1381 = vmatprep.subr.mxu1 %v5374_v10  ;;  %v5390_v10 = vld [vmem:[#allocation2 + $0x18] sm:$0xff] }
 0x45b   :  { %1311 = vmatpush1.msra.mxu0 %v5235_v11  ;;  %1382 = vmatpush1.msra.mxu1 %v5378_v43  ;;  %7062 = vst [vmem:[#allocation30_spill] sm:$0xff] %v5390_v10 }
 0x45c   :  { %1312 = vmatprep.subr.mxu0 %v5239_v13  ;;  %1383 = vmatprep.subr.mxu1 %v5382_v0  ;;  %v5395_v13 = vld [vmem:[#allocation2 + $0x10] sm:$0xff] }
 0x45d   :  { %1313 = vmatpush1.msra.mxu0 %v5243_v16  ;;  %1384 = vmatpush1.msra.mxu1 %v5386_v47  ;;  %7063 = vst [vmem:[#allocation20_spill] sm:$0xff] %v5395_v13 }
 0x45e   :  { %1314 = vmatprep.subr.mxu0 %v5247_v19  ;;  %1385 = vmatprep.subr.mxu1 %v5390_v10  ;;  %v7064_v19 = vld [vmem:[#allocation54_spill] sm:$0xff]  ;;  %v7065_v10 = vld [vmem:[#allocation55_spill] sm:$0xff] }
 0x45f   :  { %1315 = vmatpush1.msra.mxu0 %v5251_v23  ;;  %1348 = vmatprep.mubr.f32.mxu0 %v7032_v45 }
 0x460   :  { %1386 = vmatpush1.msra.mxu1 %v5395_v13  ;;  %1419 = vmatprep.mubr.f32.mxu1 %v7032_v45 }
 0x461   :  { %1454 = vmatprep.subr.mxu0 %v5115_v57  ;;  %1525 = vmatprep.subr.mxu1 %v5258_v26 }
 0x500   :  { %v1180_v47 = vpop.f32.mrf.mxu0  ;;  %v1251_v23 = vpop.f32.mrf.mxu1 }
 0x501   :  { %v1256_v16 = vadd.f32 %v1180_v47, %v7064_v19  ;;  %v1258_v45 = vadd.f32 %v1251_v23, %v7067_v33  ;;  %v7070_v23 = vld [vmem:[#allocation49_spill] sm:$0xff]  ;;  %v7074_v33 = vld [vmem:[#allocation34_spill] sm:$0xff] }
 0x502   :  { %v1182_v0 = vpop.f32.mrf.mxu0  ;;  %v1253_v50 = vpop.f32.mrf.mxu1 }
 0x503   :  { %v3791_v43 = vmul.f32 -1.442695, %v1256_v16  ;;  %v1257_v11 = vadd.f32 %v1182_v0, %v7065_v10  ;;  %v1259_v13 = vadd.f32 %v1253_v50, %v7066_v25  ;;  %v7075_v50 = vld [vmem:[#allocation28_spill] sm:$0xff] }
 0x505   :  { %3966 = vpow2.f32 %v3791_v43  ;;  %v3792_v27 = vmul.f32 -1.442695, %v1257_v11  ;;  %v3793_v21 = vmul.f32 -1.442695, %v1259_v13 }
 0x507   :  { %3968 = vpow2.f32 %v3792_v27 }
 0x508   :  { %3970 = vtanh.f32 %v1258_v45 }
 0x509   :  { %3972 = vpow2.f32 %v3793_v21  ;;  %v7069_v21 = vld [vmem:[#allocation16_spill] sm:$0xff] }
 0x512   :  { %v3967_v57 = vpop.eup %3966 }
 0x513   :  { %v1263_v41 = vadd.f32 1.0, %v3967_v57 }
 0x514   :  { %v3969_v26 = vpop.eup %3968 }
 0x515   :  { %3974 = vrcp.f32 %v1263_v41  ;;  %v1269_v47 = vadd.f32 1.0, %v3969_v26  ;;  %v3971_v16 = vpop.eup %3970  ;;  %v7071_v26 = vld [vmem:[#allocation27_spill] sm:$0xff]  ;;  %v7073_v41 = vld [vmem:[#allocation17_spill] sm:$0xff] }
 0x516   :  { %v3973_v10 = vpop.eup %3972 }
 0x517   :  { %3976 = vrcp.f32 %v1269_v47  ;;  %v1276_v27 = vadd.f32 1.0, %v3973_v10  ;;  %v7076_v47 = vld [vmem:[#allocation23_spill] sm:$0xff]  ;;  %v7078_v10 = vld [vmem:[#allocation13_spill] sm:$0xff] }
 0x519   :  { %3978 = vrcp.f32 %v1276_v27  ;;  %v7082_v27 = vld [vmem:[#allocation14_spill] sm:$0xff] }
 0x522   :  { %v3975_v0 = vpop.eup %3974 }
 0x523   :  { %v1280_v19 = vmul.f32 %v3975_v0, %v3971_v16  ;;  %v7077_v16 = vld [vmem:[#allocation18_spill] sm:$0xff]  ;;  %v7079_v0 = vld [vmem:[#allocation29_spill] sm:$0xff] }
 0x524   :  { %v3977_v11 = vpop.eup %3976 }
 0x525   :  { %v1279_v43 = vmul.f32 %v3977_v11, %v5266_v30  ;;  %v7072_v30 = vld [vmem:[#allocation35_spill] sm:$0xff] }
 0x526   :  { %v3979_v57 = vpop.eup %3978  ;;  %v7081_v11 = vld [vmem:[#allocation19_spill] sm:$0xff] }
 0x527   :  { %v5406_v25 = vadd.f32 %v1280_v19, %v1279_v43  ;;  %v7080_v19 = vld [vmem:[#allocation24_spill] sm:$0xff]  ;;  %v7083_v43 = vld [vmem:[#allocation30_spill] sm:$0xff] }
 0x529   :  { %3980 = vtanh.f32 %v5406_v25 }
 0x536   :  { %v3981_v45 = vpop.eup %3980 }
 0x537   :  { %v5409_v13 = vmul.f32 %v3981_v45, %v3979_v57  ;;  %v7084_v57 = vld [vmem:[#allocation25_spill] sm:$0xff]  ;;  %v7085_v45 = vmov 0.0  }
 0x539   :  { %7068 = vst [vmem:[#allocation31_spill] sm:$0xff] %v5409_v13  ;;  %1349 = vmatmul.mubr.f32.vlgmr.msra.gmra.mxu0 %v5409_v13  ;;  %1420 = vmatmul.mubr.f32.vlgmr.msra.gmra.mxu1 %v5409_v13  ;;  %v7086_v13 = vld [vmem:[#allocation20_spill] sm:$0xff] }
 0x53a   :  { %1455 = vmatpush1.msra.mxu0 %v5131_v36  ;;  %1526 = vmatpush1.msra.mxu1 %v5274_v48 }
 0x53b   :  { %1456 = vmatprep.subr.mxu0 %v5135_v54  ;;  %1527 = vmatprep.subr.mxu1 %v5278_v44 }
 0x53c   :  { %1457 = vmatpush1.msra.mxu0 %v5139_v39  ;;  %1528 = vmatpush1.msra.mxu1 %v5282_v34 }
 0x53d   :  { %1458 = vmatprep.subr.mxu0 %v5143_v35  ;;  %1529 = vmatprep.subr.mxu1 %v5286_v49 }
 0x53e   :  { %1459 = vmatpush1.msra.mxu0 %v5147_v51  ;;  %1530 = vmatpush1.msra.mxu1 %v5290_v42 }
 0x53f   :  { %1460 = vmatprep.subr.mxu0 %v5151_v58  ;;  %1531 = vmatprep.subr.mxu1 %v5294_v56 }
 0x540   :  { %1461 = vmatpush1.msra.mxu0 %v5155_v59  ;;  %1532 = vmatpush1.msra.mxu1 %v5298_v46 }
 0x541   :  { %1462 = vmatprep.subr.mxu0 %v5159_v60  ;;  %1533 = vmatprep.subr.mxu1 %v5302_v38 }
 0x542   :  { %1463 = vmatpush1.msra.mxu0 %v5163_v61  ;;  %1534 = vmatpush1.msra.mxu1 %v5306_v53 }
 0x543   :  { %1464 = vmatprep.subr.mxu0 %v5167_v62  ;;  %1535 = vmatprep.subr.mxu1 %v5310_v32 }
 0x544   :  { %1465 = vmatpush1.msra.mxu0 %v5171_v63  ;;  %1536 = vmatpush1.msra.mxu1 %v5314_v37 }
 0x545   :  { %1466 = vmatprep.subr.mxu0 %v5175_v1  ;;  %1537 = vmatprep.subr.mxu1 %v5318_v28 }
 0x546   :  { %1467 = vmatpush1.msra.mxu0 %v5179_v2  ;;  %1538 = vmatpush1.msra.mxu1 %v5322_v52 }
 0x547   :  { %1468 = vmatprep.subr.mxu0 %v5183_v3  ;;  %1539 = vmatprep.subr.mxu1 %v5326_v12 }
 0x548   :  { %1469 = vmatpush1.msra.mxu0 %v5187_v4  ;;  %1540 = vmatpush1.msra.mxu1 %v5330_v15 }
 0x549   :  { %1470 = vmatprep.subr.mxu0 %v5191_v5  ;;  %1541 = vmatprep.subr.mxu1 %v5334_v17 }
 0x54a   :  { %1471 = vmatpush1.msra.mxu0 %v5195_v6  ;;  %1542 = vmatpush1.msra.mxu1 %v5338_v22 }
 0x54b   :  { %1472 = vmatprep.subr.mxu0 %v5199_v7  ;;  %1543 = vmatprep.subr.mxu1 %v5342_v24 }
 0x54c   :  { %1473 = vmatpush1.msra.mxu0 %v5203_v8  ;;  %1544 = vmatpush1.msra.mxu1 %v5346_v29 }
 0x54d   :  { %1474 = vmatprep.subr.mxu0 %v5207_v9  ;;  %1545 = vmatprep.subr.mxu1 %v5350_v31 }
 0x54e   :  { %1475 = vmatpush1.msra.mxu0 %v5211_v14  ;;  %1546 = vmatpush1.msra.mxu1 %v5354_v40 }
 0x54f   :  { %1476 = vmatprep.subr.mxu0 %v5215_v18  ;;  %1547 = vmatprep.subr.mxu1 %v5358_v55 }
 0x550   :  { %1477 = vmatpush1.msra.mxu0 %v5219_v20  ;;  %1548 = vmatpush1.msra.mxu1 %v7069_v21 }
 0x551   :  { %1478 = vmatprep.subr.mxu0 %v7070_v23  ;;  %1549 = vmatprep.subr.mxu1 %v7071_v26  ;;  %v7092_v26 = vld [vmem:[#allocation42_spill] sm:$0xff] }
 0x552   :  { %1479 = vmatpush1.msra.mxu0 %v7072_v30  ;;  %1550 = vmatpush1.msra.mxu1 %v7073_v41  ;;  %v7091_v30 = vld [vmem:[#allocation43_spill] sm:$0xff] }
 0x553   :  { %1480 = vmatprep.subr.mxu0 %v7074_v33  ;;  %1551 = vmatprep.subr.mxu1 %v7075_v50 }
 0x554   :  { %1481 = vmatpush1.msra.mxu0 %v7076_v47  ;;  %1552 = vmatpush1.msra.mxu1 %v7077_v16  ;;  %v7087_v16 = vld [vmem:[#allocation12_spill] sm:$0xff] }
 0x555   :  { %1482 = vmatprep.subr.mxu0 %v7078_v10  ;;  %1553 = vmatprep.subr.mxu1 %v7079_v0  ;;  %v7088_v10 = vld [vmem:[#allocation15_spill] sm:$0xff] }
 0x556   :  { %1483 = vmatpush1.msra.mxu0 %v7080_v19  ;;  %1554 = vmatpush1.msra.mxu1 %v7081_v11  ;;  %v7089_v19 = vld [vmem:[#allocation56_spill] sm:$0xff] }
 0x557   :  { %1484 = vmatprep.subr.mxu0 %v7082_v27  ;;  %1555 = vmatprep.subr.mxu1 %v7083_v43  ;;  %v7090_v27 = vld [vmem:[#allocation57_spill] sm:$0xff] }
 0x558   :  { %1485 = vmatpush1.msra.mxu0 %v7084_v57  ;;  %1518 = vmatprep.mubr.f32.mxu0 %v7085_v45 }
 0x559   :  { %1556 = vmatpush1.msra.mxu1 %v7086_v13  ;;  %1589 = vmatprep.mubr.f32.mxu1 %v7085_v45 }
 0x55a   :  { %1624 = vmatprep.subr.mxu0 %v7087_v16  ;;  %1695 = vmatprep.subr.mxu1 %v7088_v10 }
 0x5f9   :  { %v1350_v0 = vpop.f32.mrf.mxu0  ;;  %v1421_v43 = vpop.f32.mrf.mxu1 }
 0x5fa   :  { %v1426_v47 = vadd.f32 %v1350_v0, %v7089_v19  ;;  %v1428_v45 = vadd.f32 %v1421_v43, %v7092_v26 }
 0x5fb   :  { %v1352_v11 = vpop.f32.mrf.mxu0  ;;  %v1423_v41 = vpop.f32.mrf.mxu1 }
 0x5fc   :  { %v3794_v50 = vmul.f32 -1.442695, %v1426_v47  ;;  %v1427_v33 = vadd.f32 %v1352_v11, %v7090_v27  ;;  %v1429_v13 = vadd.f32 %v1423_v41, %v7091_v30 }
 0x5fe   :  { %3982 = vpow2.f32 %v3794_v50  ;;  %v3795_v57 = vmul.f32 -1.442695, %v1427_v33  ;;  %v3796_v23 = vmul.f32 -1.442695, %v1429_v13 }
 0x600   :  { %3984 = vpow2.f32 %v3795_v57 }
 0x601   :  { %3986 = vtanh.f32 %v1428_v45 }
 0x602   :  { %3988 = vpow2.f32 %v3796_v23 }
 0x60b   :  { %v3983_v16 = vpop.eup %3982 }
 0x60c   :  { %v1433_v21 = vadd.f32 1.0, %v3983_v16  ;;  %v1854_v16 = vld [vmem:[#allocation4 + $0x1e0] sm:$0xff] }
 0x60d   :  { %v3985_v10 = vpop.eup %3984 }
 0x60e   :  { %3990 = vrcp.f32 %v1433_v21  ;;  %v1439_v0 = vadd.f32 1.0, %v3985_v10  ;;  %v3987_v47 = vpop.eup %3986  ;;  %v1856_v10 = vld [vmem:[#allocation4 + $0x1f0] sm:$0xff] }
 0x60f   :  { %v3989_v19 = vpop.eup %3988 }
 0x610   :  { %3992 = vrcp.f32 %v1439_v0  ;;  %v1446_v27 = vadd.f32 1.0, %v3989_v19  ;;  %v1851_v0 = vld [vmem:[#allocation4 + $0x1c8] sm:$0xff]  ;;  %v1850_v19 = vld [vmem:[#allocation4 + $0x1c0] sm:$0xff] }
 0x612   :  { %3994 = vrcp.f32 %v1446_v27  ;;  %v1846_v27 = vld [vmem:[#allocation4 + $0x1a0] sm:$0xff] }
 0x61b   :  { %v3991_v50 = vpop.eup %3990 }
 0x61c   :  { %v1450_v11 = vmul.f32 %v3991_v50, %v3987_v47  ;;  %v1853_v47 = vld [vmem:[#allocation4 + $0x1d8] sm:$0xff]  ;;  %v1852_v50 = vld [vmem:[#allocation4 + $0x1d0] sm:$0xff] }
 0x61d   :  { %v3993_v33 = vpop.eup %3992 }
 0x61e   :  { %v1449_v57 = vmul.f32 %v3993_v33, %v5406_v25  ;;  %v1849_v33 = vld [vmem:[#allocation4 + $0x1b8] sm:$0xff] }
 0x61f   :  { %v3995_v13 = vpop.eup %3994 }
 0x620   :  { %v5484_v30 = vadd.f32 %v1450_v11, %v1449_v57  ;;  %v1847_v11 = vld [vmem:[#allocation4 + $0x1a8] sm:$0xff]  ;;  %v1848_v57 = vld [vmem:[#allocation4 + $0x1b0] sm:$0xff] }
 0x622   :  { %3996 = vtanh.f32 %v5484_v30 }
 0x62f   :  { %v3997_v26 = vpop.eup %3996 }
 0x630   :  { %v5487_v41 = vmul.f32 %v3997_v26, %v3995_v13  ;;  %v1845_v13 = vld [vmem:[#allocation4 + $0x198] sm:$0xff]  ;;  %v1842_v26 = vld [vmem:[#allocation4 + $0x180] sm:$0xff] }
 0x632   :  { %1519 = vmatmul.mubr.f32.vlgmr.msra.gmra.mxu0 %v5487_v41  ;;  %1590 = vmatmul.mubr.f32.vlgmr.msra.gmra.mxu1 %v5487_v41 }
 0x633   :  { %1625 = vmatpush1.msra.mxu0 %v5131_v36  ;;  %1696 = vmatpush1.msra.mxu1 %v5274_v48  ;;  %v7093_v36 = vld [vmem:[#allocation16_spill] sm:$0xff] }
 0x634   :  { %1626 = vmatprep.subr.mxu0 %v5135_v54  ;;  %1697 = vmatprep.subr.mxu1 %v5278_v44  ;;  %v7094_v54 = vld [vmem:[#allocation49_spill] sm:$0xff] }
 0x635   :  { %1627 = vmatpush1.msra.mxu0 %v5139_v39  ;;  %1698 = vmatpush1.msra.mxu1 %v5282_v34  ;;  %v7095_v39 = vld [vmem:[#allocation27_spill] sm:$0xff] }
 0x636   :  { %1628 = vmatprep.subr.mxu0 %v5143_v35  ;;  %1699 = vmatprep.subr.mxu1 %v5286_v49  ;;  %v7096_v35 = vld [vmem:[#allocation35_spill] sm:$0xff] }
 0x637   :  { %1629 = vmatpush1.msra.mxu0 %v5147_v51  ;;  %1700 = vmatpush1.msra.mxu1 %v5290_v42  ;;  %v7097_v51 = vld [vmem:[#allocation17_spill] sm:$0xff]  ;;  %v7112_v34 = vld [vmem:[#allocation59_spill] sm:$0xff] }
 0x638   :  { %1630 = vmatprep.subr.mxu0 %v5151_v58  ;;  %1701 = vmatprep.subr.mxu1 %v5294_v56  ;;  %v7098_v58 = vld [vmem:[#allocation34_spill] sm:$0xff] }
 0x639   :  { %1631 = vmatpush1.msra.mxu0 %v5155_v59  ;;  %1702 = vmatpush1.msra.mxu1 %v5298_v46  ;;  %v7099_v59 = vld [vmem:[#allocation28_spill] sm:$0xff] }
 0x63a   :  { %1632 = vmatprep.subr.mxu0 %v5159_v60  ;;  %1703 = vmatprep.subr.mxu1 %v5302_v38  ;;  %v7100_v60 = vld [vmem:[#allocation23_spill] sm:$0xff]  ;;  %v7113_v38 = vld [vmem:[#allocation45_spill] sm:$0xff] }
 0x63b   :  { %1633 = vmatpush1.msra.mxu0 %v5163_v61  ;;  %1704 = vmatpush1.msra.mxu1 %v5306_v53  ;;  %v7101_v61 = vld [vmem:[#allocation18_spill] sm:$0xff] }
 0x63c   :  { %1634 = vmatprep.subr.mxu0 %v5167_v62  ;;  %1705 = vmatprep.subr.mxu1 %v5310_v32  ;;  %v7102_v62 = vld [vmem:[#allocation13_spill] sm:$0xff]  ;;  %v7114_v32 = vld [vmem:[#allocation44_spill] sm:$0xff] }
 0x63d   :  { %1635 = vmatpush1.msra.mxu0 %v5171_v63  ;;  %1706 = vmatpush1.msra.mxu1 %v5314_v37  ;;  %v7103_v63 = vld [vmem:[#allocation29_spill] sm:$0xff] }
 0x63e   :  { %1636 = vmatprep.subr.mxu0 %v5175_v1  ;;  %1707 = vmatprep.subr.mxu1 %v5318_v28  ;;  %v7104_v1 = vld [vmem:[#allocation24_spill] sm:$0xff] }
 0x63f   :  { %1637 = vmatpush1.msra.mxu0 %v5179_v2  ;;  %1708 = vmatpush1.msra.mxu1 %v5322_v52  ;;  %v7105_v2 = vld [vmem:[#allocation19_spill] sm:$0xff] }
 0x640   :  { %1638 = vmatprep.subr.mxu0 %v5183_v3  ;;  %1709 = vmatprep.subr.mxu1 %v5326_v12  ;;  %v7106_v3 = vld [vmem:[#allocation14_spill] sm:$0xff] }
 0x641   :  { %1639 = vmatpush1.msra.mxu0 %v5187_v4  ;;  %1710 = vmatpush1.msra.mxu1 %v5330_v15  ;;  %v7107_v4 = vld [vmem:[#allocation30_spill] sm:$0xff] }
 0x642   :  { %1640 = vmatprep.subr.mxu0 %v5191_v5  ;;  %1711 = vmatprep.subr.mxu1 %v5334_v17  ;;  %v7108_v5 = vld [vmem:[#allocation25_spill] sm:$0xff] }
 0x643   :  { %1641 = vmatpush1.msra.mxu0 %v5195_v6  ;;  %1712 = vmatpush1.msra.mxu1 %v5338_v22  ;;  %v7109_v6 = vld [vmem:[#allocation20_spill] sm:$0xff] }
 0x644   :  { %1642 = vmatprep.subr.mxu0 %v5199_v7  ;;  %1713 = vmatprep.subr.mxu1 %v5342_v24  ;;  %v7110_v7 = vmov 0.0  }
 0x645   :  { %1643 = vmatpush1.msra.mxu0 %v5203_v8  ;;  %1714 = vmatpush1.msra.mxu1 %v5346_v29  ;;  %v1855_v8 = vld [vmem:[#allocation4 + $0x1e8] sm:$0xff] }
 0x646   :  { %1644 = vmatprep.subr.mxu0 %v5207_v9  ;;  %1715 = vmatprep.subr.mxu1 %v5350_v31  ;;  %v1857_v9 = vld [vmem:[#allocation4 + $0x1f8] sm:$0xff] }
 0x647   :  { %1645 = vmatpush1.msra.mxu0 %v5211_v14  ;;  %1716 = vmatpush1.msra.mxu1 %v5354_v40 }
 0x648   :  { %1646 = vmatprep.subr.mxu0 %v5215_v18  ;;  %1717 = vmatprep.subr.mxu1 %v5358_v55  ;;  %v7111_v18 = vld [vmem:[#allocation58_spill] sm:$0xff] }
 0x649   :  { %1647 = vmatpush1.msra.mxu0 %v5219_v20  ;;  %1718 = vmatpush1.msra.mxu1 %v7093_v36  ;;  %v1844_v36 = vld [vmem:[#allocation4 + $0x190] sm:$0xff] }
 0x64a   :  { %1648 = vmatprep.subr.mxu0 %v7094_v54  ;;  %1719 = vmatprep.subr.mxu1 %v7095_v39  ;;  %v1839_v54 = vld [vmem:[#allocation4 + $0x168] sm:$0xff]  ;;  %v1841_v39 = vld [vmem:[#allocation4 + $0x178] sm:$0xff] }
 0x64b   :  { %1649 = vmatpush1.msra.mxu0 %v7096_v35  ;;  %1720 = vmatpush1.msra.mxu1 %v7097_v51  ;;  %v1838_v35 = vld [vmem:[#allocation4 + $0x160] sm:$0xff]  ;;  %v1840_v51 = vld [vmem:[#allocation4 + $0x170] sm:$0xff] }
 0x64c   :  { %1650 = vmatprep.subr.mxu0 %v7098_v58  ;;  %1721 = vmatprep.subr.mxu1 %v7099_v59  ;;  %v1835_v58 = vld [vmem:[#allocation4 + $0x148] sm:$0xff]  ;;  %v1837_v59 = vld [vmem:[#allocation4 + $0x158] sm:$0xff] }
 0x64d   :  { %1651 = vmatpush1.msra.mxu0 %v7100_v60  ;;  %1722 = vmatpush1.msra.mxu1 %v7101_v61  ;;  %v1834_v60 = vld [vmem:[#allocation4 + $0x140] sm:$0xff]  ;;  %v1836_v61 = vld [vmem:[#allocation4 + $0x150] sm:$0xff] }
 0x64e   :  { %1652 = vmatprep.subr.mxu0 %v7102_v62  ;;  %1723 = vmatprep.subr.mxu1 %v7103_v63  ;;  %v1831_v62 = vld [vmem:[#allocation4 + $0x128] sm:$0xff]  ;;  %v1833_v63 = vld [vmem:[#allocation4 + $0x138] sm:$0xff] }
 0x64f   :  { %1653 = vmatpush1.msra.mxu0 %v7104_v1  ;;  %1724 = vmatpush1.msra.mxu1 %v7105_v2  ;;  %v1830_v1 = vld [vmem:[#allocation4 + $0x120] sm:$0xff]  ;;  %v1832_v2 = vld [vmem:[#allocation4 + $0x130] sm:$0xff] }
 0x650   :  { %1654 = vmatprep.subr.mxu0 %v7106_v3  ;;  %1725 = vmatprep.subr.mxu1 %v7107_v4  ;;  %v1827_v3 = vld [vmem:[#allocation4 + $0x108] sm:$0xff]  ;;  %v1829_v4 = vld [vmem:[#allocation4 + $0x118] sm:$0xff] }
 0x651   :  { %1655 = vmatpush1.msra.mxu0 %v7108_v5  ;;  %1726 = vmatpush1.msra.mxu1 %v7109_v6  ;;  %v1826_v5 = vld [vmem:[#allocation4 + $0x100] sm:$0xff]  ;;  %v1828_v6 = vld [vmem:[#allocation4 + $0x110] sm:$0xff] }
 0x652   :  { %1688 = vmatprep.mubr.f32.mxu0 %v7110_v7  ;;  %1759 = vmatprep.mubr.f32.mxu1 %v7110_v7 }
 0x653   :  { %1944 = vmatprep.subr.mxu0 %v1855_v8  ;;  %2057 = vmatprep.subr.mxu1 %v1857_v9  ;;  %v1823_v8 = vld [vmem:[#allocation4 + $0xe8] sm:$0xff]  ;;  %v1825_v9 = vld [vmem:[#allocation4 + $0xf8] sm:$0xff] }
 0x6f2   :  { %v1520_v14 = vpop.f32.mrf.mxu0  ;;  %v1591_v42 = vpop.f32.mrf.mxu1 }
 0x6f3   :  { %v1596_v20 = vadd.f32 %v1520_v14, %v7111_v18  ;;  %v1598_v37 = vadd.f32 %v1591_v42, %v7114_v32  ;;  %v1822_v14 = vld [vmem:[#allocation4 + $0xe0] sm:$0xff]  ;;  %v1824_v18 = vld [vmem:[#allocation4 + $0xf0] sm:$0xff]  ;;  %v1817_v42 = vld [vmem:[#allocation4 + $0xb8] sm:$0xff] }
 0x6f4   :  { %v1522_v48 = vpop.f32.mrf.mxu0  ;;  %v1593_v46 = vpop.f32.mrf.mxu1  ;;  %v1810_v32 = vld [vmem:[#allocation4 + $0x80] sm:$0xff] }
 0x6f5   :  { %v3797_v44 = vmul.f32 -1.442695, %v1596_v20  ;;  %v1597_v49 = vadd.f32 %v1522_v48, %v7112_v34  ;;  %v1599_v53 = vadd.f32 %v1593_v46, %v7113_v38  ;;  %v1819_v20 = vld [vmem:[#allocation4 + $0xc8] sm:$0xff]  ;;  %v1821_v48 = vld [vmem:[#allocation4 + $0xd8] sm:$0xff]  ;;  %v1820_v34 = vld [vmem:[#allocation4 + $0xd0] sm:$0xff] }
 0x6f6   :  { %v1816_v46 = vld [vmem:[#allocation4 + $0xb0] sm:$0xff]  ;;  %v1811_v38 = vld [vmem:[#allocation4 + $0x88] sm:$0xff] }
 0x6f7   :  { %3998 = vpow2.f32 %v3797_v44  ;;  %v3798_v56 = vmul.f32 -1.442695, %v1597_v49  ;;  %v3799_v28 = vmul.f32 -1.442695, %v1599_v53  ;;  %v1818_v44 = vld [vmem:[#allocation4 + $0xc0] sm:$0xff]  ;;  %v1815_v49 = vld [vmem:[#allocation4 + $0xa8] sm:$0xff] }
 0x6f8   :  { %v1813_v53 = vld [vmem:[#allocation4 + $0x98] sm:$0xff] }
 0x6f9   :  { %4000 = vpow2.f32 %v3798_v56  ;;  %v1814_v56 = vld [vmem:[#allocation4 + $0xa0] sm:$0xff] }
 0x6fa   :  { %4002 = vtanh.f32 %v1598_v37  ;;  %v1812_v37 = vld [vmem:[#allocation4 + $0x90] sm:$0xff] }
 0x6fb   :  { %4004 = vpow2.f32 %v3799_v28  ;;  %v1807_v28 = vld [vmem:[#allocation4 + $0x68] sm:$0xff] }
 0x704   :  { %v3999_v52 = vpop.eup %3998 }
 0x705   :  { %v1603_v12 = vadd.f32 1.0, %v3999_v52  ;;  %v1809_v52 = vld [vmem:[#allocation4 + $0x78] sm:$0xff] }
 0x706   :  { %v4001_v15 = vpop.eup %4000 }
 0x707   :  { %4006 = vrcp.f32 %v1603_v12  ;;  %v1609_v17 = vadd.f32 1.0, %v4001_v15  ;;  %v4003_v22 = vpop.eup %4002  ;;  %v1806_v12 = vld [vmem:[#allocation4 + $0x60] sm:$0xff]  ;;  %v1808_v15 = vld [vmem:[#allocation4 + $0x70] sm:$0xff] }
 0x708   :  { %v4005_v24 = vpop.eup %4004 }
 0x709   :  { %4008 = vrcp.f32 %v1609_v17  ;;  %v1616_v55 = vadd.f32 1.0, %v4005_v24  ;;  %v1803_v17 = vld [vmem:[#allocation4 + $0x48] sm:$0xff]  ;;  %v1802_v24 = vld [vmem:[#allocation4 + $0x40] sm:$0xff] }
 0x70b   :  { %4010 = vrcp.f32 %v1616_v55  ;;  %v1798_v55 = vld [vmem:[#allocation4 + $0x20] sm:$0xff] }
 0x714   :  { %v4007_v29 = vpop.eup %4006 }
 0x715   :  { %v1620_v31 = vmul.f32 %v4007_v29, %v4003_v22  ;;  %v1805_v22 = vld [vmem:[#allocation4 + $0x58] sm:$0xff]  ;;  %v1804_v29 = vld [vmem:[#allocation4 + $0x50] sm:$0xff] }
 0x716   :  { %v4009_v40 = vpop.eup %4008 }
 0x717   :  { %v1619_v25 = vmul.f32 %v4009_v40, %v5484_v30  ;;  %v1843_v30 = vld [vmem:[#allocation4 + $0x188] sm:$0xff]  ;;  %v1801_v40 = vld [vmem:[#allocation4 + $0x38] sm:$0xff] }
 0x718   :  { %v4011_v23 = vpop.eup %4010 }
 0x719   :  { %v5560_v21 = vadd.f32 %v1620_v31, %v1619_v25  ;;  %v1799_v31 = vld [vmem:[#allocation4 + $0x28] sm:$0xff]  ;;  %v1800_v25 = vld [vmem:[#allocation4 + $0x30] sm:$0xff] }
 0x71b   :  { %4012 = vtanh.f32 %v5560_v21 }
 0x728   :  { %v4013_v43 = vpop.eup %4012 }
 0x729   :  { %v5563_v45 = vmul.f32 %v4013_v43, %v4011_v23  ;;  %v1795_v23 = vld [vmem:[#allocation4 + $0x8] sm:$0xff]  ;;  %v1797_v43 = vld [vmem:[#allocation4 + $0x18] sm:$0xff] }
 0x72b   :  { %1689 = vmatmul.mubr.f32.vlgmr.msra.gmra.mxu0 %v5563_v45  ;;  %1760 = vmatmul.mubr.f32.vlgmr.msra.gmra.mxu1 %v5563_v45 }
 0x72c   :  { %1945 = vmatpush1.msra.mxu0 %v1854_v16  ;;  %2058 = vmatpush1.msra.mxu1 %v1856_v10  ;;  %v1794_v16 = vld [vmem:[#allocation4] sm:$0xff]  ;;  %v1796_v10 = vld [vmem:[#allocation4 + $0x10] sm:$0xff] }
 0x72d   :  { %1946 = vmatprep.subr.mxu0 %v1851_v0  ;;  %2059 = vmatprep.subr.mxu1 %v1853_v47  ;;  %v7115_v0 = vld [vmem:[#allocation61_spill] sm:$0xff]  ;;  %v7116_v47 = vld [vmem:[#allocation11_spill] sm:$0xff] }
 0x72e   :  { %1947 = vmatpush1.msra.mxu0 %v1850_v19  ;;  %2060 = vmatpush1.msra.mxu1 %v1852_v50  ;;  %v7117_v19 = vld [vmem:[#allocation9_spill] sm:$0xff]  ;;  %v7118_v50 = vld [vmem:[#allocation26_spill] sm:$0xff] }
 0x72f   :  { %1948 = vmatprep.subr.mxu0 %v1847_v11  ;;  %2061 = vmatprep.subr.mxu1 %v1849_v33  ;;  %v7119_v11 = vld [vmem:[#allocation31_spill] sm:$0xff]  ;;  %v5597_v33 = vld [vmem:[#allocation6 + $0x1e8] sm:$0xff] }
 0x730   :  { %1949 = vmatpush1.msra.mxu0 %v1846_v27  ;;  %2062 = vmatpush1.msra.mxu1 %v1848_v57  ;;  %7120 = vst [vmem:[#allocation21_spill] sm:$0xff] %v5597_v33  ;;  %v5599_v27 = vld [vmem:[#allocation6 + $0x1f8] sm:$0xff]  ;;  %v5602_v57 = vld [vmem:[#allocation6 + $0x1e0] sm:$0xff] }
 0x731   :  { %1950 = vmatprep.subr.mxu0 %v1843_v30  ;;  %2063 = vmatprep.subr.mxu1 %v1845_v13  ;;  %7121 = vst [vmem:[#allocation32_spill] sm:$0xff] %v5599_v27  ;;  %v5608_v30 = vld [vmem:[#allocation6 + $0x1c8] sm:$0xff]  ;;  %v5614_v13 = vld [vmem:[#allocation6 + $0x1c0] sm:$0xff] }
 0x732   :  { %1951 = vmatpush1.msra.mxu0 %v1842_v26  ;;  %2064 = vmatpush1.msra.mxu1 %v1844_v36  ;;  %v5617_v26 = vld [vmem:[#allocation6 + $0x1d0] sm:$0xff]  ;;  %v5620_v36 = vld [vmem:[#allocation6 + $0x1a8] sm:$0xff] }
 0x733   :  { %1952 = vmatprep.subr.mxu0 %v1839_v54  ;;  %2065 = vmatprep.subr.mxu1 %v1841_v39  ;;  %v5623_v54 = vld [vmem:[#allocation6 + $0x1b8] sm:$0xff]  ;;  %v5626_v39 = vld [vmem:[#allocation6 + $0x1a0] sm:$0xff] }
 0x734   :  { %1953 = vmatpush1.msra.mxu0 %v1838_v35  ;;  %2066 = vmatpush1.msra.mxu1 %v1840_v51  ;;  %v5629_v35 = vld [vmem:[#allocation6 + $0x1b0] sm:$0xff]  ;;  %v5632_v51 = vld [vmem:[#allocation6 + $0x188] sm:$0xff] }
 0x735   :  { %1954 = vmatprep.subr.mxu0 %v1835_v58  ;;  %2067 = vmatprep.subr.mxu1 %v1837_v59  ;;  %v5635_v58 = vld [vmem:[#allocation6 + $0x198] sm:$0xff]  ;;  %v5638_v59 = vld [vmem:[#allocation6 + $0x180] sm:$0xff] }
 0x736   :  { %1955 = vmatpush1.msra.mxu0 %v1834_v60  ;;  %2068 = vmatpush1.msra.mxu1 %v1836_v61  ;;  %v5641_v60 = vld [vmem:[#allocation6 + $0x190] sm:$0xff]  ;;  %v5644_v61 = vld [vmem:[#allocation6 + $0x168] sm:$0xff] }
 0x737   :  { %1956 = vmatprep.subr.mxu0 %v1831_v62  ;;  %2069 = vmatprep.subr.mxu1 %v1833_v63  ;;  %v5647_v62 = vld [vmem:[#allocation6 + $0x178] sm:$0xff]  ;;  %v5650_v63 = vld [vmem:[#allocation6 + $0x160] sm:$0xff] }
 0x738   :  { %1957 = vmatpush1.msra.mxu0 %v1830_v1  ;;  %2070 = vmatpush1.msra.mxu1 %v1832_v2  ;;  %v5653_v1 = vld [vmem:[#allocation6 + $0x170] sm:$0xff]  ;;  %v5656_v2 = vld [vmem:[#allocation6 + $0x148] sm:$0xff] }
 0x739   :  { %1958 = vmatprep.subr.mxu0 %v1827_v3  ;;  %2071 = vmatprep.subr.mxu1 %v1829_v4  ;;  %v5659_v3 = vld [vmem:[#allocation6 + $0x158] sm:$0xff]  ;;  %v5662_v4 = vld [vmem:[#allocation6 + $0x140] sm:$0xff] }
 0x73a   :  { %1959 = vmatpush1.msra.mxu0 %v1826_v5  ;;  %2072 = vmatpush1.msra.mxu1 %v1828_v6  ;;  %v5665_v5 = vld [vmem:[#allocation6 + $0x150] sm:$0xff]  ;;  %v5668_v6 = vld [vmem:[#allocation6 + $0x128] sm:$0xff] }
 0x73b   :  { %1960 = vmatprep.subr.mxu0 %v1823_v8  ;;  %2073 = vmatprep.subr.mxu1 %v1825_v9  ;;  %v5671_v8 = vld [vmem:[#allocation6 + $0x138] sm:$0xff]  ;;  %v5674_v9 = vld [vmem:[#allocation6 + $0x120] sm:$0xff] }
 0x73c   :  { %1961 = vmatpush1.msra.mxu0 %v1822_v14  ;;  %2074 = vmatpush1.msra.mxu1 %v1824_v18  ;;  %v5677_v14 = vld [vmem:[#allocation6 + $0x130] sm:$0xff]  ;;  %v5680_v18 = vld [vmem:[#allocation6 + $0x108] sm:$0xff] }
 0x73d   :  { %1962 = vmatprep.subr.mxu0 %v1819_v20  ;;  %2075 = vmatprep.subr.mxu1 %v1821_v48  ;;  %v5683_v20 = vld [vmem:[#allocation6 + $0x118] sm:$0xff]  ;;  %v5686_v48 = vld [vmem:[#allocation6 + $0x100] sm:$0xff] }
 0x73e   :  { %1963 = vmatpush1.msra.mxu0 %v1818_v44  ;;  %2076 = vmatpush1.msra.mxu1 %v1820_v34  ;;  %v5689_v44 = vld [vmem:[#allocation6 + $0x110] sm:$0xff]  ;;  %v5692_v34 = vld [vmem:[#allocation6 + $0xe8] sm:$0xff] }
 0x73f   :  { %1964 = vmatprep.subr.mxu0 %v1815_v49  ;;  %2077 = vmatprep.subr.mxu1 %v1817_v42  ;;  %v5695_v49 = vld [vmem:[#allocation6 + $0xf8] sm:$0xff]  ;;  %v5698_v42 = vld [vmem:[#allocation6 + $0xe0] sm:$0xff] }
 0x740   :  { %1965 = vmatpush1.msra.mxu0 %v1814_v56  ;;  %2078 = vmatpush1.msra.mxu1 %v1816_v46  ;;  %v5701_v56 = vld [vmem:[#allocation6 + $0xf0] sm:$0xff]  ;;  %v5704_v46 = vld [vmem:[#allocation6 + $0xc8] sm:$0xff] }
 0x741   :  { %1966 = vmatprep.subr.mxu0 %v1811_v38  ;;  %2079 = vmatprep.subr.mxu1 %v1813_v53  ;;  %v5707_v38 = vld [vmem:[#allocation6 + $0xd8] sm:$0xff]  ;;  %v5710_v53 = vld [vmem:[#allocation6 + $0xc0] sm:$0xff] }
 0x742   :  { %1967 = vmatpush1.msra.mxu0 %v1810_v32  ;;  %2080 = vmatpush1.msra.mxu1 %v1812_v37  ;;  %v5713_v32 = vld [vmem:[#allocation6 + $0xd0] sm:$0xff]  ;;  %v5716_v37 = vld [vmem:[#allocation6 + $0xa8] sm:$0xff] }
 0x743   :  { %1968 = vmatprep.subr.mxu0 %v1807_v28  ;;  %2081 = vmatprep.subr.mxu1 %v1809_v52  ;;  %v5719_v28 = vld [vmem:[#allocation6 + $0xb8] sm:$0xff]  ;;  %v5722_v52 = vld [vmem:[#allocation6 + $0xa0] sm:$0xff] }
 0x744   :  { %1969 = vmatpush1.msra.mxu0 %v1806_v12  ;;  %2082 = vmatpush1.msra.mxu1 %v1808_v15  ;;  %v5725_v12 = vld [vmem:[#allocation6 + $0xb0] sm:$0xff]  ;;  %v5728_v15 = vld [vmem:[#allocation6 + $0x88] sm:$0xff] }
 0x745   :  { %1970 = vmatprep.subr.mxu0 %v1803_v17  ;;  %2083 = vmatprep.subr.mxu1 %v1805_v22  ;;  %7122 = vst [vmem:[#allocation22_spill] sm:$0xff] %v5725_v12  ;;  %7123 = vst [vmem:[#allocation50_spill] sm:$0xff] %v5728_v15  ;;  %v5731_v17 = vld [vmem:[#allocation6 + $0x98] sm:$0xff]  ;;  %v5734_v22 = vld [vmem:[#allocation6 + $0x80] sm:$0xff] }
 0x746   :  { %1971 = vmatpush1.msra.mxu0 %v1802_v24  ;;  %2084 = vmatpush1.msra.mxu1 %v1804_v29  ;;  %7124 = vst [vmem:[#allocation51_spill] sm:$0xff] %v5731_v17  ;;  %7125 = vst [vmem:[#allocation37_spill] sm:$0xff] %v5734_v22  ;;  %v5737_v24 = vld [vmem:[#allocation6 + $0x90] sm:$0xff]  ;;  %v5740_v29 = vld [vmem:[#allocation6 + $0x68] sm:$0xff] }
 0x747   :  { %1972 = vmatprep.subr.mxu0 %v1799_v31  ;;  %2085 = vmatprep.subr.mxu1 %v1801_v40  ;;  %7126 = vst [vmem:[#allocation36_spill] sm:$0xff] %v5737_v24  ;;  %7127 = vst [vmem:[#allocation52_spill] sm:$0xff] %v5740_v29  ;;  %v5743_v31 = vld [vmem:[#allocation6 + $0x78] sm:$0xff]  ;;  %v5746_v40 = vld [vmem:[#allocation6 + $0x60] sm:$0xff] }
 0x748   :  { %1973 = vmatpush1.msra.mxu0 %v1798_v55  ;;  %2086 = vmatpush1.msra.mxu1 %v1800_v25  ;;  %7128 = vst [vmem:[#allocation53_spill] sm:$0xff] %v5743_v31  ;;  %7129 = vst [vmem:[#allocation39_spill] sm:$0xff] %v5746_v40  ;;  %v5749_v55 = vld [vmem:[#allocation6 + $0x70] sm:$0xff]  ;;  %v5752_v25 = vld [vmem:[#allocation6 + $0x48] sm:$0xff] }
 0x749   :  { %1974 = vmatprep.subr.mxu0 %v1795_v23  ;;  %2087 = vmatprep.subr.mxu1 %v1797_v43  ;;  %7130 = vst [vmem:[#allocation38_spill] sm:$0xff] %v5749_v55  ;;  %7131 = vst [vmem:[#allocation54_spill] sm:$0xff] %v5752_v25  ;;  %v5755_v23 = vld [vmem:[#allocation6 + $0x58] sm:$0xff]  ;;  %v5758_v43 = vld [vmem:[#allocation6 + $0x40] sm:$0xff] }
 0x74a   :  { %1975 = vmatpush1.msra.mxu0 %v1794_v16  ;;  %2008 = vmatprep.mubr.f32.mxu0 %v7110_v7  ;;  %7132 = vst [vmem:[#allocation55_spill] sm:$0xff] %v5755_v23  ;;  %7133 = vst [vmem:[#allocation41_spill] sm:$0xff] %v5758_v43  ;;  %v5761_v16 = vld [vmem:[#allocation6 + $0x50] sm:$0xff] }
 0x74b   :  { %2088 = vmatpush1.msra.mxu1 %v1796_v10  ;;  %2121 = vmatprep.mubr.f32.mxu1 %v7110_v7  ;;  %7134 = vst [vmem:[#allocation40_spill] sm:$0xff] %v5761_v16  ;;  %v5764_v10 = vld [vmem:[#allocation6 + $0x28] sm:$0xff] }
 0x74c   :  { %2009 = vmatmul.mubr.f32.vlgmr.msra.gmra.mxu0 %v7115_v0  ;;  %2122 = vmatmul.mubr.f32.vlgmr.msra.gmra.mxu1 %v7115_v0  ;;  %7135 = vst [vmem:[#allocation12_spill] sm:$0xff] %v5764_v10  ;;  %v5767_v0 = vld [vmem:[#allocation6 + $0x38] sm:$0xff] }
 0x74d   :  { %2014 = vmatprep.mubr.f32.mxu0 %v7110_v7  ;;  %2127 = vmatprep.mubr.f32.mxu1 %v7110_v7  ;;  %7136 = vst [vmem:[#allocation15_spill] sm:$0xff] %v5767_v0 }
 0x74e   :  { %2170 = vmatprep.subr.mxu0 %v5597_v33  ;;  %2241 = vmatprep.subr.mxu1 %v5599_v27 }
 0x74f   :  { %2171 = vmatpush1.msra.mxu0 %v5602_v57 }
 0x750   :  { %2015 = vmatmul.mubr.f32.gmra.mxu0 %v7116_v47  ;;  %2128 = vmatmul.mubr.f32.gmra.mxu1 %v7116_v47  ;;  %v5770_v47 = vld [vmem:[#allocation6 + $0x20] sm:$0xff] }
 0x751   :  { %2020 = vmatprep.mubr.f32.mxu0 %v7110_v7  ;;  %2133 = vmatprep.mubr.f32.mxu1 %v7110_v7  ;;  %7137 = vst [vmem:[#allocation56_spill] sm:$0xff] %v5770_v47 }
 0x752   :  { %2172 = vmatprep.subr.mxu0 %v5608_v30 }
 0x753   :  { %2173 = vmatpush1.msra.mxu0 %v5614_v13 }
 0x754   :  { %2021 = vmatmul.mubr.f32.gmra.mxu0 %v7117_v19  ;;  %2134 = vmatmul.mubr.f32.gmra.mxu1 %v7117_v19  ;;  %v5773_v19 = vld [vmem:[#allocation6 + $0x30] sm:$0xff] }
 0x755   :  { %2026 = vmatprep.mubr.f32.mxu0 %v7110_v7  ;;  %2139 = vmatprep.mubr.f32.mxu1 %v7110_v7  ;;  %7138 = vst [vmem:[#allocation57_spill] sm:$0xff] %v5773_v19 }
 0x756   :  { %2174 = vmatprep.subr.mxu0 %v5620_v36 }
 0x757   :  { %2175 = vmatpush1.msra.mxu0 %v5626_v39 }
 0x758   :  { %2027 = vmatmul.mubr.f32.gmra.mxu0 %v7118_v50  ;;  %2140 = vmatmul.mubr.f32.gmra.mxu1 %v7118_v50  ;;  %v5776_v50 = vld [vmem:[#allocation6 + $0x8] sm:$0xff] }
 0x759   :  { %2032 = vmatprep.mubr.f32.mxu0 %v7110_v7  ;;  %2145 = vmatprep.mubr.f32.mxu1 %v7110_v7  ;;  %7139 = vst [vmem:[#allocation43_spill] sm:$0xff] %v5776_v50 }
 0x75a   :  { %2176 = vmatprep.subr.mxu0 %v5632_v51 }
 0x75b   :  { %2177 = vmatpush1.msra.mxu0 %v5638_v59 }
 0x75c   :  { %2033 = vmatmul.mubr.f32.gmra.mxu0 %v7119_v11  ;;  %2146 = vmatmul.mubr.f32.gmra.mxu1 %v7119_v11  ;;  %v5779_v11 = vld [vmem:[#allocation6] sm:$0xff] }
 0x75d   :  { %2038 = vmatprep.mubr.f32.mxu0 %v7110_v7  ;;  %2151 = vmatprep.mubr.f32.mxu1 %v7110_v7  ;;  %7140 = vst [vmem:[#allocation42_spill] sm:$0xff] %v5779_v11 }
 0x75e   :  { %2178 = vmatprep.subr.mxu0 %v5644_v61 }
 0x75f   :  { %2179 = vmatpush1.msra.mxu0 %v5650_v63 }
 0x760   :  { %2039 = vmatmul.mubr.f32.gmra.mxu0 %v5487_v41  ;;  %2152 = vmatmul.mubr.f32.gmra.mxu1 %v5487_v41  ;;  %v5605_v41 = vld [vmem:[#allocation6 + $0x1f0] sm:$0xff] }
 0x761   :  { %2044 = vmatprep.mubr.f32.mxu0 %v7110_v7  ;;  %2157 = vmatprep.mubr.f32.mxu1 %v7110_v7 }
 0x762   :  { %2242 = vmatpush1.msra.mxu1 %v5605_v41  ;;  %2180 = vmatprep.subr.mxu0 %v5656_v2 }
 0x763   :  { %2181 = vmatpush1.msra.mxu0 %v5662_v4 }
 0x764   :  { %2045 = vmatmul.mubr.f32.gmra.mxu0 %v5563_v45  ;;  %2158 = vmatmul.mubr.f32.gmra.mxu1 %v5563_v45  ;;  %v5611_v45 = vld [vmem:[#allocation6 + $0x1d8] sm:$0xff] }
 0x765   :  { %2050 = vmatprep.mubr.f32.mxu0 %v7110_v7  ;;  %2163 = vmatprep.mubr.f32.mxu1 %v7110_v7 }
 0x766   :  { %2243 = vmatprep.subr.mxu1 %v5611_v45  ;;  %2182 = vmatprep.subr.mxu0 %v5668_v6 }
 0x767   :  { %2244 = vmatpush1.msra.mxu1 %v5617_v26  ;;  %2183 = vmatpush1.msra.mxu0 %v5674_v9 }
 0x768   :  { %2245 = vmatprep.subr.mxu1 %v5623_v54  ;;  %2184 = vmatprep.subr.mxu0 %v5680_v18 }
 0x769   :  { %2246 = vmatpush1.msra.mxu1 %v5629_v35  ;;  %2185 = vmatpush1.msra.mxu0 %v5686_v48 }
 0x76a   :  { %2247 = vmatprep.subr.mxu1 %v5635_v58  ;;  %2186 = vmatprep.subr.mxu0 %v5692_v34 }
 0x76b   :  { %2248 = vmatpush1.msra.mxu1 %v5641_v60  ;;  %2187 = vmatpush1.msra.mxu0 %v5698_v42 }
 0x76c   :  { %2249 = vmatprep.subr.mxu1 %v5647_v62  ;;  %2188 = vmatprep.subr.mxu0 %v5704_v46 }
 0x76d   :  { %2250 = vmatpush1.msra.mxu1 %v5653_v1  ;;  %2189 = vmatpush1.msra.mxu0 %v5710_v53 }
 0x76e   :  { %2251 = vmatprep.subr.mxu1 %v5659_v3  ;;  %2190 = vmatprep.subr.mxu0 %v5716_v37 }
 0x76f   :  { %2252 = vmatpush1.msra.mxu1 %v5665_v5  ;;  %2191 = vmatpush1.msra.mxu0 %v5722_v52 }
 0x770   :  { %2253 = vmatprep.subr.mxu1 %v5671_v8  ;;  %2192 = vmatprep.subr.mxu0 %v5728_v15 }
 0x771   :  { %2254 = vmatpush1.msra.mxu1 %v5677_v14  ;;  %2193 = vmatpush1.msra.mxu0 %v5734_v22 }
 0x772   :  { %2255 = vmatprep.subr.mxu1 %v5683_v20  ;;  %2194 = vmatprep.subr.mxu0 %v5740_v29  ;;  %v7146_v29 = vld [vmem:[#allocation48_spill] sm:$0xff] }
 0x773   :  { %2256 = vmatpush1.msra.mxu1 %v5689_v44  ;;  %2195 = vmatpush1.msra.mxu0 %v5746_v40 }
 0x774   :  { %2257 = vmatprep.subr.mxu1 %v5695_v49  ;;  %2196 = vmatprep.subr.mxu0 %v5752_v25 }
 0x775   :  { %2258 = vmatpush1.msra.mxu1 %v5701_v56  ;;  %2197 = vmatpush1.msra.mxu0 %v5758_v43  ;;  %v5781_v43 = vld [vmem:[#allocation6 + $0x18] sm:$0xff] }
 0x776   :  { %2259 = vmatprep.subr.mxu1 %v5707_v38  ;;  %2198 = vmatprep.subr.mxu0 %v5764_v10  ;;  %7141 = vst [vmem:[#allocation16_spill] sm:$0xff] %v5781_v43  ;;  %v5785_v10 = vld [vmem:[#allocation6 + $0x10] sm:$0xff] }
 0x777   :  { %2260 = vmatpush1.msra.mxu1 %v5713_v32  ;;  %2199 = vmatpush1.msra.mxu0 %v5770_v47  ;;  %7142 = vst [vmem:[#allocation49_spill] sm:$0xff] %v5785_v10 }
 0x778   :  { %2261 = vmatprep.subr.mxu1 %v5719_v28  ;;  %2200 = vmatprep.subr.mxu0 %v5776_v50 }
 0x779   :  { %2262 = vmatpush1.msra.mxu1 %v5725_v12  ;;  %2201 = vmatpush1.msra.mxu0 %v5779_v11 }
 0x77a   :  { %2263 = vmatprep.subr.mxu1 %v5731_v17  ;;  %2340 = vmatprep.subr.mxu0 %v5597_v33 }
 0x77b   :  { %2264 = vmatpush1.msra.mxu1 %v5737_v24  ;;  %v7147_v24 = vld [vmem:[#allocation46_spill] sm:$0xff] }
 0x77c   :  { %2265 = vmatprep.subr.mxu1 %v5743_v31 }
 0x77d   :  { %2266 = vmatpush1.msra.mxu1 %v5749_v55 }
 0x77e   :  { %2267 = vmatprep.subr.mxu1 %v5755_v23  ;;  %v7145_v23 = vld [vmem:[#allocation60_spill] sm:$0xff] }
 0x77f   :  { %2268 = vmatpush1.msra.mxu1 %v5761_v16 }
 0x780   :  { %2269 = vmatprep.subr.mxu1 %v5767_v0  ;;  %v7144_v0 = vld [vmem:[#allocation10_spill] sm:$0xff] }
 0x781   :  { %2270 = vmatpush1.msra.mxu1 %v5773_v19  ;;  %v7143_v19 = vld [vmem:[#allocation47_spill] sm:$0xff] }
 0x782   :  { %2271 = vmatprep.subr.mxu1 %v5781_v43  ;;  %v319_v16 = vadd.f32 %v7144_v0, %v7143_v19  ;;  %v7154_v19 = vld [vmem:[#allocation39_spill] sm:$0xff] }
 0x783   :  { %2272 = vmatpush1.msra.mxu1 %v5785_v10 }
 0x784   :  { %2411 = vmatprep.subr.mxu1 %v5599_v27 }
 0x7eb   :  { %v1690_v47 = vpop.f32.mrf.mxu0  ;;  %v1761_v43 = vpop.f32.mrf.mxu1 }
 0x7ec   :  { %v1766_v25 = vadd.f32 %v1690_v47, %v7145_v23  ;;  %v1768_v33 = vadd.f32 %v1761_v43, %v7147_v24 }
 0x7ed   :  { %v1692_v55 = vpop.f32.mrf.mxu0  ;;  %v1763_v11 = vpop.f32.mrf.mxu1 }
 0x7ee   :  { %v3800_v50 = vmul.f32 -1.442695, %v1766_v25  ;;  %v1767_v40 = vadd.f32 %v1692_v55, %v319_v16  ;;  %v1769_v10 = vadd.f32 %v1763_v11, %v7146_v29  ;;  %v7156_v11 = vld [vmem:[#allocation54_spill] sm:$0xff] }
 0x7f0   :  { %4014 = vpow2.f32 %v3800_v50  ;;  %v3801_v31 = vmul.f32 -1.442695, %v1767_v40  ;;  %v3802_v22 = vmul.f32 -1.442695, %v1769_v10  ;;  %v7153_v10 = vld [vmem:[#allocation53_spill] sm:$0xff]  ;;  %v7155_v50 = vld [vmem:[#allocation38_spill] sm:$0xff] }
 0x7f2   :  { %4016 = vpow2.f32 %v3801_v31 }
 0x7f3   :  { %4018 = vtanh.f32 %v1768_v33  ;;  %v7149_v33 = vld [vmem:[#allocation51_spill] sm:$0xff] }
 0x7f4   :  { %4020 = vpow2.f32 %v3802_v22  ;;  %v7152_v22 = vld [vmem:[#allocation52_spill] sm:$0xff] }
 0x7fd   :  { %v4015_v27 = vpop.eup %4014 }
 0x7fe   :  { %v1773_v17 = vadd.f32 1.0, %v4015_v27 }
 0x7ff   :  { %v4017_v15 = vpop.eup %4016 }
 0x800   :  { %4022 = vrcp.f32 %v1773_v17  ;;  %v1779_v23 = vadd.f32 1.0, %v4017_v15  ;;  %v4019_v25 = vpop.eup %4018  ;;  %v7150_v15 = vld [vmem:[#allocation37_spill] sm:$0xff]  ;;  %v7151_v17 = vld [vmem:[#allocation36_spill] sm:$0xff] }
 0x801   :  { %v4021_v55 = vpop.eup %4020 }
 0x802   :  { %4024 = vrcp.f32 %v1779_v23  ;;  %v1786_v31 = vadd.f32 1.0, %v4021_v55  ;;  %v7157_v23 = vld [vmem:[#allocation55_spill] sm:$0xff]  ;;  %v7159_v55 = vld [vmem:[#allocation40_spill] sm:$0xff] }
 0x804   :  { %4026 = vrcp.f32 %v1786_v31  ;;  %v7163_v31 = vld [vmem:[#allocation57_spill] sm:$0xff] }
 0x80d   :  { %v4023_v16 = vpop.eup %4022 }
 0x80e   :  { %v1790_v0 = vmul.f32 %v4023_v16, %v4019_v25  ;;  %v7158_v25 = vld [vmem:[#allocation41_spill] sm:$0xff]  ;;  %v7160_v16 = vld [vmem:[#allocation12_spill] sm:$0xff] }
 0x80f   :  { %v4025_v40 = vpop.eup %4024 }
 0x810   :  { %v1789_v47 = vmul.f32 %v4025_v40, %v5560_v21  ;;  %v7148_v21 = vld [vmem:[#allocation50_spill] sm:$0xff]  ;;  %v7162_v40 = vld [vmem:[#allocation56_spill] sm:$0xff] }
 0x811   :  { %v4027_v24 = vpop.eup %4026 }
 0x812   :  { %v1791_v29 = vadd.f32 %v1790_v0, %v1789_v47  ;;  %v7161_v0 = vld [vmem:[#allocation15_spill] sm:$0xff] }
 0x813   :  { %v7164_v47 = vld [vmem:[#allocation43_spill] sm:$0xff] }
 0x814   :  { %4028 = vtanh.f32 %v1791_v29  ;;  %v7165_v29 = vld [vmem:[#allocation16_spill] sm:$0xff] }
 0x821   :  { %v4029_v43 = vpop.eup %4028 }
 0x822   :  { %v1793_v27 = vmul.f32 %v4029_v43, %v4027_v24  ;;  %v7166_v24 = vld [vmem:[#allocation42_spill] sm:$0xff]  ;;  %v7167_v43 = vld [vmem:[#allocation49_spill] sm:$0xff] }
 0x824   :  { %2051 = vmatmul.mubr.f32.gmra.mxu0 %v1793_v27  ;;  %2164 = vmatmul.mubr.f32.gmra.mxu1 %v1793_v27  ;;  %v7168_v27 = vld [vmem:[#allocation21_spill] sm:$0xff] }
 0x825   :  { %2234 = vmatprep.mubr.f32.mxu0 %v7110_v7  ;;  %2305 = vmatprep.mubr.f32.mxu1 %v7110_v7 }
 0x828   :  { %2235 = vmatmul.mubr.f32.vlgmr.msra.gmra.mxu0 %v7110_v7  ;;  %2306 = vmatmul.mubr.f32.vlgmr.msra.gmra.mxu1 %v7110_v7 }
 0x829   :  { %2341 = vmatpush1.msra.mxu0 %v5602_v57  ;;  %2412 = vmatpush1.msra.mxu1 %v5605_v41 }
 0x82a   :  { %2342 = vmatprep.subr.mxu0 %v5608_v30  ;;  %2413 = vmatprep.subr.mxu1 %v5611_v45 }
 0x82b   :  { %2343 = vmatpush1.msra.mxu0 %v5614_v13  ;;  %2414 = vmatpush1.msra.mxu1 %v5617_v26 }
 0x82c   :  { %2344 = vmatprep.subr.mxu0 %v5620_v36  ;;  %2415 = vmatprep.subr.mxu1 %v5623_v54 }
 0x82d   :  { %2345 = vmatpush1.msra.mxu0 %v5626_v39  ;;  %2416 = vmatpush1.msra.mxu1 %v5629_v35 }
 0x82e   :  { %2346 = vmatprep.subr.mxu0 %v5632_v51  ;;  %2417 = vmatprep.subr.mxu1 %v5635_v58 }
 0x82f   :  { %2347 = vmatpush1.msra.mxu0 %v5638_v59  ;;  %2418 = vmatpush1.msra.mxu1 %v5641_v60 }
 0x830   :  { %2348 = vmatprep.subr.mxu0 %v5644_v61  ;;  %2419 = vmatprep.subr.mxu1 %v5647_v62 }
 0x831   :  { %2349 = vmatpush1.msra.mxu0 %v5650_v63  ;;  %2420 = vmatpush1.msra.mxu1 %v5653_v1 }
 0x832   :  { %2350 = vmatprep.subr.mxu0 %v5656_v2  ;;  %2421 = vmatprep.subr.mxu1 %v5659_v3 }
 0x833   :  { %2351 = vmatpush1.msra.mxu0 %v5662_v4  ;;  %2422 = vmatpush1.msra.mxu1 %v5665_v5 }
 0x834   :  { %2352 = vmatprep.subr.mxu0 %v5668_v6  ;;  %2423 = vmatprep.subr.mxu1 %v5671_v8 }
 0x835   :  { %2353 = vmatpush1.msra.mxu0 %v5674_v9  ;;  %2424 = vmatpush1.msra.mxu1 %v5677_v14 }
 0x836   :  { %2354 = vmatprep.subr.mxu0 %v5680_v18  ;;  %2425 = vmatprep.subr.mxu1 %v5683_v20 }
 0x837   :  { %2355 = vmatpush1.msra.mxu0 %v5686_v48  ;;  %2426 = vmatpush1.msra.mxu1 %v5689_v44 }
 0x838   :  { %2356 = vmatprep.subr.mxu0 %v5692_v34  ;;  %2427 = vmatprep.subr.mxu1 %v5695_v49 }
 0x839   :  { %2357 = vmatpush1.msra.mxu0 %v5698_v42  ;;  %2428 = vmatpush1.msra.mxu1 %v5701_v56 }
 0x83a   :  { %2358 = vmatprep.subr.mxu0 %v5704_v46  ;;  %2429 = vmatprep.subr.mxu1 %v5707_v38 }
 0x83b   :  { %2359 = vmatpush1.msra.mxu0 %v5710_v53  ;;  %2430 = vmatpush1.msra.mxu1 %v5713_v32 }
 0x83c   :  { %2360 = vmatprep.subr.mxu0 %v5716_v37  ;;  %2431 = vmatprep.subr.mxu1 %v5719_v28 }
 0x83d   :  { %2361 = vmatpush1.msra.mxu0 %v5722_v52  ;;  %2432 = vmatpush1.msra.mxu1 %v5725_v12 }
 0x83e   :  { %2362 = vmatprep.subr.mxu0 %v7148_v21  ;;  %2433 = vmatprep.subr.mxu1 %v7149_v33 }
 0x83f   :  { %2363 = vmatpush1.msra.mxu0 %v7150_v15  ;;  %2434 = vmatpush1.msra.mxu1 %v7151_v17 }
 0x840   :  { %2364 = vmatprep.subr.mxu0 %v7152_v22  ;;  %2435 = vmatprep.subr.mxu1 %v7153_v10 }
 0x841   :  { %2365 = vmatpush1.msra.mxu0 %v7154_v19  ;;  %2436 = vmatpush1.msra.mxu1 %v7155_v50 }
 0x842   :  { %2366 = vmatprep.subr.mxu0 %v7156_v11  ;;  %2437 = vmatprep.subr.mxu1 %v7157_v23 }
 0x843   :  { %2367 = vmatpush1.msra.mxu0 %v7158_v25  ;;  %2438 = vmatpush1.msra.mxu1 %v7159_v55 }
 0x844   :  { %2368 = vmatprep.subr.mxu0 %v7160_v16  ;;  %2439 = vmatprep.subr.mxu1 %v7161_v0  ;;  %v7169_v16 = vld [vmem:[#allocation32_spill] sm:$0xff]  ;;  %v2010_v0 = vpop.f32.mrf.mxu0 }
 0x845   :  { %2369 = vmatpush1.msra.mxu0 %v7162_v40  ;;  %2440 = vmatpush1.msra.mxu1 %v7163_v31  ;;  %v2123_v40 = vpop.f32.mrf.mxu1 }
 0x846   :  { %2370 = vmatprep.subr.mxu0 %v7164_v47  ;;  %2441 = vmatprep.subr.mxu1 %v7165_v29  ;;  %v2012_v55 = vpop.f32.mrf.mxu0 }
 0x847   :  { %2371 = vmatpush1.msra.mxu0 %v7166_v24  ;;  %2404 = vmatprep.mubr.f32.mxu0 %v7110_v7  ;;  %v2125_v31 = vpop.f32.mrf.mxu1 }
 0x848   :  { %2442 = vmatpush1.msra.mxu1 %v7167_v43  ;;  %2475 = vmatprep.mubr.f32.mxu1 %v7110_v7  ;;  %v5867_v25 = vpop.f32.mrf.mxu0 }
 0x849   :  { %2510 = vmatprep.subr.mxu0 %v7168_v27  ;;  %2581 = vmatprep.subr.mxu1 %v7169_v16  ;;  %7170 = vst [vmem:[#allocation27_spill] sm:$0xff] %v5867_v25  ;;  %v5869_v47 = vpop.f32.mrf.mxu1 }
 0x84a   :  { %7171 = vst [vmem:[#allocation35_spill] sm:$0xff] %v5869_v47  ;;  %v5871_v29 = vpop.f32.mrf.mxu0 }
 0x84b   :  { %7172 = vst [vmem:[#allocation17_spill] sm:$0xff] %v5871_v29  ;;  %v5873_v24 = vpop.f32.mrf.mxu1 }
 0x84c   :  { %7173 = vst [vmem:[#allocation34_spill] sm:$0xff] %v5873_v24  ;;  %v5875_v23 = vpop.f32.mrf.mxu0 }
 0x84d   :  { %7174 = vst [vmem:[#allocation28_spill] sm:$0xff] %v5875_v23  ;;  %v5877_v43 = vpop.f32.mrf.mxu1 }
 0x84e   :  { %7175 = vst [vmem:[#allocation23_spill] sm:$0xff] %v5877_v43  ;;  %v5879_v7 = vpop.f32.mrf.mxu0 }
 0x84f   :  { %7176 = vst [vmem:[#allocation18_spill] sm:$0xff] %v5879_v7  ;;  %v5881_v27 = vpop.f32.mrf.mxu1 }
 0x850   :  { %7177 = vst [vmem:[#allocation13_spill] sm:$0xff] %v5881_v27  ;;  %v5883_v16 = vpop.f32.mrf.mxu0 }
 0x851   :  { %7178 = vst [vmem:[#allocation29_spill] sm:$0xff] %v5883_v16  ;;  %v5885_v11 = vpop.f32.mrf.mxu1 }
 0x852   :  { %7179 = vst [vmem:[#allocation24_spill] sm:$0xff] %v5885_v11  ;;  %v5887_v50 = vpop.f32.mrf.mxu0 }
 0x853   :  { %7180 = vst [vmem:[#allocation19_spill] sm:$0xff] %v5887_v50  ;;  %v5889_v25 = vpop.f32.mrf.mxu1 }
 0x854   :  { %7181 = vst [vmem:[#allocation14_spill] sm:$0xff] %v5889_v25  ;;  %v5891_v47 = vpop.f32.mrf.mxu0 }
 0x855   :  { %7182 = vst [vmem:[#allocation30_spill] sm:$0xff] %v5891_v47  ;;  %v5893_v29 = vpop.f32.mrf.mxu1 }
 0x856   :  { %7183 = vst [vmem:[#allocation25_spill] sm:$0xff] %v5893_v29  ;;  %v5895_v24 = vpop.f32.mrf.mxu0  ;;  %v1922_v29 = vld [vmem:[%s6717_s6] sm:$0xf] }
 0x857   :  { %7184 = vst [vmem:[#allocation20_spill] sm:$0xff] %v5895_v24  ;;  %v5897_v23 = vpop.f32.mrf.mxu1  ;;  %v7193_v24 = vld [vmem:[#allocation33_spill] sm:$0xff] }
 0x858   :  { %7185 = vst [vmem:[#allocation58_spill] sm:$0xff] %v5897_v23  ;;  %v5899_v43 = vpop.f32.mrf.mxu0  ;;  %v7194_v23 = vsub.s32 0, %v7193_v24 }
 0x859   :  { %7186 = vst [vmem:[#allocation59_spill] sm:$0xff] %v5899_v43  ;;  %v5901_v7 = vpop.f32.mrf.mxu1 }
 0x85a   :  { %7187 = vst [vmem:[#allocation45_spill] sm:$0xff] %v5901_v7  ;;  %v5903_v27 = vpop.f32.mrf.mxu0  ;;  %v5918_v25 = vrot.slane %v1922_v29, %v7194_v23 }
 0x85b   :  { %7188 = vst [vmem:[#allocation44_spill] sm:$0xff] %v5903_v27  ;;  %v5905_v16 = vpop.f32.mrf.mxu1 }
 0x85c   :  { %7189 = vst [vmem:[#allocation61_spill] sm:$0xff] %v5905_v16  ;;  %v5907_v11 = vpop.f32.mrf.mxu0  ;;  %7195 = vst [vmem:[#allocation31_spill] sm:$0xff] %v5918_v25  ;;  %v7198_v16 = vsub.s32 1, %v7193_v24  ;;  %v2011_v19 = vadd.f32 %v2010_v0, %v5918_v25 }
 0x85d   :  { %7190 = vst [vmem:[#allocation11_spill] sm:$0xff] %v5907_v11  ;;  %v5909_v50 = vpop.f32.mrf.mxu1 }
 0x85e   :  { %7191 = vst [vmem:[#allocation9_spill] sm:$0xff] %v5909_v50  ;;  %v5914_v47 = vpop.f32.mrf.mxu0  ;;  %v5926_v27 = vrot.slane %v1922_v29, %v7198_v16  ;;  %v7202_v16 = vsub.s32 3, %v7193_v24 }
 0x85f   :  { %7192 = vst [vmem:[#allocation26_spill] sm:$0xff] %v5914_v47  ;;  %v5920_v43 = vpop.f32.mrf.mxu1 }
 0x860   :  { %7196 = vst [vmem:[#allocation47_spill] sm:$0xff] %v5920_v43  ;;  %v2013_v47 = vadd.f32 %v2012_v55, %v5926_v27  ;;  %v5938_v21 = vrot.slane %v1922_v29, %v7202_v16 }
 0x862   :  { %7203 = vst [vmem:[#allocation33_spill] sm:$0xff] %v5938_v21  ;;  %v2126_v0 = vadd.f32 %v2125_v31, %v5938_v21 }
 0x8e4   :  { %v5922_v7 = vpop.f32.mrf.mxu0  ;;  %v5928_v11 = vpop.f32.mrf.mxu1 }
 0x8e5   :  { %7197 = vst [vmem:[#allocation10_spill] sm:$0xff] %v5922_v7  ;;  %7199 = vst [vmem:[#allocation60_spill] sm:$0xff] %v5928_v11 }
 0x8e6   :  { %v5930_v50 = vpop.f32.mrf.mxu0  ;;  %v5934_v22 = vpop.f32.mrf.mxu1 }
 0x8e7   :  { %7200 = vst [vmem:[#allocation48_spill] sm:$0xff] %v5930_v50  ;;  %7201 = vst [vmem:[#allocation46_spill] sm:$0xff] %v5934_v22  ;;  %v7204_v50 = vsub.s32 2, %v7193_v24 }
 0x8e8   :  { %v2236_v10 = vpop.f32.mrf.mxu0  ;;  %v2307_v7 = vpop.f32.mrf.mxu1 }
 0x8e9   :  { %v2312_v23 = vadd.f32 %v2236_v10, %v2011_v19  ;;  %v5943_v55 = vrot.slane %v1922_v29, %v7204_v50 }
 0x8ea   :  { %v2238_v17 = vpop.f32.mrf.mxu0  ;;  %v2309_v11 = vpop.f32.mrf.mxu1 }
 0x8eb   :  { %v3803_v43 = vmul.f32 -1.442695, %v2312_v23  ;;  %v2313_v15 = vadd.f32 %v2238_v17, %v2013_v47  ;;  %v2315_v22 = vadd.f32 %v2309_v11, %v2126_v0  ;;  %v2124_v10 = vadd.f32 %v2123_v40, %v5943_v55  ;;  %v7207_v0 = vld [vmem:[#allocation51_spill] sm:$0xff] }
 0x8ed   :  { %4030 = vpow2.f32 %v3803_v43  ;;  %v3804_v33 = vmul.f32 -1.442695, %v2313_v15  ;;  %v3805_v19 = vmul.f32 -1.442695, %v2315_v22  ;;  %v2314_v47 = vadd.f32 %v2307_v7, %v2124_v10  ;;  %v7208_v10 = vld [vmem:[#allocation37_spill] sm:$0xff] }
 0x8ef   :  { %4032 = vpow2.f32 %v3804_v33 }
 0x8f0   :  { %4034 = vpow2.f32 %v3805_v19  ;;  %v7209_v19 = vld [vmem:[#allocation36_spill] sm:$0xff] }
 0x8fa   :  { %v4031_v17 = vpop.eup %4030 }
 0x8fb   :  { %v2319_v43 = vadd.f32 1.0, %v4031_v17  ;;  %v7210_v17 = vld [vmem:[#allocation52_spill] sm:$0xff] }
 0x8fc   :  { %v4033_v15 = vpop.eup %4032 }
 0x8fd   :  { %4036 = vrcp.f32 %v2319_v43  ;;  %v2325_v23 = vadd.f32 1.0, %v4033_v15  ;;  %v4035_v33 = vpop.eup %4034  ;;  %v7212_v43 = vld [vmem:[#allocation39_spill] sm:$0xff]  ;;  %v7213_v15 = vld [vmem:[#allocation38_spill] sm:$0xff] }
 0x8fe   :  { %4038 = vtanh.f32 %v2314_v47  ;;  %v2332_v24 = vadd.f32 1.0, %v4035_v33  ;;  %v7211_v47 = vld [vmem:[#allocation53_spill] sm:$0xff]  ;;  %v7215_v33 = vld [vmem:[#allocation55_spill] sm:$0xff] }
 0x8ff   :  { %4040 = vrcp.f32 %v2325_v23  ;;  %v7214_v23 = vld [vmem:[#allocation54_spill] sm:$0xff] }
 0x900   :  { %4042 = vrcp.f32 %v2332_v24  ;;  %v7218_v24 = vld [vmem:[#allocation12_spill] sm:$0xff] }
 0x90a   :  { %v4037_v16 = vpop.eup %4036 }
 0x90b   :  { %v4039_v31 = vpop.eup %4038 }
 0x90c   :  { %v4041_v21 = vpop.eup %4040  ;;  %v2336_v29 = vmul.f32 %v4039_v31, %v4037_v16  ;;  %v7216_v16 = vld [vmem:[#allocation41_spill] sm:$0xff]  ;;  %v7217_v31 = vld [vmem:[#allocation40_spill] sm:$0xff] }
 0x90d   :  { %v2335_v50 = vmul.f32 0.0, %v4041_v21  ;;  %v4043_v7 = vpop.eup %4042  ;;  %v7206_v21 = vld [vmem:[#allocation50_spill] sm:$0xff] }
 0x90f   :  { %v5946_v11 = vadd.f32 %v2336_v29, %v2335_v50  ;;  %v7219_v50 = vld [vmem:[#allocation15_spill] sm:$0xff]  ;;  %v7220_v29 = vld [vmem:[#allocation56_spill] sm:$0xff] }
 0x911   :  { %4044 = vtanh.f32 %v5946_v11 }
 0x91e   :  { %v4045_v22 = vpop.eup %4044 }
 0x91f   :  { %v5949_v40 = vmul.f32 %v4045_v22, %v4043_v7  ;;  %v7221_v7 = vld [vmem:[#allocation57_spill] sm:$0xff]  ;;  %v7222_v22 = vld [vmem:[#allocation43_spill] sm:$0xff] }
 0x921   :  { %7205 = vst [vmem:[#allocation62_spill] sm:$0xff] %v5949_v40  ;;  %2405 = vmatmul.mubr.f32.vlgmr.msra.gmra.mxu0 %v5949_v40  ;;  %2476 = vmatmul.mubr.f32.vlgmr.msra.gmra.mxu1 %v5949_v40  ;;  %v7223_v40 = vld [vmem:[#allocation16_spill] sm:$0xff] }
 0x922   :  { %2511 = vmatpush1.msra.mxu0 %v5602_v57  ;;  %2582 = vmatpush1.msra.mxu1 %v5605_v41 }
 0x923   :  { %2512 = vmatprep.subr.mxu0 %v5608_v30  ;;  %2583 = vmatprep.subr.mxu1 %v5611_v45 }
 0x924   :  { %2513 = vmatpush1.msra.mxu0 %v5614_v13  ;;  %2584 = vmatpush1.msra.mxu1 %v5617_v26 }
 0x925   :  { %2514 = vmatprep.subr.mxu0 %v5620_v36  ;;  %2585 = vmatprep.subr.mxu1 %v5623_v54 }
 0x926   :  { %2515 = vmatpush1.msra.mxu0 %v5626_v39  ;;  %2586 = vmatpush1.msra.mxu1 %v5629_v35 }
 0x927   :  { %2516 = vmatprep.subr.mxu0 %v5632_v51  ;;  %2587 = vmatprep.subr.mxu1 %v5635_v58 }
 0x928   :  { %2517 = vmatpush1.msra.mxu0 %v5638_v59  ;;  %2588 = vmatpush1.msra.mxu1 %v5641_v60 }
 0x929   :  { %2518 = vmatprep.subr.mxu0 %v5644_v61  ;;  %2589 = vmatprep.subr.mxu1 %v5647_v62 }
 0x92a   :  { %2519 = vmatpush1.msra.mxu0 %v5650_v63  ;;  %2590 = vmatpush1.msra.mxu1 %v5653_v1 }
 0x92b   :  { %2520 = vmatprep.subr.mxu0 %v5656_v2  ;;  %2591 = vmatprep.subr.mxu1 %v5659_v3 }
 0x92c   :  { %2521 = vmatpush1.msra.mxu0 %v5662_v4  ;;  %2592 = vmatpush1.msra.mxu1 %v5665_v5 }
 0x92d   :  { %2522 = vmatprep.subr.mxu0 %v5668_v6  ;;  %2593 = vmatprep.subr.mxu1 %v5671_v8 }
 0x92e   :  { %2523 = vmatpush1.msra.mxu0 %v5674_v9  ;;  %2594 = vmatpush1.msra.mxu1 %v5677_v14 }
 0x92f   :  { %2524 = vmatprep.subr.mxu0 %v5680_v18  ;;  %2595 = vmatprep.subr.mxu1 %v5683_v20 }
 0x930   :  { %2525 = vmatpush1.msra.mxu0 %v5686_v48  ;;  %2596 = vmatpush1.msra.mxu1 %v5689_v44 }
 0x931   :  { %2526 = vmatprep.subr.mxu0 %v5692_v34  ;;  %2597 = vmatprep.subr.mxu1 %v5695_v49 }
 0x932   :  { %2527 = vmatpush1.msra.mxu0 %v5698_v42  ;;  %2598 = vmatpush1.msra.mxu1 %v5701_v56 }
 0x933   :  { %2528 = vmatprep.subr.mxu0 %v5704_v46  ;;  %2599 = vmatprep.subr.mxu1 %v5707_v38 }
 0x934   :  { %2529 = vmatpush1.msra.mxu0 %v5710_v53  ;;  %2600 = vmatpush1.msra.mxu1 %v5713_v32 }
 0x935   :  { %2530 = vmatprep.subr.mxu0 %v5716_v37  ;;  %2601 = vmatprep.subr.mxu1 %v5719_v28 }
 0x936   :  { %2531 = vmatpush1.msra.mxu0 %v5722_v52  ;;  %2602 = vmatpush1.msra.mxu1 %v5725_v12 }
 0x937   :  { %2532 = vmatprep.subr.mxu0 %v7206_v21  ;;  %2603 = vmatprep.subr.mxu1 %v7207_v0  ;;  %v7233_v0 = vld [vmem:[#allocation35_spill] sm:$0xff] }
 0x938   :  { %2533 = vmatpush1.msra.mxu0 %v7208_v10  ;;  %2604 = vmatpush1.msra.mxu1 %v7209_v19  ;;  %v7231_v19 = vld [vmem:[#allocation33_spill] sm:$0xff] }
 0x939   :  { %2534 = vmatprep.subr.mxu0 %v7210_v17  ;;  %2605 = vmatprep.subr.mxu1 %v7211_v47 }
 0x93a   :  { %2535 = vmatpush1.msra.mxu0 %v7212_v43  ;;  %2606 = vmatpush1.msra.mxu1 %v7213_v15  ;;  %v7224_v15 = vld [vmem:[#allocation42_spill] sm:$0xff] }
 0x93b   :  { %2536 = vmatprep.subr.mxu0 %v7214_v23  ;;  %2607 = vmatprep.subr.mxu1 %v7215_v33  ;;  %v7225_v23 = vmov 0.0   ;;  %v7226_v33 = vld [vmem:[#allocation49_spill] sm:$0xff] }
 0x93c   :  { %2537 = vmatpush1.msra.mxu0 %v7216_v16  ;;  %2608 = vmatpush1.msra.mxu1 %v7217_v31  ;;  %v7227_v31 = vld [vmem:[#allocation21_spill] sm:$0xff] }
 0x93d   :  { %2538 = vmatprep.subr.mxu0 %v7218_v24  ;;  %2609 = vmatprep.subr.mxu1 %v7219_v50  ;;  %v7228_v24 = vld [vmem:[#allocation32_spill] sm:$0xff] }
 0x93e   :  { %2539 = vmatpush1.msra.mxu0 %v7220_v29  ;;  %2610 = vmatpush1.msra.mxu1 %v7221_v7  ;;  %v7229_v29 = vld [vmem:[#allocation27_spill] sm:$0xff] }
 0x93f   :  { %2540 = vmatprep.subr.mxu0 %v7222_v22  ;;  %2611 = vmatprep.subr.mxu1 %v7223_v40  ;;  %v2017_v50 = vadd.f32 %v7229_v29, %v5918_v25  ;;  %v7230_v22 = vld [vmem:[#allocation17_spill] sm:$0xff]  ;;  %v2130_v29 = vadd.f32 %v7233_v0, %v5943_v55 }
 0x940   :  { %2541 = vmatpush1.msra.mxu0 %v7224_v15  ;;  %2574 = vmatprep.mubr.f32.mxu0 %v7225_v23  ;;  %v2019_v16 = vadd.f32 %v7230_v22, %v5926_v27 }
 0x941   :  { %2612 = vmatpush1.msra.mxu1 %v7226_v33  ;;  %2645 = vmatprep.mubr.f32.mxu1 %v7225_v23 }
 0x942   :  { %2680 = vmatprep.subr.mxu0 %v7227_v31  ;;  %2751 = vmatprep.subr.mxu1 %v7228_v24  ;;  %v7232_v31 = vld [vmem:[#allocation34_spill] sm:$0xff] }
 0x943   :  { %v2132_v10 = vadd.f32 %v7232_v31, %v7231_v19 }
 0x9e1   :  { %v2406_v7 = vpop.f32.mrf.mxu0  ;;  %v2477_v17 = vpop.f32.mrf.mxu1 }
 0x9e2   :  { %v2482_v40 = vadd.f32 %v2406_v7, %v2017_v50  ;;  %v2484_v25 = vadd.f32 %v2477_v17, %v2130_v29  ;;  %v7249_v17 = vld [vmem:[#allocation15_spill] sm:$0xff]  ;;  %v7251_v7 = vld [vmem:[#allocation57_spill] sm:$0xff] }
 0x9e3   :  { %v2408_v43 = vpop.f32.mrf.mxu0  ;;  %v2479_v23 = vpop.f32.mrf.mxu1  ;;  %v7252_v29 = vld [vmem:[#allocation43_spill] sm:$0xff] }
 0x9e4   :  { %v3806_v15 = vmul.f32 -1.442695, %v2482_v40  ;;  %v2483_v47 = vadd.f32 %v2408_v43, %v2019_v16  ;;  %v2485_v24 = vadd.f32 %v2479_v23, %v2132_v10 }
 0x9e6   :  { %4046 = vpow2.f32 %v3806_v15  ;;  %v3807_v33 = vmul.f32 -1.442695, %v2483_v47  ;;  %v3808_v21 = vmul.f32 -1.442695, %v2485_v24  ;;  %v7250_v24 = vld [vmem:[#allocation56_spill] sm:$0xff] }
 0x9e8   :  { %4048 = vpow2.f32 %v3807_v33 }
 0x9e9   :  { %4050 = vtanh.f32 %v2484_v25 }
 0x9ea   :  { %4052 = vpow2.f32 %v3808_v21  ;;  %v7248_v21 = vld [vmem:[#allocation12_spill] sm:$0xff] }
 0x9f3   :  { %v4047_v12 = vpop.eup %4046 }
 0x9f4   :  { %v2489_v22 = vadd.f32 1.0, %v4047_v12 }
 0x9f5   :  { %v4049_v50 = vpop.eup %4048 }
 0x9f6   :  { %4054 = vrcp.f32 %v2489_v22  ;;  %v2495_v40 = vadd.f32 1.0, %v4049_v50  ;;  %v4051_v47 = vpop.eup %4050  ;;  %v7253_v22 = vld [vmem:[#allocation16_spill] sm:$0xff]  ;;  %v7254_v50 = vld [vmem:[#allocation42_spill] sm:$0xff] }
 0x9f7   :  { %v4053_v43 = vpop.eup %4052 }
 0x9f8   :  { %4056 = vrcp.f32 %v2495_v40  ;;  %v2502_v31 = vadd.f32 1.0, %v4053_v43  ;;  %v7255_v40 = vmov 0.0   ;;  %v7257_v43 = vld [vmem:[#allocation21_spill] sm:$0xff] }
 0x9fa   :  { %4058 = vrcp.f32 %v2502_v31 }
 0xa03   :  { %v4055_v15 = vpop.eup %4054 }
 0xa04   :  { %v2506_v33 = vmul.f32 %v4055_v15, %v4051_v47  ;;  %v7256_v47 = vld [vmem:[#allocation49_spill] sm:$0xff]  ;;  %v7258_v15 = vld [vmem:[#allocation32_spill] sm:$0xff] }
 0xa05   :  { %v4057_v16 = vpop.eup %4056 }
 0xa06   :  { %v2505_v10 = vmul.f32 %v4057_v16, %v5946_v11  ;;  %v7247_v11 = vld [vmem:[#allocation40_spill] sm:$0xff] }
 0xa07   :  { %v4059_v12 = vpop.eup %4058  ;;  %v7260_v16 = vld [vmem:[#allocation28_spill] sm:$0xff] }
 0xa08   :  { %v6028_v23 = vadd.f32 %v2506_v33, %v2505_v10  ;;  %v7259_v33 = vld [vmem:[#allocation31_spill] sm:$0xff] }
 0xa09   :  { %v2023_v31 = vadd.f32 %v7260_v16, %v7259_v33 }
 0xa0a   :  { %4060 = vtanh.f32 %v6028_v23 }
 0xa17   :  { %v4061_v25 = vpop.eup %4060 }
 0xa18   :  { %v6031_v0 = vmul.f32 %v4061_v25, %v4059_v12  ;;  %v7261_v12 = vld [vmem:[#allocation18_spill] sm:$0xff] }
 0xa19   :  { %v2025_v25 = vadd.f32 %v7261_v12, %v5926_v27 }
 0xa1a   :  { %7234 = vst [vmem:[#allocation27_spill] sm:$0xff] %v6031_v0  ;;  %2575 = vmatmul.mubr.f32.vlgmr.msra.gmra.mxu0 %v6031_v0  ;;  %2646 = vmatmul.mubr.f32.vlgmr.msra.gmra.mxu1 %v6031_v0 }
 0xa1b   :  { %2681 = vmatpush1.msra.mxu0 %v5602_v57  ;;  %2752 = vmatpush1.msra.mxu1 %v5605_v41  ;;  %v7235_v57 = vld [vmem:[#allocation22_spill] sm:$0xff] }
 0xa1c   :  { %2682 = vmatprep.subr.mxu0 %v5608_v30  ;;  %2753 = vmatprep.subr.mxu1 %v5611_v45  ;;  %v7236_v41 = vld [vmem:[#allocation50_spill] sm:$0xff]  ;;  %v7237_v30 = vld [vmem:[#allocation51_spill] sm:$0xff]  ;;  %v7238_v45 = vld [vmem:[#allocation37_spill] sm:$0xff] }
 0xa1d   :  { %2683 = vmatpush1.msra.mxu0 %v5614_v13  ;;  %2754 = vmatpush1.msra.mxu1 %v5617_v26  ;;  %v7239_v13 = vld [vmem:[#allocation36_spill] sm:$0xff] }
 0xa1e   :  { %2684 = vmatprep.subr.mxu0 %v5620_v36  ;;  %2755 = vmatprep.subr.mxu1 %v5623_v54  ;;  %v7240_v26 = vld [vmem:[#allocation52_spill] sm:$0xff]  ;;  %v7241_v36 = vld [vmem:[#allocation53_spill] sm:$0xff]  ;;  %v7242_v54 = vld [vmem:[#allocation39_spill] sm:$0xff] }
 0xa1f   :  { %2685 = vmatpush1.msra.mxu0 %v5626_v39  ;;  %2756 = vmatpush1.msra.mxu1 %v5629_v35  ;;  %v7243_v39 = vld [vmem:[#allocation38_spill] sm:$0xff] }
 0xa20   :  { %2686 = vmatprep.subr.mxu0 %v5632_v51  ;;  %2757 = vmatprep.subr.mxu1 %v5635_v58  ;;  %v7244_v35 = vld [vmem:[#allocation54_spill] sm:$0xff]  ;;  %v7245_v51 = vld [vmem:[#allocation55_spill] sm:$0xff]  ;;  %v7246_v58 = vld [vmem:[#allocation41_spill] sm:$0xff] }
 0xa21   :  { %2687 = vmatpush1.msra.mxu0 %v5638_v59  ;;  %2758 = vmatpush1.msra.mxu1 %v5641_v60 }
 0xa22   :  { %2688 = vmatprep.subr.mxu0 %v5644_v61  ;;  %2759 = vmatprep.subr.mxu1 %v5647_v62 }
 0xa23   :  { %2689 = vmatpush1.msra.mxu0 %v5650_v63  ;;  %2760 = vmatpush1.msra.mxu1 %v5653_v1 }
 0xa24   :  { %2690 = vmatprep.subr.mxu0 %v5656_v2  ;;  %2761 = vmatprep.subr.mxu1 %v5659_v3 }
 0xa25   :  { %2691 = vmatpush1.msra.mxu0 %v5662_v4  ;;  %2762 = vmatpush1.msra.mxu1 %v5665_v5 }
 0xa26   :  { %2692 = vmatprep.subr.mxu0 %v5668_v6  ;;  %2763 = vmatprep.subr.mxu1 %v5671_v8 }
 0xa27   :  { %2693 = vmatpush1.msra.mxu0 %v5674_v9  ;;  %2764 = vmatpush1.msra.mxu1 %v5677_v14 }
 0xa28   :  { %2694 = vmatprep.subr.mxu0 %v5680_v18  ;;  %2765 = vmatprep.subr.mxu1 %v5683_v20 }
 0xa29   :  { %2695 = vmatpush1.msra.mxu0 %v5686_v48  ;;  %2766 = vmatpush1.msra.mxu1 %v5689_v44 }
 0xa2a   :  { %2696 = vmatprep.subr.mxu0 %v5692_v34  ;;  %2767 = vmatprep.subr.mxu1 %v5695_v49 }
 0xa2b   :  { %2697 = vmatpush1.msra.mxu0 %v5698_v42  ;;  %2768 = vmatpush1.msra.mxu1 %v5701_v56 }
 0xa2c   :  { %2698 = vmatprep.subr.mxu0 %v5704_v46  ;;  %2769 = vmatprep.subr.mxu1 %v5707_v38 }
 0xa2d   :  { %2699 = vmatpush1.msra.mxu0 %v5710_v53  ;;  %2770 = vmatpush1.msra.mxu1 %v5713_v32 }
 0xa2e   :  { %2700 = vmatprep.subr.mxu0 %v5716_v37  ;;  %2771 = vmatprep.subr.mxu1 %v5719_v28 }
 0xa2f   :  { %2701 = vmatpush1.msra.mxu0 %v5722_v52  ;;  %2772 = vmatpush1.msra.mxu1 %v7235_v57 }
 0xa30   :  { %2702 = vmatprep.subr.mxu0 %v7236_v41  ;;  %2773 = vmatprep.subr.mxu1 %v7237_v30 }
 0xa31   :  { %2703 = vmatpush1.msra.mxu0 %v7238_v45  ;;  %2774 = vmatpush1.msra.mxu1 %v7239_v13 }
 0xa32   :  { %2704 = vmatprep.subr.mxu0 %v7240_v26  ;;  %2775 = vmatprep.subr.mxu1 %v7241_v36 }
 0xa33   :  { %2705 = vmatpush1.msra.mxu0 %v7242_v54  ;;  %2776 = vmatpush1.msra.mxu1 %v7243_v39 }
 0xa34   :  { %2706 = vmatprep.subr.mxu0 %v7244_v35  ;;  %2777 = vmatprep.subr.mxu1 %v7245_v51 }
 0xa35   :  { %2707 = vmatpush1.msra.mxu0 %v7246_v58  ;;  %2778 = vmatpush1.msra.mxu1 %v7247_v11 }
 0xa36   :  { %2708 = vmatprep.subr.mxu0 %v7248_v21  ;;  %2779 = vmatprep.subr.mxu1 %v7249_v17  ;;  %v7263_v17 = vld [vmem:[#allocation23_spill] sm:$0xff] }
 0xa37   :  { %2709 = vmatpush1.msra.mxu0 %v7250_v24  ;;  %2780 = vmatpush1.msra.mxu1 %v7251_v7  ;;  %v2136_v16 = vadd.f32 %v7263_v17, %v5943_v55 }
 0xa38   :  { %2710 = vmatprep.subr.mxu0 %v7252_v29  ;;  %2781 = vmatprep.subr.mxu1 %v7253_v22 }
 0xa39   :  { %2711 = vmatpush1.msra.mxu0 %v7254_v50  ;;  %2744 = vmatprep.mubr.f32.mxu0 %v7255_v40 }
 0xa3a   :  { %2782 = vmatpush1.msra.mxu1 %v7256_v47  ;;  %2815 = vmatprep.mubr.f32.mxu1 %v7255_v40 }
 0xa3b   :  { %2850 = vmatprep.subr.mxu0 %v7257_v43  ;;  %2921 = vmatprep.subr.mxu1 %v7258_v15  ;;  %v7262_v43 = vld [vmem:[#allocation13_spill] sm:$0xff] }
 0xa3c   :  { %v2138_v24 = vadd.f32 %v7262_v43, %v7231_v19  ;;  %v6126_v43 = vld [vmem:[#allocation6 + $0x1d8] sm:$0xff] }
 0xada   :  { %v2576_v10 = vpop.f32.mrf.mxu0  ;;  %v2647_v7 = vpop.f32.mrf.mxu1 }
 0xadb   :  { %v2652_v0 = vadd.f32 %v2576_v10, %v2023_v31  ;;  %v2654_v33 = vadd.f32 %v2647_v7, %v2136_v16  ;;  %v6132_v16 = vld [vmem:[#allocation6 + $0x1d0] sm:$0xff] }
 0xadc   :  { %v2578_v22 = vpop.f32.mrf.mxu0  ;;  %v2649_v40 = vpop.f32.mrf.mxu1 }
 0xadd   :  { %v3809_v50 = vmul.f32 -1.442695, %v2652_v0  ;;  %v2653_v29 = vadd.f32 %v2578_v22, %v2025_v25  ;;  %v2655_v15 = vadd.f32 %v2649_v40, %v2138_v24 }
 0xadf   :  { %4062 = vpow2.f32 %v3809_v50  ;;  %v3810_v47 = vmul.f32 -1.442695, %v2653_v29  ;;  %v3811_v21 = vmul.f32 -1.442695, %v2655_v15  ;;  %v6129_v15 = vld [vmem:[#allocation6 + $0x1c0] sm:$0xff] }
 0xae1   :  { %4064 = vpow2.f32 %v3810_v47 }
 0xae2   :  { %4066 = vtanh.f32 %v2654_v33  ;;  %v6120_v33 = vld [vmem:[#allocation6 + $0x1f0] sm:$0xff] }
 0xae3   :  { %4068 = vpow2.f32 %v3811_v21  ;;  %v6117_v21 = vld [vmem:[#allocation6 + $0x1e0] sm:$0xff] }
 0xaec   :  { %v4063_v11 = vpop.eup %4062 }
 0xaed   :  { %v2659_v12 = vadd.f32 1.0, %v4063_v11 }
 0xaee   :  { %v4065_v31 = vpop.eup %4064 }
 0xaef   :  { %4070 = vrcp.f32 %v2659_v12  ;;  %v2665_v0 = vadd.f32 1.0, %v4065_v31  ;;  %v4067_v29 = vpop.eup %4066  ;;  %v6135_v12 = vld [vmem:[#allocation6 + $0x1a8] sm:$0xff]  ;;  %v6138_v31 = vld [vmem:[#allocation6 + $0x1b8] sm:$0xff] }
 0xaf0   :  { %v4069_v22 = vpop.eup %4068 }
 0xaf1   :  { %4072 = vrcp.f32 %v2665_v0  ;;  %v2672_v25 = vadd.f32 1.0, %v4069_v22  ;;  %v6141_v0 = vld [vmem:[#allocation6 + $0x1a0] sm:$0xff]  ;;  %v6147_v22 = vld [vmem:[#allocation6 + $0x188] sm:$0xff] }
 0xaf3   :  { %4074 = vrcp.f32 %v2672_v25 }
 0xafc   :  { %v4071_v50 = vpop.eup %4070 }
 0xafd   :  { %v2676_v47 = vmul.f32 %v4071_v50, %v4067_v29  ;;  %v6144_v29 = vld [vmem:[#allocation6 + $0x1b0] sm:$0xff]  ;;  %v6150_v50 = vld [vmem:[#allocation6 + $0x198] sm:$0xff] }
 0xafe   :  { %v4073_v10 = vpop.eup %4072 }
 0xaff   :  { %v2675_v24 = vmul.f32 %v4073_v10, %v6028_v23  ;;  %v6123_v23 = vld [vmem:[#allocation6 + $0x1c8] sm:$0xff] }
 0xb00   :  { %v4075_v11 = vpop.eup %4074 }
 0xb01   :  { %v6110_v40 = vadd.f32 %v2676_v47, %v2675_v24 }
 0xb03   :  { %4076 = vtanh.f32 %v6110_v40 }
 0xb10   :  { %v4077_v17 = vpop.eup %4076 }
 0xb11   :  { %v6113_v7 = vmul.f32 %v4077_v17, %v4075_v11 }
 0xb13   :  { %7264 = vst [vmem:[#allocation17_spill] sm:$0xff] %v6113_v7  ;;  %2745 = vmatmul.mubr.f32.vlgmr.msra.gmra.mxu0 %v6113_v7  ;;  %2816 = vmatmul.mubr.f32.vlgmr.msra.gmra.mxu1 %v6113_v7  ;;  %v6368_v7 = vld [vmem:[#allocation6 + $0x38] sm:$0xff] }
 0xb14   :  { %2851 = vmatpush1.msra.mxu0 %v6117_v21  ;;  %2922 = vmatpush1.msra.mxu1 %v6120_v33  ;;  %7297 = vst [vmem:[#allocation28_spill] sm:$0xff] %v6368_v7 }
 0xb15   :  { %2852 = vmatprep.subr.mxu0 %v6123_v23  ;;  %2923 = vmatprep.subr.mxu1 %v6126_v43 }
 0xb16   :  { %2853 = vmatpush1.msra.mxu0 %v6129_v15  ;;  %2924 = vmatpush1.msra.mxu1 %v6132_v16 }
 0xb17   :  { %2854 = vmatprep.subr.mxu0 %v6135_v12  ;;  %2925 = vmatprep.subr.mxu1 %v6138_v31 }
 0xb18   :  { %2855 = vmatpush1.msra.mxu0 %v6141_v0  ;;  %2926 = vmatpush1.msra.mxu1 %v6144_v29 }
 0xb19   :  { %2856 = vmatprep.subr.mxu0 %v6147_v22  ;;  %2927 = vmatprep.subr.mxu1 %v6150_v50 }
 0xb1a   :  { %2857 = vmatpush1.msra.mxu0 %v5638_v59  ;;  %2928 = vmatpush1.msra.mxu1 %v5641_v60  ;;  %v7265_v59 = vld [vmem:[#allocation40_spill] sm:$0xff] }
 0xb1b   :  { %2858 = vmatprep.subr.mxu0 %v5644_v61  ;;  %2929 = vmatprep.subr.mxu1 %v5647_v62  ;;  %v7266_v60 = vld [vmem:[#allocation12_spill] sm:$0xff]  ;;  %v7267_v61 = vld [vmem:[#allocation15_spill] sm:$0xff] }
 0xb1c   :  { %2859 = vmatpush1.msra.mxu0 %v5650_v63  ;;  %2930 = vmatpush1.msra.mxu1 %v5653_v1  ;;  %v7268_v62 = vld [vmem:[#allocation56_spill] sm:$0xff]  ;;  %v7269_v63 = vld [vmem:[#allocation57_spill] sm:$0xff]  ;;  %v7270_v1 = vld [vmem:[#allocation43_spill] sm:$0xff] }
 0xb1d   :  { %2860 = vmatprep.subr.mxu0 %v5656_v2  ;;  %2931 = vmatprep.subr.mxu1 %v5659_v3  ;;  %v7271_v2 = vld [vmem:[#allocation16_spill] sm:$0xff]  ;;  %v7272_v3 = vld [vmem:[#allocation42_spill] sm:$0xff] }
 0xb1e   :  { %2861 = vmatpush1.msra.mxu0 %v5662_v4  ;;  %2932 = vmatpush1.msra.mxu1 %v5665_v5  ;;  %v7273_v4 = vmov 0.0   ;;  %v7274_v5 = vld [vmem:[#allocation49_spill] sm:$0xff] }
 0xb1f   :  { %2862 = vmatprep.subr.mxu0 %v5668_v6  ;;  %2933 = vmatprep.subr.mxu1 %v5671_v8  ;;  %v6205_v6 = vld [vmem:[#allocation6 + $0x1e8] sm:$0xff]  ;;  %v6208_v8 = vld [vmem:[#allocation6 + $0x1f8] sm:$0xff] }
 0xb20   :  { %2863 = vmatpush1.msra.mxu0 %v5674_v9  ;;  %2934 = vmatpush1.msra.mxu1 %v5677_v14  ;;  %7275 = vst [vmem:[#allocation33_spill] sm:$0xff] %v6205_v6  ;;  %7276 = vst [vmem:[#allocation34_spill] sm:$0xff] %v6208_v8  ;;  %v7277_v9 = vld [vmem:[#allocation31_spill] sm:$0xff]  ;;  %v7278_v14 = vld [vmem:[#allocation29_spill] sm:$0xff] }
 0xb21   :  { %2864 = vmatprep.subr.mxu0 %v5680_v18  ;;  %2935 = vmatprep.subr.mxu1 %v5683_v20  ;;  %v2029_v18 = vadd.f32 %v7278_v14, %v7277_v9  ;;  %v6269_v14 = vld [vmem:[#allocation6 + $0x128] sm:$0xff] }
 0xb22   :  { %2865 = vmatpush1.msra.mxu0 %v5686_v48  ;;  %2936 = vmatpush1.msra.mxu1 %v5689_v44  ;;  %v7279_v48 = vld [vmem:[#allocation19_spill] sm:$0xff] }
 0xb23   :  { %2866 = vmatprep.subr.mxu0 %v5692_v34  ;;  %2937 = vmatprep.subr.mxu1 %v5695_v49  ;;  %v2031_v44 = vadd.f32 %v7279_v48, %v5926_v27  ;;  %v6278_v48 = vld [vmem:[#allocation6 + $0x130] sm:$0xff] }
 0xb24   :  { %2867 = vmatpush1.msra.mxu0 %v5698_v42  ;;  %2938 = vmatpush1.msra.mxu1 %v5701_v56 }
 0xb25   :  { %2868 = vmatprep.subr.mxu0 %v5704_v46  ;;  %2939 = vmatprep.subr.mxu1 %v5707_v38 }
 0xb26   :  { %2869 = vmatpush1.msra.mxu0 %v5710_v53  ;;  %2940 = vmatpush1.msra.mxu1 %v5713_v32  ;;  %v7280_v32 = vld [vmem:[#allocation14_spill] sm:$0xff] }
 0xb27   :  { %2870 = vmatprep.subr.mxu0 %v5716_v37  ;;  %2941 = vmatprep.subr.mxu1 %v5719_v28  ;;  %v2144_v37 = vadd.f32 %v7280_v32, %v7231_v19  ;;  %v6305_v32 = vld [vmem:[#allocation6 + $0xc8] sm:$0xff] }
 0xb28   :  { %2871 = vmatpush1.msra.mxu0 %v5722_v52  ;;  %2942 = vmatpush1.msra.mxu1 %v7235_v57  ;;  %v7281_v52 = vld [vmem:[#allocation24_spill] sm:$0xff] }
 0xb29   :  { %2872 = vmatprep.subr.mxu0 %v7236_v41  ;;  %2943 = vmatprep.subr.mxu1 %v7237_v30  ;;  %v2142_v57 = vadd.f32 %v7281_v52, %v5943_v55  ;;  %v6314_v52 = vld [vmem:[#allocation6 + $0xd0] sm:$0xff] }
 0xb2a   :  { %2873 = vmatpush1.msra.mxu0 %v7238_v45  ;;  %2944 = vmatpush1.msra.mxu1 %v7239_v13 }
 0xb2b   :  { %2874 = vmatprep.subr.mxu0 %v7240_v26  ;;  %2945 = vmatprep.subr.mxu1 %v7241_v36 }
 0xb2c   :  { %2875 = vmatpush1.msra.mxu0 %v7242_v54  ;;  %2946 = vmatpush1.msra.mxu1 %v7243_v39 }
 0xb2d   :  { %2876 = vmatprep.subr.mxu0 %v7244_v35  ;;  %2947 = vmatprep.subr.mxu1 %v7245_v51 }
 0xb2e   :  { %2877 = vmatpush1.msra.mxu0 %v7246_v58  ;;  %2948 = vmatpush1.msra.mxu1 %v7265_v59  ;;  %v6242_v59 = vld [vmem:[#allocation6 + $0x190] sm:$0xff] }
 0xb2f   :  { %2878 = vmatprep.subr.mxu0 %v7266_v60  ;;  %2949 = vmatprep.subr.mxu1 %v7267_v61  ;;  %v6245_v60 = vld [vmem:[#allocation6 + $0x168] sm:$0xff]  ;;  %v6248_v61 = vld [vmem:[#allocation6 + $0x178] sm:$0xff] }
 0xb30   :  { %2879 = vmatpush1.msra.mxu0 %v7268_v62  ;;  %2950 = vmatpush1.msra.mxu1 %v7269_v63  ;;  %v6251_v62 = vld [vmem:[#allocation6 + $0x160] sm:$0xff]  ;;  %v6254_v63 = vld [vmem:[#allocation6 + $0x170] sm:$0xff] }
 0xb31   :  { %2880 = vmatprep.subr.mxu0 %v7270_v1  ;;  %2951 = vmatprep.subr.mxu1 %v7271_v2  ;;  %v6257_v1 = vld [vmem:[#allocation6 + $0x148] sm:$0xff]  ;;  %v6260_v2 = vld [vmem:[#allocation6 + $0x158] sm:$0xff] }
 0xb32   :  { %2881 = vmatpush1.msra.mxu0 %v7272_v3  ;;  %2914 = vmatprep.mubr.f32.mxu0 %v7273_v4  ;;  %v6263_v3 = vld [vmem:[#allocation6 + $0x140] sm:$0xff] }
 0xb33   :  { %2952 = vmatpush1.msra.mxu1 %v7274_v5  ;;  %2985 = vmatprep.mubr.f32.mxu1 %v7273_v4  ;;  %v6266_v5 = vld [vmem:[#allocation6 + $0x150] sm:$0xff] }
 0xb34   :  { %3020 = vmatprep.subr.mxu0 %v6205_v6  ;;  %3091 = vmatprep.subr.mxu1 %v6208_v8 }
 0xbd3   :  { %v2746_v20 = vpop.f32.mrf.mxu0  ;;  %v2817_v46 = vpop.f32.mrf.mxu1 }
 0xbd4   :  { %v2822_v34 = vadd.f32 %v2746_v20, %v2029_v18  ;;  %v2824_v41 = vadd.f32 %v2817_v46, %v2142_v57  ;;  %v6272_v18 = vld [vmem:[#allocation6 + $0x138] sm:$0xff]  ;;  %v6275_v20 = vld [vmem:[#allocation6 + $0x120] sm:$0xff]  ;;  %v6317_v57 = vld [vmem:[#allocation6 + $0xa8] sm:$0xff] }
 0xbd5   :  { %v2748_v49 = vpop.f32.mrf.mxu0  ;;  %v2819_v53 = vpop.f32.mrf.mxu1  ;;  %v6296_v46 = vld [vmem:[#allocation6 + $0xf8] sm:$0xff] }
 0xbd6   :  { %v3812_v42 = vmul.f32 -1.442695, %v2822_v34  ;;  %v2823_v56 = vadd.f32 %v2748_v49, %v2031_v44  ;;  %v2825_v28 = vadd.f32 %v2819_v53, %v2144_v37  ;;  %v6281_v44 = vld [vmem:[#allocation6 + $0x108] sm:$0xff]  ;;  %v6284_v34 = vld [vmem:[#allocation6 + $0x118] sm:$0xff]  ;;  %v6287_v49 = vld [vmem:[#allocation6 + $0x100] sm:$0xff] }
 0xbd7   :  { %v6302_v53 = vld [vmem:[#allocation6 + $0xf0] sm:$0xff]  ;;  %v6308_v37 = vld [vmem:[#allocation6 + $0xd8] sm:$0xff] }
 0xbd8   :  { %4078 = vpow2.f32 %v3812_v42  ;;  %v3813_v38 = vmul.f32 -1.442695, %v2823_v56  ;;  %v3814_v30 = vmul.f32 -1.442695, %v2825_v28  ;;  %v6290_v42 = vld [vmem:[#allocation6 + $0x110] sm:$0xff]  ;;  %v6293_v56 = vld [vmem:[#allocation6 + $0xe8] sm:$0xff] }
 0xbd9   :  { %v6311_v28 = vld [vmem:[#allocation6 + $0xc0] sm:$0xff] }
 0xbda   :  { %4080 = vpow2.f32 %v3813_v38  ;;  %v6299_v38 = vld [vmem:[#allocation6 + $0xe0] sm:$0xff] }
 0xbdb   :  { %4082 = vtanh.f32 %v2824_v41  ;;  %v6320_v41 = vld [vmem:[#allocation6 + $0xb8] sm:$0xff] }
 0xbdc   :  { %4084 = vpow2.f32 %v3814_v30  ;;  %v6323_v30 = vld [vmem:[#allocation6 + $0xa0] sm:$0xff] }
 0xbe5   :  { %v4079_v45 = vpop.eup %4078 }
 0xbe6   :  { %v2829_v13 = vadd.f32 1.0, %v4079_v45  ;;  %v6326_v45 = vld [vmem:[#allocation6 + $0xb0] sm:$0xff] }
 0xbe7   :  { %v4081_v26 = vpop.eup %4080  ;;  %7283 = vst [vmem:[#allocation22_spill] sm:$0xff] %v6326_v45 }
 0xbe8   :  { %4086 = vrcp.f32 %v2829_v13  ;;  %v2835_v36 = vadd.f32 1.0, %v4081_v26  ;;  %v4083_v54 = vpop.eup %4082  ;;  %v6329_v13 = vld [vmem:[#allocation6 + $0x88] sm:$0xff]  ;;  %v6332_v26 = vld [vmem:[#allocation6 + $0x98] sm:$0xff] }
 0xbe9   :  { %v4085_v39 = vpop.eup %4084  ;;  %7284 = vst [vmem:[#allocation50_spill] sm:$0xff] %v6329_v13  ;;  %7285 = vst [vmem:[#allocation51_spill] sm:$0xff] %v6332_v26 }
 0xbea   :  { %4088 = vrcp.f32 %v2835_v36  ;;  %v2842_v47 = vadd.f32 1.0, %v4085_v39  ;;  %v6335_v36 = vld [vmem:[#allocation6 + $0x80] sm:$0xff]  ;;  %v6341_v39 = vld [vmem:[#allocation6 + $0x68] sm:$0xff] }
 0xbeb   :  { %7286 = vst [vmem:[#allocation37_spill] sm:$0xff] %v6335_v36  ;;  %7288 = vst [vmem:[#allocation52_spill] sm:$0xff] %v6341_v39 }
 0xbec   :  { %4090 = vrcp.f32 %v2842_v47  ;;  %v6353_v47 = vld [vmem:[#allocation6 + $0x48] sm:$0xff] }
 0xbed   :  { %7292 = vst [vmem:[#allocation54_spill] sm:$0xff] %v6353_v47 }
 0xbf5   :  { %v4087_v35 = vpop.eup %4086 }
 0xbf6   :  { %v2846_v51 = vmul.f32 %v4087_v35, %v4083_v54  ;;  %v6338_v54 = vld [vmem:[#allocation6 + $0x90] sm:$0xff]  ;;  %v6344_v35 = vld [vmem:[#allocation6 + $0x78] sm:$0xff] }
 0xbf7   :  { %v4089_v58 = vpop.eup %4088  ;;  %7287 = vst [vmem:[#allocation36_spill] sm:$0xff] %v6338_v54  ;;  %7289 = vst [vmem:[#allocation53_spill] sm:$0xff] %v6344_v35 }
 0xbf8   :  { %v2845_v10 = vmul.f32 %v4089_v58, %v6110_v40  ;;  %v6239_v40 = vld [vmem:[#allocation6 + $0x180] sm:$0xff]  ;;  %v6350_v58 = vld [vmem:[#allocation6 + $0x70] sm:$0xff] }
 0xbf9   :  { %v4091_v24 = vpop.eup %4090  ;;  %7291 = vst [vmem:[#allocation38_spill] sm:$0xff] %v6350_v58 }
 0xbfa   :  { %v6220_v25 = vadd.f32 %v2846_v51, %v2845_v10  ;;  %v6347_v51 = vld [vmem:[#allocation6 + $0x60] sm:$0xff]  ;;  %v6356_v10 = vld [vmem:[#allocation6 + $0x58] sm:$0xff] }
 0xbfb   :  { %7290 = vst [vmem:[#allocation39_spill] sm:$0xff] %v6347_v51  ;;  %7293 = vst [vmem:[#allocation55_spill] sm:$0xff] %v6356_v10 }
 0xbfc   :  { %4092 = vtanh.f32 %v6220_v25 }
 0xc09   :  { %v4093_v11 = vpop.eup %4092 }
 0xc0a   :  { %v6223_v17 = vmul.f32 %v4093_v11, %v4091_v24  ;;  %v6359_v24 = vld [vmem:[#allocation6 + $0x40] sm:$0xff]  ;;  %v6362_v11 = vld [vmem:[#allocation6 + $0x50] sm:$0xff] }
 0xc0b   :  { %7294 = vst [vmem:[#allocation41_spill] sm:$0xff] %v6359_v24  ;;  %7295 = vst [vmem:[#allocation21_spill] sm:$0xff] %v6362_v11 }
 0xc0c   :  { %7282 = vst [vmem:[#allocation35_spill] sm:$0xff] %v6223_v17  ;;  %2915 = vmatmul.mubr.f32.vlgmr.msra.gmra.mxu0 %v6223_v17  ;;  %2986 = vmatmul.mubr.f32.vlgmr.msra.gmra.mxu1 %v6223_v17  ;;  %v6365_v17 = vld [vmem:[#allocation6 + $0x28] sm:$0xff] }
 0xc0d   :  { %3021 = vmatpush1.msra.mxu0 %v6117_v21  ;;  %3092 = vmatpush1.msra.mxu1 %v6120_v33  ;;  %7296 = vst [vmem:[#allocation32_spill] sm:$0xff] %v6365_v17 }
 0xc0e   :  { %3022 = vmatprep.subr.mxu0 %v6123_v23  ;;  %3093 = vmatprep.subr.mxu1 %v6126_v43 }
 0xc0f   :  { %3023 = vmatpush1.msra.mxu0 %v6129_v15  ;;  %3094 = vmatpush1.msra.mxu1 %v6132_v16 }
 0xc10   :  { %3024 = vmatprep.subr.mxu0 %v6135_v12  ;;  %3095 = vmatprep.subr.mxu1 %v6138_v31 }
 0xc11   :  { %3025 = vmatpush1.msra.mxu0 %v6141_v0  ;;  %3096 = vmatpush1.msra.mxu1 %v6144_v29 }
 0xc12   :  { %3026 = vmatprep.subr.mxu0 %v6147_v22  ;;  %3097 = vmatprep.subr.mxu1 %v6150_v50 }
 0xc13   :  { %3027 = vmatpush1.msra.mxu0 %v6239_v40  ;;  %3098 = vmatpush1.msra.mxu1 %v6242_v59 }
 0xc14   :  { %3028 = vmatprep.subr.mxu0 %v6245_v60  ;;  %3099 = vmatprep.subr.mxu1 %v6248_v61 }
 0xc15   :  { %3029 = vmatpush1.msra.mxu0 %v6251_v62  ;;  %3100 = vmatpush1.msra.mxu1 %v6254_v63 }
 0xc16   :  { %3030 = vmatprep.subr.mxu0 %v6257_v1  ;;  %3101 = vmatprep.subr.mxu1 %v6260_v2 }
 0xc17   :  { %3031 = vmatpush1.msra.mxu0 %v6263_v3  ;;  %3102 = vmatpush1.msra.mxu1 %v6266_v5 }
 0xc18   :  { %3032 = vmatprep.subr.mxu0 %v6269_v14  ;;  %3103 = vmatprep.subr.mxu1 %v6272_v18 }
 0xc19   :  { %3033 = vmatpush1.msra.mxu0 %v6275_v20  ;;  %3104 = vmatpush1.msra.mxu1 %v6278_v48 }
 0xc1a   :  { %3034 = vmatprep.subr.mxu0 %v6281_v44  ;;  %3105 = vmatprep.subr.mxu1 %v6284_v34 }
 0xc1b   :  { %3035 = vmatpush1.msra.mxu0 %v6287_v49  ;;  %3106 = vmatpush1.msra.mxu1 %v6290_v42 }
 0xc1c   :  { %3036 = vmatprep.subr.mxu0 %v6293_v56  ;;  %3107 = vmatprep.subr.mxu1 %v6296_v46 }
 0xc1d   :  { %3037 = vmatpush1.msra.mxu0 %v6299_v38  ;;  %3108 = vmatpush1.msra.mxu1 %v6302_v53 }
 0xc1e   :  { %3038 = vmatprep.subr.mxu0 %v6305_v32  ;;  %3109 = vmatprep.subr.mxu1 %v6308_v37 }
 0xc1f   :  { %3039 = vmatpush1.msra.mxu0 %v6311_v28  ;;  %3110 = vmatpush1.msra.mxu1 %v6314_v52 }
 0xc20   :  { %3040 = vmatprep.subr.mxu0 %v6317_v57  ;;  %3111 = vmatprep.subr.mxu1 %v6320_v41 }
 0xc21   :  { %3041 = vmatpush1.msra.mxu0 %v6323_v30  ;;  %3112 = vmatpush1.msra.mxu1 %v6326_v45 }
 0xc22   :  { %3042 = vmatprep.subr.mxu0 %v6329_v13  ;;  %3113 = vmatprep.subr.mxu1 %v6332_v26  ;;  %v7307_v26 = vld [vmem:[#allocation25_spill] sm:$0xff] }
 0xc23   :  { %3043 = vmatpush1.msra.mxu0 %v6335_v36  ;;  %3114 = vmatpush1.msra.mxu1 %v6338_v54 }
 0xc24   :  { %3044 = vmatprep.subr.mxu0 %v6341_v39  ;;  %3115 = vmatprep.subr.mxu1 %v6344_v35 }
 0xc25   :  { %3045 = vmatpush1.msra.mxu0 %v6347_v51  ;;  %3116 = vmatpush1.msra.mxu1 %v6350_v58 }
 0xc26   :  { %3046 = vmatprep.subr.mxu0 %v6353_v47  ;;  %3117 = vmatprep.subr.mxu1 %v6356_v10  ;;  %v6371_v47 = vld [vmem:[#allocation6 + $0x20] sm:$0xff]  ;;  %v6374_v10 = vld [vmem:[#allocation6 + $0x30] sm:$0xff] }
 0xc27   :  { %3047 = vmatpush1.msra.mxu0 %v6359_v24  ;;  %3118 = vmatpush1.msra.mxu1 %v6362_v11  ;;  %7298 = vst [vmem:[#allocation18_spill] sm:$0xff] %v6371_v47  ;;  %7299 = vst [vmem:[#allocation13_spill] sm:$0xff] %v6374_v10  ;;  %v6377_v24 = vld [vmem:[#allocation6 + $0x8] sm:$0xff]  ;;  %v6380_v11 = vld [vmem:[#allocation6 + $0x18] sm:$0xff] }
 0xc28   :  { %3048 = vmatprep.subr.mxu0 %v6365_v17  ;;  %3119 = vmatprep.subr.mxu1 %v6368_v7  ;;  %7300 = vst [vmem:[#allocation23_spill] sm:$0xff] %v6377_v24  ;;  %7301 = vst [vmem:[#allocation40_spill] sm:$0xff] %v6380_v11  ;;  %v6383_v17 = vld [vmem:[#allocation6] sm:$0xff]  ;;  %v6387_v7 = vld [vmem:[#allocation6 + $0x10] sm:$0xff] }
 0xc29   :  { %3049 = vmatpush1.msra.mxu0 %v6371_v47  ;;  %3120 = vmatpush1.msra.mxu1 %v6374_v10  ;;  %7302 = vst [vmem:[#allocation12_spill] sm:$0xff] %v6383_v17  ;;  %7303 = vst [vmem:[#allocation15_spill] sm:$0xff] %v6387_v7  ;;  %v7305_v47 = vld [vmem:[#allocation20_spill] sm:$0xff] }
 0xc2a   :  { %3050 = vmatprep.subr.mxu0 %v6377_v24  ;;  %3121 = vmatprep.subr.mxu1 %v6380_v11  ;;  %v7304_v24 = vld [vmem:[#allocation30_spill] sm:$0xff]  ;;  %v2037_v58 = vadd.f32 %v7305_v47, %v5926_v27 }
 0xc2b   :  { %3051 = vmatpush1.msra.mxu0 %v6383_v17  ;;  %3084 = vmatprep.mubr.f32.mxu0 %v7273_v4  ;;  %v2035_v10 = vadd.f32 %v7304_v24, %v7277_v9  ;;  %v2148_v24 = vadd.f32 %v7307_v26, %v5943_v55  ;;  %v7311_v26 = vld [vmem:[#allocation51_spill] sm:$0xff] }
 0xc2c   :  { %3122 = vmatpush1.msra.mxu1 %v6387_v7  ;;  %3155 = vmatprep.mubr.f32.mxu1 %v7273_v4 }
 0xc2d   :  { %3190 = vmatprep.subr.mxu0 %v6205_v6  ;;  %3261 = vmatprep.subr.mxu1 %v6208_v8  ;;  %v7306_v6 = vld [vmem:[#allocation58_spill] sm:$0xff] }
 0xc2e   :  { %v2150_v36 = vadd.f32 %v7306_v6, %v7231_v19 }
 0xccc   :  { %v2916_v11 = vpop.f32.mrf.mxu0  ;;  %v2987_v54 = vpop.f32.mrf.mxu1 }
 0xccd   :  { %v2992_v17 = vadd.f32 %v2916_v11, %v2035_v10  ;;  %v2994_v9 = vadd.f32 %v2987_v54, %v2148_v24  ;;  %v7312_v54 = vld [vmem:[#allocation37_spill] sm:$0xff]  ;;  %v7313_v11 = vld [vmem:[#allocation36_spill] sm:$0xff] }
 0xcce   :  { %v2918_v51 = vpop.f32.mrf.mxu0  ;;  %v2989_v4 = vpop.f32.mrf.mxu1  ;;  %v7314_v24 = vld [vmem:[#allocation52_spill] sm:$0xff] }
 0xccf   :  { %v3815_v35 = vmul.f32 -1.442695, %v2992_v17  ;;  %v2993_v39 = vadd.f32 %v2918_v51, %v2037_v58  ;;  %v2995_v8 = vadd.f32 %v2989_v4, %v2150_v36 }
 0xcd1   :  { %4094 = vpow2.f32 %v3815_v35  ;;  %v3816_v7 = vmul.f32 -1.442695, %v2993_v39  ;;  %v3817_v13 = vmul.f32 -1.442695, %v2995_v8 }
 0xcd3   :  { %4096 = vpow2.f32 %v3816_v7 }
 0xcd4   :  { %4098 = vtanh.f32 %v2994_v9 }
 0xcd5   :  { %4100 = vpow2.f32 %v3817_v13  ;;  %v7310_v13 = vld [vmem:[#allocation50_spill] sm:$0xff] }
 0xcde   :  { %v4095_v45 = vpop.eup %4094 }
 0xcdf   :  { %v2999_v47 = vadd.f32 1.0, %v4095_v45 }
 0xce0   :  { %v4097_v10 = vpop.eup %4096 }
 0xce1   :  { %4102 = vrcp.f32 %v2999_v47  ;;  %v3005_v17 = vadd.f32 1.0, %v4097_v10  ;;  %v4099_v39 = vpop.eup %4098  ;;  %v7315_v47 = vld [vmem:[#allocation53_spill] sm:$0xff]  ;;  %v7316_v10 = vld [vmem:[#allocation39_spill] sm:$0xff] }
 0xce2   :  { %v4101_v7 = vpop.eup %4100 }
 0xce3   :  { %4104 = vrcp.f32 %v3005_v17  ;;  %v3012_v6 = vadd.f32 1.0, %v4101_v7  ;;  %v7317_v17 = vld [vmem:[#allocation38_spill] sm:$0xff]  ;;  %v7319_v7 = vld [vmem:[#allocation55_spill] sm:$0xff] }
 0xce5   :  { %4106 = vrcp.f32 %v3012_v6  ;;  %v7323_v6 = vld [vmem:[#allocation28_spill] sm:$0xff] }
 0xcee   :  { %v4103_v35 = vpop.eup %4102 }
 0xcef   :  { %v3016_v51 = vmul.f32 %v4103_v35, %v4099_v39  ;;  %v7318_v39 = vld [vmem:[#allocation54_spill] sm:$0xff]  ;;  %v7320_v35 = vld [vmem:[#allocation41_spill] sm:$0xff] }
 0xcf0   :  { %v4105_v58 = vpop.eup %4104 }
 0xcf1   :  { %v3015_v4 = vmul.f32 %v4105_v58, %v6220_v25  ;;  %v7309_v25 = vld [vmem:[#allocation22_spill] sm:$0xff]  ;;  %v7322_v58 = vld [vmem:[#allocation32_spill] sm:$0xff] }
 0xcf2   :  { %v4107_v8 = vpop.eup %4106 }
 0xcf3   :  { %v6402_v36 = vadd.f32 %v3016_v51, %v3015_v4  ;;  %v7321_v51 = vld [vmem:[#allocation21_spill] sm:$0xff]  ;;  %v7324_v4 = vld [vmem:[#allocation18_spill] sm:$0xff] }
 0xcf5   :  { %4108 = vtanh.f32 %v6402_v36 }
 0xd02   :  { %v4109_v9 = vpop.eup %4108 }
 0xd03   :  { %v6405_v45 = vmul.f32 %v4109_v9, %v4107_v8  ;;  %v7325_v8 = vld [vmem:[#allocation13_spill] sm:$0xff]  ;;  %v7326_v9 = vld [vmem:[#allocation23_spill] sm:$0xff] }
 0xd05   :  { %7308 = vst [vmem:[#allocation56_spill] sm:$0xff] %v6405_v45  ;;  %3085 = vmatmul.mubr.f32.vlgmr.msra.gmra.mxu0 %v6405_v45  ;;  %3156 = vmatmul.mubr.f32.vlgmr.msra.gmra.mxu1 %v6405_v45  ;;  %v7327_v45 = vld [vmem:[#allocation40_spill] sm:$0xff] }
 0xd06   :  { %3191 = vmatpush1.msra.mxu0 %v6117_v21  ;;  %3262 = vmatpush1.msra.mxu1 %v6120_v33 }
 0xd07   :  { %3192 = vmatprep.subr.mxu0 %v6123_v23  ;;  %3263 = vmatprep.subr.mxu1 %v6126_v43 }
 0xd08   :  { %3193 = vmatpush1.msra.mxu0 %v6129_v15  ;;  %3264 = vmatpush1.msra.mxu1 %v6132_v16 }
 0xd09   :  { %3194 = vmatprep.subr.mxu0 %v6135_v12  ;;  %3265 = vmatprep.subr.mxu1 %v6138_v31 }
 0xd0a   :  { %3195 = vmatpush1.msra.mxu0 %v6141_v0  ;;  %3266 = vmatpush1.msra.mxu1 %v6144_v29 }
 0xd0b   :  { %3196 = vmatprep.subr.mxu0 %v6147_v22  ;;  %3267 = vmatprep.subr.mxu1 %v6150_v50 }
 0xd0c   :  { %3197 = vmatpush1.msra.mxu0 %v6239_v40  ;;  %3268 = vmatpush1.msra.mxu1 %v6242_v59 }
 0xd0d   :  { %3198 = vmatprep.subr.mxu0 %v6245_v60  ;;  %3269 = vmatprep.subr.mxu1 %v6248_v61 }
 0xd0e   :  { %3199 = vmatpush1.msra.mxu0 %v6251_v62  ;;  %3270 = vmatpush1.msra.mxu1 %v6254_v63 }
 0xd0f   :  { %3200 = vmatprep.subr.mxu0 %v6257_v1  ;;  %3271 = vmatprep.subr.mxu1 %v6260_v2 }
 0xd10   :  { %3201 = vmatpush1.msra.mxu0 %v6263_v3  ;;  %3272 = vmatpush1.msra.mxu1 %v6266_v5 }
 0xd11   :  { %3202 = vmatprep.subr.mxu0 %v6269_v14  ;;  %3273 = vmatprep.subr.mxu1 %v6272_v18 }
 0xd12   :  { %3203 = vmatpush1.msra.mxu0 %v6275_v20  ;;  %3274 = vmatpush1.msra.mxu1 %v6278_v48 }
 0xd13   :  { %3204 = vmatprep.subr.mxu0 %v6281_v44  ;;  %3275 = vmatprep.subr.mxu1 %v6284_v34 }
 0xd14   :  { %3205 = vmatpush1.msra.mxu0 %v6287_v49  ;;  %3276 = vmatpush1.msra.mxu1 %v6290_v42 }
 0xd15   :  { %3206 = vmatprep.subr.mxu0 %v6293_v56  ;;  %3277 = vmatprep.subr.mxu1 %v6296_v46 }
 0xd16   :  { %3207 = vmatpush1.msra.mxu0 %v6299_v38  ;;  %3278 = vmatpush1.msra.mxu1 %v6302_v53 }
 0xd17   :  { %3208 = vmatprep.subr.mxu0 %v6305_v32  ;;  %3279 = vmatprep.subr.mxu1 %v6308_v37 }
 0xd18   :  { %3209 = vmatpush1.msra.mxu0 %v6311_v28  ;;  %3280 = vmatpush1.msra.mxu1 %v6314_v52 }
 0xd19   :  { %3210 = vmatprep.subr.mxu0 %v6317_v57  ;;  %3281 = vmatprep.subr.mxu1 %v6320_v41 }
 0xd1a   :  { %3211 = vmatpush1.msra.mxu0 %v6323_v30  ;;  %3282 = vmatpush1.msra.mxu1 %v7309_v25 }
 0xd1b   :  { %3212 = vmatprep.subr.mxu0 %v7310_v13  ;;  %3283 = vmatprep.subr.mxu1 %v7311_v26  ;;  %v7337_v26 = vld [vmem:[#allocation45_spill] sm:$0xff] }
 0xd1c   :  { %3213 = vmatpush1.msra.mxu0 %v7312_v54  ;;  %3284 = vmatpush1.msra.mxu1 %v7313_v11 }
 0xd1d   :  { %3214 = vmatprep.subr.mxu0 %v7314_v24  ;;  %3285 = vmatprep.subr.mxu1 %v7315_v47 }
 0xd1e   :  { %3215 = vmatpush1.msra.mxu0 %v7316_v10  ;;  %3286 = vmatpush1.msra.mxu1 %v7317_v17  ;;  %v7328_v17 = vld [vmem:[#allocation12_spill] sm:$0xff] }
 0xd1f   :  { %3216 = vmatprep.subr.mxu0 %v7318_v39  ;;  %3287 = vmatprep.subr.mxu1 %v7319_v7  ;;  %v7329_v39 = vmov 0.0   ;;  %v7330_v7 = vld [vmem:[#allocation15_spill] sm:$0xff] }
 0xd20   :  { %3217 = vmatpush1.msra.mxu0 %v7320_v35  ;;  %3288 = vmatpush1.msra.mxu1 %v7321_v51  ;;  %v7331_v51 = vld [vmem:[#allocation33_spill] sm:$0xff] }
 0xd21   :  { %3218 = vmatprep.subr.mxu0 %v7322_v58  ;;  %3289 = vmatprep.subr.mxu1 %v7323_v6  ;;  %v7332_v58 = vld [vmem:[#allocation34_spill] sm:$0xff]  ;;  %v7333_v6 = vld [vmem:[#allocation31_spill] sm:$0xff] }
 0xd22   :  { %3219 = vmatpush1.msra.mxu0 %v7324_v4  ;;  %3290 = vmatpush1.msra.mxu1 %v7325_v8  ;;  %v7334_v4 = vld [vmem:[#allocation59_spill] sm:$0xff] }
 0xd23   :  { %3220 = vmatprep.subr.mxu0 %v7326_v9  ;;  %3291 = vmatprep.subr.mxu1 %v7327_v45  ;;  %v2041_v35 = vadd.f32 %v7334_v4, %v7333_v6  ;;  %v7335_v9 = vld [vmem:[#allocation44_spill] sm:$0xff]  ;;  %v2154_v4 = vadd.f32 %v7337_v26, %v5943_v55 }
 0xd24   :  { %3221 = vmatpush1.msra.mxu0 %v7328_v17  ;;  %3254 = vmatprep.mubr.f32.mxu0 %v7329_v39  ;;  %v2043_v10 = vadd.f32 %v7335_v9, %v5926_v27 }
 0xd25   :  { %3292 = vmatpush1.msra.mxu1 %v7330_v7  ;;  %3325 = vmatprep.mubr.f32.mxu1 %v7329_v39 }
 0xd26   :  { %3360 = vmatprep.subr.mxu0 %v7331_v51  ;;  %3431 = vmatprep.subr.mxu1 %v7332_v58  ;;  %v7336_v51 = vld [vmem:[#allocation61_spill] sm:$0xff] }
 0xd27   :  { %v2156_v54 = vadd.f32 %v7336_v51, %v7231_v19 }
 0xdc5   :  { %v3086_v8 = vpop.f32.mrf.mxu0  ;;  %v3157_v11 = vpop.f32.mrf.mxu1 }
 0xdc6   :  { %v3162_v45 = vadd.f32 %v3086_v8, %v2041_v35  ;;  %v3164_v6 = vadd.f32 %v3157_v11, %v2154_v4 }
 0xdc7   :  { %v3088_v47 = vpop.f32.mrf.mxu0  ;;  %v3159_v39 = vpop.f32.mrf.mxu1 }
 0xdc8   :  { %v3818_v17 = vmul.f32 -1.442695, %v3162_v45  ;;  %v3163_v24 = vadd.f32 %v3088_v47, %v2043_v10  ;;  %v3165_v58 = vadd.f32 %v3159_v39, %v2156_v54 }
 0xdca   :  { %4110 = vpow2.f32 %v3818_v17  ;;  %v3819_v7 = vmul.f32 -1.442695, %v3163_v24  ;;  %v3820_v13 = vmul.f32 -1.442695, %v3165_v58 }
 0xdcc   :  { %4112 = vpow2.f32 %v3819_v7 }
 0xdcd   :  { %4114 = vtanh.f32 %v3164_v6 }
 0xdce   :  { %4116 = vpow2.f32 %v3820_v13 }
 0xdd7   :  { %v4111_v25 = vpop.eup %4110 }
 0xdd8   :  { %v3169_v9 = vadd.f32 1.0, %v4111_v25 }
 0xdd9   :  { %v4113_v35 = vpop.eup %4112 }
 0xdda   :  { %4118 = vrcp.f32 %v3169_v9  ;;  %v3175_v45 = vadd.f32 1.0, %v4113_v35  ;;  %v4115_v24 = vpop.eup %4114 }
 0xddb   :  { %v4117_v47 = vpop.eup %4116 }
 0xddc   :  { %4120 = vrcp.f32 %v3175_v45  ;;  %v3182_v8 = vadd.f32 1.0, %v4117_v47 }
 0xdde   :  { %4122 = vrcp.f32 %v3182_v8 }
 0xde7   :  { %v4119_v10 = vpop.eup %4118 }
 0xde8   :  { %v3186_v17 = vmul.f32 %v4119_v10, %v4115_v24 }
 0xde9   :  { %v4121_v7 = vpop.eup %4120 }
 0xdea   :  { %v3185_v54 = vmul.f32 %v4121_v7, %v6402_v36 }
 0xdeb   :  { %v4123_v25 = vpop.eup %4122 }
 0xdec   :  { %v6484_v39 = vadd.f32 %v3186_v17, %v3185_v54 }
 0xdee   :  { %4124 = vtanh.f32 %v6484_v39 }
 0xdfb   :  { %v4125_v26 = vpop.eup %4124 }
 0xdfc   :  { %v6487_v11 = vmul.f32 %v4125_v26, %v4123_v25  ;;  %v3544_v26 = vld [vmem:[%s6718_s7 + $0x70] sm:$0xff] }
 0xdfe   :  { %3255 = vmatmul.mubr.f32.vlgmr.msra.gmra.mxu0 %v6487_v11  ;;  %3326 = vmatmul.mubr.f32.vlgmr.msra.gmra.mxu1 %v6487_v11 }
 0xdff   :  { %3361 = vmatpush1.msra.mxu0 %v6117_v21  ;;  %3432 = vmatpush1.msra.mxu1 %v6120_v33  ;;  %v7338_v21 = vld [vmem:[#allocation22_spill] sm:$0xff] }
 0xe00   :  { %3362 = vmatprep.subr.mxu0 %v6123_v23  ;;  %3433 = vmatprep.subr.mxu1 %v6126_v43  ;;  %v7339_v33 = vld [vmem:[#allocation50_spill] sm:$0xff]  ;;  %v7340_v23 = vld [vmem:[#allocation51_spill] sm:$0xff]  ;;  %v7341_v43 = vld [vmem:[#allocation37_spill] sm:$0xff] }
 0xe01   :  { %3363 = vmatpush1.msra.mxu0 %v6129_v15  ;;  %3434 = vmatpush1.msra.mxu1 %v6132_v16  ;;  %v7342_v15 = vld [vmem:[#allocation36_spill] sm:$0xff] }
 0xe02   :  { %3364 = vmatprep.subr.mxu0 %v6135_v12  ;;  %3435 = vmatprep.subr.mxu1 %v6138_v31  ;;  %v7343_v16 = vld [vmem:[#allocation52_spill] sm:$0xff]  ;;  %v7344_v12 = vld [vmem:[#allocation53_spill] sm:$0xff]  ;;  %v7345_v31 = vld [vmem:[#allocation39_spill] sm:$0xff] }
 0xe03   :  { %3365 = vmatpush1.msra.mxu0 %v6141_v0  ;;  %3436 = vmatpush1.msra.mxu1 %v6144_v29  ;;  %v7346_v0 = vld [vmem:[#allocation38_spill] sm:$0xff] }
 0xe04   :  { %3366 = vmatprep.subr.mxu0 %v6147_v22  ;;  %3437 = vmatprep.subr.mxu1 %v6150_v50  ;;  %v7347_v29 = vld [vmem:[#allocation54_spill] sm:$0xff]  ;;  %v7348_v22 = vld [vmem:[#allocation55_spill] sm:$0xff]  ;;  %v7349_v50 = vld [vmem:[#allocation41_spill] sm:$0xff] }
 0xe05   :  { %3367 = vmatpush1.msra.mxu0 %v6239_v40  ;;  %3438 = vmatpush1.msra.mxu1 %v6242_v59  ;;  %v7350_v40 = vld [vmem:[#allocation21_spill] sm:$0xff]  ;;  %v7351_v59 = vld [vmem:[#allocation32_spill] sm:$0xff] }
 0xe06   :  { %3368 = vmatprep.subr.mxu0 %v6245_v60  ;;  %3439 = vmatprep.subr.mxu1 %v6248_v61  ;;  %v7352_v60 = vld [vmem:[#allocation28_spill] sm:$0xff]  ;;  %v7353_v61 = vld [vmem:[#allocation18_spill] sm:$0xff] }
 0xe07   :  { %3369 = vmatpush1.msra.mxu0 %v6251_v62  ;;  %3440 = vmatpush1.msra.mxu1 %v6254_v63  ;;  %v7354_v62 = vld [vmem:[#allocation13_spill] sm:$0xff]  ;;  %v7355_v63 = vld [vmem:[#allocation23_spill] sm:$0xff] }
 0xe08   :  { %3370 = vmatprep.subr.mxu0 %v6257_v1  ;;  %3441 = vmatprep.subr.mxu1 %v6260_v2  ;;  %v7356_v1 = vld [vmem:[#allocation40_spill] sm:$0xff] }
 0xe09   :  { %3371 = vmatpush1.msra.mxu0 %v6263_v3  ;;  %3442 = vmatpush1.msra.mxu1 %v6266_v5  ;;  %v7357_v2 = vld [vmem:[#allocation12_spill] sm:$0xff]  ;;  %v7358_v3 = vmov 0.0   ;;  %v7359_v5 = vld [vmem:[#allocation15_spill] sm:$0xff] }
 0xe0a   :  { %3372 = vmatprep.subr.mxu0 %v6269_v14  ;;  %3443 = vmatprep.subr.mxu1 %v6272_v18  ;;  %v3545_v14 = vld [vmem:[%s6718_s7 + $0x78] sm:$0xff]  ;;  %v7360_v18 = vld [vmem:[#allocation31_spill] sm:$0xff] }
 0xe0b   :  { %3373 = vmatpush1.msra.mxu0 %v6275_v20  ;;  %3444 = vmatpush1.msra.mxu1 %v6278_v48  ;;  %v7361_v20 = vld [vmem:[#allocation11_spill] sm:$0xff] }
 0xe0c   :  { %3374 = vmatprep.subr.mxu0 %v6281_v44  ;;  %3445 = vmatprep.subr.mxu1 %v6284_v34  ;;  %v2047_v48 = vadd.f32 %v7361_v20, %v7360_v18  ;;  %v7362_v34 = vld [vmem:[#allocation26_spill] sm:$0xff] }
 0xe0d   :  { %3375 = vmatpush1.msra.mxu0 %v6287_v49  ;;  %3446 = vmatpush1.msra.mxu1 %v6290_v42  ;;  %v2049_v49 = vadd.f32 %v7362_v34, %v5926_v27 }
 0xe0e   :  { %3376 = vmatprep.subr.mxu0 %v6293_v56  ;;  %3447 = vmatprep.subr.mxu1 %v6296_v46 }
 0xe0f   :  { %3377 = vmatpush1.msra.mxu0 %v6299_v38  ;;  %3448 = vmatpush1.msra.mxu1 %v6302_v53 }
 0xe10   :  { %3378 = vmatprep.subr.mxu0 %v6305_v32  ;;  %3449 = vmatprep.subr.mxu1 %v6308_v37 }
 0xe11   :  { %3379 = vmatpush1.msra.mxu0 %v6311_v28  ;;  %3450 = vmatpush1.msra.mxu1 %v6314_v52  ;;  %v7363_v28 = vld [vmem:[#allocation47_spill] sm:$0xff] }
 0xe12   :  { %3380 = vmatprep.subr.mxu0 %v6317_v57  ;;  %3451 = vmatprep.subr.mxu1 %v6320_v41  ;;  %v2162_v52 = vadd.f32 %v7363_v28, %v7231_v19  ;;  %v7364_v41 = vld [vmem:[#allocation9_spill] sm:$0xff] }
 0xe13   :  { %3381 = vmatpush1.msra.mxu0 %v6323_v30  ;;  %3452 = vmatpush1.msra.mxu1 %v7338_v21  ;;  %v2160_v30 = vadd.f32 %v7364_v41, %v5943_v55  ;;  %v7365_v21 = vld [vmem:[#allocation62_spill] sm:$0xff]  ;;  %v7374_v41 = vlaneseq }
 0xe14   :  { %3382 = vmatprep.subr.mxu0 %v7339_v33  ;;  %3453 = vmatprep.subr.mxu1 %v7340_v23  ;;  %v3542_v33 = vld [vmem:[%s6718_s7 + $0x60] sm:$0xff]  ;;  %v3541_v23 = vld [vmem:[%s6718_s7 + $0x58] sm:$0xff] }
 0xe15   :  { %3383 = vmatpush1.msra.mxu0 %v7341_v43  ;;  %3454 = vmatpush1.msra.mxu1 %v7342_v15  ;;  %v3540_v43 = vld [vmem:[%s6718_s7 + $0x50] sm:$0xff]  ;;  %v3539_v15 = vld [vmem:[%s6718_s7 + $0x48] sm:$0xff] }
 0xe16   :  { %3384 = vmatprep.subr.mxu0 %v7343_v16  ;;  %3455 = vmatprep.subr.mxu1 %v7344_v12  ;;  %v3538_v16 = vld [vmem:[%s6718_s7 + $0x40] sm:$0xff]  ;;  %v3537_v12 = vld [vmem:[%s6718_s7 + $0x38] sm:$0xff] }
 0xe17   :  { %3385 = vmatpush1.msra.mxu0 %v7345_v31  ;;  %3456 = vmatpush1.msra.mxu1 %v7346_v0  ;;  %v3536_v31 = vld [vmem:[%s6718_s7 + $0x30] sm:$0xff]  ;;  %v3535_v0 = vld [vmem:[%s6718_s7 + $0x28] sm:$0xff] }
 0xe18   :  { %3386 = vmatprep.subr.mxu0 %v7347_v29  ;;  %3457 = vmatprep.subr.mxu1 %v7348_v22  ;;  %v3534_v29 = vld [vmem:[%s6718_s7 + $0x20] sm:$0xff]  ;;  %v3533_v22 = vld [vmem:[%s6718_s7 + $0x18] sm:$0xff] }
 0xe19   :  { %3387 = vmatpush1.msra.mxu0 %v7349_v50  ;;  %3458 = vmatpush1.msra.mxu1 %v7350_v40  ;;  %v3532_v50 = vld [vmem:[%s6718_s7 + $0x10] sm:$0xff]  ;;  %v3531_v40 = vld [vmem:[%s6718_s7 + $0x8] sm:$0xff] }
 0xe1a   :  { %3388 = vmatprep.subr.mxu0 %v7351_v59  ;;  %3459 = vmatprep.subr.mxu1 %v7352_v60  ;;  %v3530_v59 = vld [vmem:[%s6718_s7] sm:$0xff]  ;;  %v7366_v60 = vld [vmem:[#allocation27_spill] sm:$0xff] }
 0xe1b   :  { %3389 = vmatpush1.msra.mxu0 %v7353_v61  ;;  %3460 = vmatpush1.msra.mxu1 %v7354_v62  ;;  %v7367_v61 = vld [vmem:[#allocation17_spill] sm:$0xff]  ;;  %v7368_v62 = vld [vmem:[#allocation35_spill] sm:$0xff] }
 0xe1c   :  { %3390 = vmatprep.subr.mxu0 %v7355_v63  ;;  %3461 = vmatprep.subr.mxu1 %v7356_v1  ;;  %v7369_v63 = vld [vmem:[#allocation56_spill] sm:$0xff]  ;;  %v7370_v1 = vld [vmem:[#allocation10_spill] sm:$0xff] }
 0xe1d   :  { %3391 = vmatpush1.msra.mxu0 %v7357_v2  ;;  %3424 = vmatprep.mubr.f32.mxu0 %v7358_v3  ;;  %v2053_v2 = vadd.f32 %v7370_v1, %v7360_v18 }
 0xe1e   :  { %3462 = vmatpush1.msra.mxu1 %v7359_v5  ;;  %3495 = vmatprep.mubr.f32.mxu1 %v7358_v3  ;;  %v7371_v5 = vld [vmem:[#allocation48_spill] sm:$0xff] }
 0xe1f   :  { %3852 = vmatprep.subr.mxu0 %v3545_v14 }
 0xebe   :  { %v3256_v44 = vpop.f32.mrf.mxu0  ;;  %v3327_v53 = vpop.f32.mrf.mxu1 }
 0xebf   :  { %v3332_v42 = vadd.f32 %v3256_v44, %v2047_v48  ;;  %v3334_v36 = vadd.f32 %v3327_v53, %v2160_v30  ;;  %v7373_v53 = vld [vmem:[#allocation60_spill] sm:$0xff]  ;;  %v6630_v30 = vand.u32 127, %v7374_v41 }
 0xec0   :  { %v3258_v56 = vpop.f32.mrf.mxu0  ;;  %v3329_v37 = vpop.f32.mrf.mxu1  ;;  %v2166_v18 = vadd.f32 %v7373_v53, %v5943_v55 }
 0xec1   :  { %v3821_v46 = vmul.f32 -1.442695, %v3332_v42  ;;  %v3333_v38 = vadd.f32 %v3258_v56, %v2049_v49  ;;  %v3335_v57 = vadd.f32 %v3329_v37, %v2162_v52  ;;  %vm3660_vm1 = vcmp.lt.s32.totalorder %v6630_v30, 8 }
 0xec3   :  { %4126 = vpow2.f32 %v3821_v46  ;;  %v3822_v32 = vmul.f32 -1.442695, %v3333_v38  ;;  %v3823_v13 = vmul.f32 -1.442695, %v3335_v57  ;;  %v7372_v46 = vld [vmem:[#allocation46_spill] sm:$0xff] }
 0xec5   :  { %4128 = vpow2.f32 %v3822_v32 }
 0xec6   :  { %4130 = vtanh.f32 %v3334_v36 }
 0xec7   :  { %4132 = vpow2.f32 %v3823_v13 }
 0xed0   :  { %v4127_v6 = vpop.eup %4126 }
 0xed1   :  { %v3339_v51 = vadd.f32 1.0, %v4127_v6 }
 0xed2   :  { %v4129_v58 = vpop.eup %4128 }
 0xed3   :  { %4134 = vrcp.f32 %v3339_v51  ;;  %v3345_v4 = vadd.f32 1.0, %v4129_v58  ;;  %v4131_v9 = vpop.eup %4130 }
 0xed4   :  { %v4133_v35 = vpop.eup %4132 }
 0xed5   :  { %4136 = vrcp.f32 %v3345_v4  ;;  %v3352_v10 = vadd.f32 1.0, %v4133_v35 }
 0xed7   :  { %4138 = vrcp.f32 %v3352_v10 }
 0xee0   :  { %v4135_v45 = vpop.eup %4134 }
 0xee1   :  { %v3356_v24 = vmul.f32 %v4135_v45, %v4131_v9 }
 0xee2   :  { %v4137_v47 = vpop.eup %4136 }
 0xee3   :  { %v3355_v17 = vmul.f32 %v4137_v47, %v6484_v39  ;;  %v3543_v39 = vld [vmem:[%s6718_s7 + $0x68] sm:$0xff] }
 0xee4   :  { %v4139_v8 = vpop.eup %4138 }
 0xee5   :  { %v6567_v7 = vadd.f32 %v3356_v24, %v3355_v17 }
 0xee7   :  { %4140 = vtanh.f32 %v6567_v7 }
 0xef4   :  { %v4141_v54 = vpop.eup %4140 }
 0xef5   :  { %v3359_v25 = vmul.f32 %v4141_v54, %v4139_v8 }
 0xef7   :  { %3425 = vmatmul.mubr.f32.vlgmr.msra.gmra.mxu0 %v3359_v25  ;;  %3496 = vmatmul.mubr.f32.vlgmr.msra.gmra.mxu1 %v3359_v25 }
 0xef8   :  { %3853 = vmatpush3.msra.mxu0 %v3545_v14  ;;  %3884 = vmatprep.mubr.f32.mxu0 %v7365_v21  ;;  %v2055_v14 = vadd.f32 %v7371_v5, %v5926_v27 }
 0xef9   :  { %3854 = vmatprep.subr.mxu0 %v3544_v26 }
 0xefa   :  { %3855 = vmatpush3.msra.mxu0 %v3544_v26 }
 0xefb   :  { %3856 = vmatprep.subr.mxu0 %v3543_v39 }
 0xefc   :  { %3857 = vmatpush3.msra.mxu0 %v3543_v39 }
 0xefd   :  { %3858 = vmatprep.subr.mxu0 %v3542_v33 }
 0xefe   :  { %3859 = vmatpush3.msra.mxu0 %v3542_v33 }
 0xeff   :  { %3860 = vmatprep.subr.mxu0 %v3541_v23 }
 0xf00   :  { %3861 = vmatpush3.msra.mxu0 %v3541_v23 }
 0xf01   :  { %3862 = vmatprep.subr.mxu0 %v3540_v43 }
 0xf02   :  { %3863 = vmatpush3.msra.mxu0 %v3540_v43 }
 0xf03   :  { %3864 = vmatprep.subr.mxu0 %v3539_v15 }
 0xf04   :  { %3865 = vmatpush3.msra.mxu0 %v3539_v15 }
 0xf05   :  { %3866 = vmatprep.subr.mxu0 %v3538_v16 }
 0xf06   :  { %3867 = vmatpush3.msra.mxu0 %v3538_v16 }
 0xf07   :  { %3868 = vmatprep.subr.mxu0 %v3537_v12 }
 0xf08   :  { %3869 = vmatpush3.msra.mxu0 %v3537_v12 }
 0xf09   :  { %3870 = vmatprep.subr.mxu0 %v3536_v31 }
 0xf0a   :  { %3871 = vmatpush3.msra.mxu0 %v3536_v31 }
 0xf0b   :  { %3872 = vmatprep.subr.mxu0 %v3535_v0 }
 0xf0c   :  { %3873 = vmatpush3.msra.mxu0 %v3535_v0 }
 0xf0d   :  { %3874 = vmatprep.subr.mxu0 %v3534_v29 }
 0xf0e   :  { %3875 = vmatpush3.msra.mxu0 %v3534_v29 }
 0xf0f   :  { %3876 = vmatprep.subr.mxu0 %v3533_v22 }
 0xf10   :  { %3877 = vmatpush3.msra.mxu0 %v3533_v22 }
 0xf11   :  { %3878 = vmatprep.subr.mxu0 %v3532_v50 }
 0xf12   :  { %3879 = vmatpush3.msra.mxu0 %v3532_v50 }
 0xf13   :  { %3880 = vmatprep.subr.mxu0 %v3531_v40 }
 0xf14   :  { %3881 = vmatpush3.msra.mxu0 %v3531_v40 }
 0xf15   :  { %3882 = vmatprep.subr.mxu0 %v3530_v59 }
 0xf16   :  { %3883 = vmatpush3.msra.mxu0 %v3530_v59 }
 0xf17   :  { %3885 = vmatmul.mubr.f32.vlgmr.msra.gmra.mxu0 %v7366_v60 }
 0xf18   :  { %3887 = vmatprep.mubr.f32.mxu0 %v7367_v61 }
 0xf1b   :  { %3888 = vmatmul.mubr.f32.gmra.mxu0 %v7368_v62 }
 0xf1c   :  { %3890 = vmatprep.mubr.f32.mxu0 %v7369_v63 }
 0xf1f   :  { %3891 = vmatmul.mubr.f32.gmra.mxu0 %v6487_v11  ;;  %v2168_v11 = vadd.f32 %v7372_v46, %v7231_v19  ;;  %v6635_v19 = vld [vmem:[%s6719_s8] ss:$0 sm:$0xff] }
 0xf20   :  { %3893 = vmatprep.mubr.f32.mxu0 %v3359_v25 }
 0xfb7   :  { %v3426_v3 = vpop.f32.mrf.mxu0  ;;  %v3497_v49 = vpop.f32.mrf.mxu1 }
 0xfb8   :  { %v3502_v20 = vadd.f32 %v3426_v3, %v2053_v2  ;;  %v3504_v32 = vadd.f32 %v3497_v49, %v2166_v18 }
 0xfb9   :  { %v3428_v48 = vpop.f32.mrf.mxu0  ;;  %v3499_v56 = vpop.f32.mrf.mxu1 }
 0xfba   :  { %v3824_v44 = vmul.f32 -1.442695, %v3502_v20  ;;  %v3503_v34 = vadd.f32 %v3428_v48, %v2055_v14  ;;  %v3505_v38 = vadd.f32 %v3499_v56, %v2168_v11 }
 0xfbc   :  { %4142 = vpow2.f32 %v3824_v44  ;;  %v3825_v42 = vmul.f32 -1.442695, %v3503_v34  ;;  %v3826_v37 = vmul.f32 -1.442695, %v3505_v38 }
 0xfbe   :  { %4144 = vpow2.f32 %v3825_v42 }
 0xfbf   :  { %4146 = vtanh.f32 %v3504_v32 }
 0xfc0   :  { %4148 = vpow2.f32 %v3826_v37 }
 0xfc9   :  { %v4143_v28 = vpop.eup %4142 }
 0xfca   :  { %v3509_v27 = vadd.f32 1.0, %v4143_v28 }
 0xfcb   :  { %v4145_v52 = vpop.eup %4144 }
 0xfcc   :  { %4150 = vrcp.f32 %v3509_v27  ;;  %v3515_v57 = vadd.f32 1.0, %v4145_v52  ;;  %v4147_v36 = vpop.eup %4146 }
 0xfcd   :  { %v4149_v13 = vpop.eup %4148 }
 0xfce   :  { %4152 = vrcp.f32 %v3515_v57  ;;  %v3522_v24 = vadd.f32 1.0, %v4149_v13 }
 0xfd0   :  { %4154 = vrcp.f32 %v3522_v24 }
 0xfd7   :  { %v3886_v55 = vpop.f32.mrf.mxu0 }
 0xfd8   :  { %v3625_v6 = vadd.f32 %v3886_v55, %v6635_v19 }
 0xfd9   :  { %v4151_v51 = vpop.eup %4150  ;;  %v3619_v58 = vpop.f32.mrf.mxu0 }
 0xfda   :  { %v3526_v4 = vmul.f32 %v4151_v51, %v4147_v36  ;;  %v3620_v9 = vadd.f32 %v6635_v19, %v3619_v58  ;;  %v3662_v35 = vsel %vm3660_vm1, %v3625_v6, -1e+30 }
 0xfdb   :  { %v4153_v45 = vpop.eup %4152  ;;  %3671 = vmax.xlane.f32.xlu0 %v3662_v35  ;;  %v3889_v47 = vpop.f32.mrf.mxu0 }
 0xfdc   :  { %v3525_v10 = vmul.f32 %v4153_v45, %v6567_v7  ;;  %v3635_v17 = vadd.f32 %v3889_v47, %v6635_v19  ;;  %v3661_v26 = vsel %vm3660_vm1, %v3620_v9, -1e+30 }
 0xfdd   :  { %v3629_v8 = vpop.f32.mrf.mxu0  ;;  %v4155_v12 = vpop.eup %4154 }
 0xfde   :  { %v3630_v54 = vadd.f32 %v6635_v19, %v3629_v8  ;;  %v3664_v25 = vsel %vm3660_vm1, %v3635_v17, -1e+30  ;;  %v3527_v21 = vadd.f32 %v3526_v4, %v3525_v10 }
 0xfdf   :  { %3675 = vmax.xlane.f32.xlu1 %v3664_v25  ;;  %v3892_v39 = vpop.f32.mrf.mxu0  ;;  %3669 = vmax.xlane.f32.xlu0 %v3661_v26 }
 0xfe0   :  { %4156 = vtanh.f32 %v3527_v21  ;;  %v3645_v7 = vadd.f32 %v3892_v39, %v6635_v19  ;;  %v3663_v43 = vsel %vm3660_vm1, %v3630_v54, -1e+30 }
 0xfe1   :  { %v3639_v33 = vpop.f32.mrf.mxu0 }
 0xfe2   :  { %v3640_v23 = vadd.f32 %v6635_v19, %v3639_v33  ;;  %v3666_v16 = vsel %vm3660_vm1, %v3645_v7, -1e+30 }
 0xfe3   :  { %3673 = vmax.xlane.f32.xlu1 %v3663_v43 }
 0xfe4   :  { %v3665_v15 = vsel %vm3660_vm1, %v3640_v23, -1e+30 }
 0xfe5   :  { %3677 = vmax.xlane.f32.xlu0 %v3665_v15 }
 0xfe7   :  { %3679 = vmax.xlane.f32.xlu1 %v3666_v16 }
 0xfed   :  { %v4157_v31 = vpop.eup %4156 }
 0xfee   :  { %v3529_v0 = vmul.f32 %v4157_v31, %v4155_v12 }
 0xff0   :  { %3894 = vmatmul.mubr.f32.gmra.mxu0 %v3529_v0 }
0x1064   :  { %v3672_v29 = vpop.xlane.xlu0 %3671 }
0x1065   :  { %v6657_v59 = vsub.f32 %v3662_v35, %v3672_v29 }
0x1067   :  { %v3695_v61 = vmul.f32 1.442695, %v6657_v59 }
0x1068   :  { %v3676_v22 = vpop.xlane.xlu1 %3675  ;;  %v3670_v50 = vpop.xlane.xlu0 %3669 }
0x1069   :  { %v6659_v60 = vsub.f32 %v3661_v26, %v3670_v50  ;;  %v6662_v62 = vsub.f32 %v3664_v25, %v3676_v22  ;;  %4158 = vpow2.f32 %v3695_v61 }
0x106b   :  { %v3693_v1 = vmul.f32 1.442695, %v6659_v60  ;;  %v3699_v5 = vmul.f32 1.442695, %v6662_v62 }
0x106c   :  { %v3674_v40 = vpop.xlane.xlu1 %3673 }
0x106d   :  { %v6665_v2 = vsub.f32 %v3663_v43, %v3674_v40  ;;  %4160 = vpow2.f32 %v3693_v1 }
0x106e   :  { %v3678_v3 = vpop.xlane.xlu0 %3677  ;;  %4162 = vpow2.f32 %v3699_v5 }
0x106f   :  { %v3697_v20 = vmul.f32 1.442695, %v6665_v2  ;;  %v6671_v48 = vsub.f32 %v3665_v15, %v3678_v3 }
0x1070   :  { %v3680_v63 = vpop.xlane.xlu1 %3679 }
0x1071   :  { %v6668_v14 = vsub.f32 %v3666_v16, %v3680_v63  ;;  %4164 = vpow2.f32 %v3697_v20  ;;  %v3701_v34 = vmul.f32 1.442695, %v6671_v48 }
0x1073   :  { %v3703_v44 = vmul.f32 1.442695, %v6668_v14 }
0x1075   :  { %4166 = vpow2.f32 %v3703_v44 }
0x1076   :  { %4168 = vpow2.f32 %v3701_v34  ;;  %v4159_v53 = vpop.eup %4158 }
0x107a   :  { %v4161_v18 = vpop.eup %4160 }
0x107b   :  { %v4163_v32 = vpop.eup %4162 }
0x107e   :  { %v4165_v37 = vpop.eup %4164 }
0x1082   :  { %v4167_v28 = vpop.eup %4166 }
0x1083   :  { %v4169_v27 = vpop.eup %4168 }
0x10b0   :  { %v3895_v49 = vpop.f32.mrf.mxu0 }
0x10b1   :  { %v3655_v42 = vadd.f32 %v3895_v49, %v6635_v19 }
0x10b2   :  { %v3649_v56 = vpop.f32.mrf.mxu0 }
0x10b3   :  { %v3650_v46 = vadd.f32 %v6635_v19, %v3649_v56  ;;  %v3668_v11 = vsel %vm3660_vm1, %v3655_v42, -1e+30 }
0x10b4   :  { %3683 = vmax.xlane.f32.xlu1 %v3668_v11 }
0x10b5   :  { %v3667_v38 = vsel %vm3660_vm1, %v3650_v46, -1e+30 }
0x10b6   :  { %3681 = vmax.xlane.f32.xlu0 %v3667_v38 }
0x10b8   :  { %3711 = vadd.xlane.f32.xlu1 %v4159_v53 }
0x10ba   :  { %3709 = vadd.xlane.f32.xlu0 %v4161_v18 }
0x10bc   :  { %3715 = vadd.xlane.f32.xlu1 %v4163_v32 }
0x10be   :  { %3713 = vadd.xlane.f32.xlu0 %v4165_v37 }
0x10c0   :  { %3719 = vadd.xlane.f32.xlu1 %v4167_v28 }
0x10c2   :  { %3717 = vadd.xlane.f32.xlu0 %v4169_v27 }
0x113d   :  { %v3684_v52 = vpop.xlane.xlu1 %3683 }
0x113e   :  { %v3692_v57 = vsub.f32 %v3668_v11, %v3684_v52 }
0x113f   :  { %v3682_v41 = vpop.xlane.xlu0 %3681 }
0x1140   :  { %v3707_v19 = vmul.f32 1.442695, %v3692_v57  ;;  %v3691_v36 = vsub.f32 %v3667_v38, %v3682_v41 }
0x1141   :  { %v3712_v30 = vpop.xlane.xlu1 %3711 }
0x1142   :  { %4170 = vpow2.f32 %v3707_v19  ;;  %v3705_v55 = vmul.f32 1.442695, %v3691_v36 }
0x1143   :  { %4172 = vlog2.f32 %v3712_v30  ;;  %v3710_v13 = vpop.xlane.xlu0 %3709 }
0x1144   :  { %4174 = vpow2.f32 %v3705_v55 }
0x1145   :  { %4176 = vlog2.f32 %v3710_v13  ;;  %v3716_v6 = vpop.xlane.xlu1 %3715 }
0x1146   :  { %4178 = vlog2.f32 %v3716_v6 }
0x1147   :  { %v3714_v51 = vpop.xlane.xlu0 %3713 }
0x1148   :  { %4180 = vlog2.f32 %v3714_v51 }
0x1149   :  { %v3720_v58 = vpop.xlane.xlu1 %3719 }
0x114a   :  { %4182 = vlog2.f32 %v3720_v58 }
0x114b   :  { %v3718_v4 = vpop.xlane.xlu0 %3717 }
0x114c   :  { %4184 = vlog2.f32 %v3718_v4 }
0x114f   :  { %v4171_v9 = vpop.eup %4170 }
0x1150   :  { %v4173_v35 = vpop.eup %4172  ;;  %3723 = vadd.xlane.f32.xlu1 %v4171_v9 }
0x1151   :  { %v4175_v45 = vpop.eup %4174  ;;  %v3728_v24 = vmul.f32 0.6931472, %v4173_v35 }
0x1152   :  { %v4177_v47 = vpop.eup %4176  ;;  %3721 = vadd.xlane.f32.xlu0 %v4175_v45 }
0x1153   :  { %v4179_v10 = vpop.eup %4178  ;;  %v3742_v17 = vsub.f32 %v6657_v59, %v3728_v24  ;;  %v3726_v8 = vmul.f32 0.6931472, %v4177_v47 }
0x1154   :  { %v3732_v54 = vmul.f32 0.6931472, %v4179_v10 }
0x1155   :  { %v4181_v25 = vpop.eup %4180  ;;  %3750 = vst [vmem:[%s6720_s9 + $0x8] sm:$0xff] %v3742_v17  ;;  %v3741_v26 = vsub.f32 %v6659_v60, %v3726_v8 }
0x1156   :  { %v3744_v21 = vsub.f32 %v6662_v62, %v3732_v54  ;;  %v3730_v39 = vmul.f32 0.6931472, %v4181_v25 }
0x1157   :  { %v4183_v33 = vpop.eup %4182  ;;  %3749 = vst [vmem:[%s6720_s9] sm:$0xff] %v3741_v26 }
0x1158   :  { %3752 = vst [vmem:[%s6720_s9 + $0x18] sm:$0xff] %v3744_v21  ;;  %v3743_v7 = vsub.f32 %v6665_v2, %v3730_v39  ;;  %v3736_v23 = vmul.f32 0.6931472, %v4183_v33 }
0x1159   :  { %v4185_v43 = vpop.eup %4184 }
0x115a   :  { %3751 = vst [vmem:[%s6720_s9 + $0x10] sm:$0xff] %v3743_v7  ;;  %v3746_v15 = vsub.f32 %v6668_v14, %v3736_v23  ;;  %v3734_v16 = vmul.f32 0.6931472, %v4185_v43 }
0x115c   :  { %3754 = vst [vmem:[%s6720_s9 + $0x28] sm:$0xff] %v3746_v15  ;;  %v3745_v12 = vsub.f32 %v6671_v48, %v3734_v16 }
0x115e   :  { %3753 = vst [vmem:[%s6720_s9 + $0x20] sm:$0xff] %v3745_v12 }
0x11d9   :  { %v3724_v31 = vpop.xlane.xlu1 %3723 }
0x11da   :  { %4186 = vlog2.f32 %v3724_v31 }
0x11db   :  { %v3722_v0 = vpop.xlane.xlu0 %3721 }
0x11dc   :  { %4188 = vlog2.f32 %v3722_v0 }
0x11e7   :  { %v4187_v29 = vpop.eup %4186 }
0x11e8   :  { %v3740_v22 = vmul.f32 0.6931472, %v4187_v29 }
0x11e9   :  { %v4189_v50 = vpop.eup %4188 }
0x11ea   :  { %v3748_v40 = vsub.f32 %v3692_v57, %v3740_v22  ;;  %v3738_v59 = vmul.f32 0.6931472, %v4189_v50 }
0x11ec   :  { %3756 = vst [vmem:[%s6720_s9 + $0x38] sm:$0xff] %v3748_v40  ;;  %v3747_v60 = vsub.f32 %v3691_v36, %v3738_v59 }
0x11ee   :  { %3755 = vst [vmem:[%s6720_s9 + $0x30] sm:$0xff] %v3747_v60 }
0x11ef   :  { %3761 = vsyncpa [#allocation3], 1 }
0x11f0   :  { %3762 = vsyncpa [#allocation5], 1 }

</bundles_post_ra>
